<compile_context>
chip_gen: v7x
topology: tpu7x:2x2x1
jax: 0.10.0
libtpu: 0.0.40
codegen_flags: <defaults>
</compile_context>

<pallas_src>
import jax
import jax.numpy as jnp
from jax.experimental import pallas as pl
from jax.experimental.pallas import tpu as pltpu


def _conv3x3_im2col(pad_ref, w, H, W, C):
    """One 3x3 'SAME' conv as a single MXU matmul.

    pad_ref: (H+2, W+2, C) VMEM ref holding the zero-halo padded,
             already-activated input.
    w:       (9*C, Cout) value, rows ordered (ky*3 + kx)*C + cin.
    Returns  (H*W, Cout) float32 accumulator (bias NOT added).
    """
    taps = []
    for t in range(9):                                   # static unroll: build im2col slab
        ky, kx = t // 3, t % 3
        taps.append(pad_ref[ky:ky + H, kx:kx + W, :].reshape(H * W, C))
    slab = jnp.concatenate(taps, axis=-1)                # (H*W, 9*C): taps folded into K
    return jnp.dot(slab, w, preferred_element_type=jnp.float32)


def _residual_unit_kernel(x_ref, w1_ref, b1_ref, w2_ref, b2_ref, out_ref, pad_ref):
    # x_ref:   (H, W, C)        original (pre-activation) input block
    # w*_ref:  (9*C, C)         im2col weight matrices, row = (ky*3+kx)*C + cin
    # b*_ref:  (1, C)           biases
    # out_ref: (H, W, C)
    # pad_ref: (H+2, W+2, C)    shared padded VMEM scratch (zero halo)
    H, W, C = out_ref.shape

    x = x_ref[...]                                       # loaded once; reused for residual

    # ---- zero ONLY the halo (interior is fully overwritten below).
    zrow = jnp.zeros((1, W + 2, C), pad_ref.dtype)
    zcol = jnp.zeros((H, 1, C), pad_ref.dtype)
    pad_ref[0:1, :, :] = zrow
    pad_ref[H + 1:H + 2, :, :] = zrow
    pad_ref[1:H + 1, 0:1, :] = zcol
    pad_ref[1:H + 1, W + 1:W + 2, :] = zcol

    # ---- stage 0: relu(x) into the padded interior (relu(0)==0, so the zero
    #      halo is exactly the implicit conv padding applied after the ReLU).
    pad_ref[1:H + 1, 1:W + 1, :] = jnp.maximum(x, 0.0)

    # ---- stage 1: h = conv3x3(relu(x)) + b1 ; relu(h) reuses the SAME scratch
    #      (all reads of pad_ref feeding `h` happen before this store).
    h = _conv3x3_im2col(pad_ref, w1_ref[...], H, W, C) + b1_ref[...]   # (H*W, C) f32
    pad_ref[1:H + 1, 1:W + 1, :] = jnp.maximum(h, 0.0).reshape(H, W, C)

    # ---- stage 2: out = conv3x3(relu(h)) + b2 + x  (pre-activation residual).
    o = _conv3x3_im2col(pad_ref, w2_ref[...], H, W, C) + b2_ref[...]   # (H*W, C) f32
    out_ref[...] = (o.reshape(H, W, C) + x).astype(out_ref.dtype)


def residual_unit_forward(x_nchw, params):
    """Pallas forward of _residual_unit.  x_nchw: (N, C, H, W) float32."""
    w1, b1, w2, b2 = params                              # w: (3, 3, Cin, Cout)
    x = jnp.transpose(x_nchw, (0, 2, 3, 1)).astype(jnp.float32)   # -> NHWC
    N, H, W, C = x.shape

    # im2col weight matrices: (3,3,Cin,Cout) -> (9*Cin, Cout);
    # row-major flatten gives row index (ky*3+kx)*Cin + cin, matching the slab.
    w1m = w1.reshape(9 * C, C).astype(jnp.float32)
    w2m = w2.reshape(9 * C, C).astype(jnp.float32)
    b1v = b1.reshape(1, C).astype(jnp.float32)
    b2v = b2.reshape(1, C).astype(jnp.float32)

    out = pl.pallas_call(
        _residual_unit_kernel,
        out_shape=jax.ShapeDtypeStruct((N, H, W, C), jnp.float32),
        grid=(N,),
        in_specs=[
            pl.BlockSpec((None, H, W, C), lambda n: (n, 0, 0, 0)),   # x
            pl.BlockSpec((9 * C, C), lambda n: (0, 0)),              # w1 (grid-invariant)
            pl.BlockSpec((1, C), lambda n: (0, 0)),                  # b1
            pl.BlockSpec((9 * C, C), lambda n: (0, 0)),              # w2
            pl.BlockSpec((1, C), lambda n: (0, 0)),                  # b2
        ],
        out_specs=pl.BlockSpec((None, H, W, C), lambda n: (n, 0, 0, 0)),
        scratch_shapes=[
            pltpu.VMEM((H + 2, W + 2, C), jnp.float32),   # shared padded scratch
        ],
        compiler_params=pltpu.CompilerParams(
            dimension_semantics=("parallel",),            # batch axis -> megacore sharding
            vmem_limit_bytes=32 * 1024 * 1024,
        ),
    )(x, w1m, b1v, w2m, b2v)

    return jnp.transpose(out, (0, 3, 1, 2))               # -> NCHW


def init_params(key, nb_filter):
    # Deterministic init with PyTorch Conv2d-style uniform bounds (fan_in = C*3*3).
    k1, k2, k3, k4 = jax.random.split(key, 4)
    bound = 1.0 / float(jnp.sqrt(nb_filter * 9))
    w1 = jax.random.uniform(k1, (3, 3, nb_filter, nb_filter), jnp.float32, -bound, bound)
    b1 = jax.random.uniform(k2, (nb_filter,), jnp.float32, -bound, bound)
    w2 = jax.random.uniform(k3, (3, 3, nb_filter, nb_filter), jnp.float32, -bound, bound)
    b2 = jax.random.uniform(k4, (nb_filter,), jnp.float32, -bound, bound)
    return w1, b1, w2, b2


def _reference_forward(x_nchw, params):
    # Pure-JAX (XLA) reference for correctness checking.
    w1, b1, w2, b2 = params

    def conv(x, w, b):
        y = jax.lax.conv_general_dilated(
            x, w, window_strides=(1, 1), padding="SAME",
            dimension_numbers=("NCHW", "HWIO", "NCHW"))
        return y + b[None, :, None, None]

    h = conv(jnp.maximum(x_nchw, 0.0), w1, b1)
    h = conv(jnp.maximum(h, 0.0), w2, b2)
    return h + x_nchw


if __name__ == "__main__":
    key = jax.random.PRNGKey(0)
    kx, kp = jax.random.split(key)

    N, C, H, W = 2, 4, 16, 16                      # small NCHW input, nb_filter = 4
    x = jax.random.normal(kx, (N, C, H, W), jnp.float32)
    params = init_params(kp, C)

    out = residual_unit_forward(x, params)
    out = jax.block_until_ready(out)

    ref = _reference_forward(x, params)
    assert out.shape == (N, C, H, W)
    assert jnp.allclose(out, ref, atol=1e-4, rtol=1e-4), "mismatch vs XLA reference"
    print("KERNEL_OK")
</pallas_src>

<mosaic_0001>
module attributes {stable_mosaic.version = 11 : i64} {
  func.func @_residual_unit_kernel(%arg0: i32, %arg1: memref<1x16x16x4xf32, #tpu.memory_space<vmem>>, %arg2: memref<36x4xf32, #tpu.memory_space<vmem>>, %arg3: memref<1x4xf32, #tpu.memory_space<vmem>>, %arg4: memref<36x4xf32, #tpu.memory_space<vmem>>, %arg5: memref<1x4xf32, #tpu.memory_space<vmem>>, %arg6: memref<1x16x16x4xf32, #tpu.memory_space<vmem>>, %arg7: memref<18x18x4xf32, #tpu.memory_space<vmem>>) attributes {dimension_semantics = [#tpu.dimension_semantics<parallel>], iteration_bounds = array<i64: 2>, scalar_prefetch = 0 : i64, scratch_operands = 1 : i64, tpu.core_type = #tpu.core_type<tc>, window_params = [{transform_indices = @transform_0, window_bounds = array<i64: 1, 16, 16, 4>}, {pipeline_mode = #tpu.pipeline_mode<synchronous>, transform_indices = @transform_1, window_bounds = array<i64: 36, 4>}, {pipeline_mode = #tpu.pipeline_mode<synchronous>, transform_indices = @transform_2, window_bounds = array<i64: 1, 4>}, {pipeline_mode = #tpu.pipeline_mode<synchronous>, transform_indices = @transform_3, window_bounds = array<i64: 36, 4>}, {pipeline_mode = #tpu.pipeline_mode<synchronous>, transform_indices = @transform_4, window_bounds = array<i64: 1, 4>}, {transform_indices = @transform_5, window_bounds = array<i64: 1, 16, 16, 4>}]} {
    %c0 = arith.constant 0 : index
    %c0_0 = arith.constant 0 : index
    %c0_1 = arith.constant 0 : index
    %c0_2 = arith.constant 0 : index
    %0 = vector.load %arg1[%c0, %c0_0, %c0_1, %c0_2] : memref<1x16x16x4xf32, #tpu.memory_space<vmem>>, vector<1x16x16x4xf32>
    %1 = vector.shape_cast %0 : vector<1x16x16x4xf32> to vector<16x16x4xf32>
    %cst = arith.constant 0.000000e+00 : f32
    %2 = vector.broadcast %cst : f32 to vector<1x18x4xf32>
    %cst_3 = arith.constant 0.000000e+00 : f32
    %3 = vector.broadcast %cst_3 : f32 to vector<16x1x4xf32>
    %c0_4 = arith.constant 0 : index
    %c0_5 = arith.constant 0 : index
    %c0_6 = arith.constant 0 : index
    %4 = vector.load %arg7[%c0_4, %c0_5, %c0_6] : memref<18x18x4xf32, #tpu.memory_space<vmem>>, vector<1x18x4xf32>
    tpu.vector_store %arg7[%c0_4, %c0_5, %c0_6], %2 {strides = array<i32>} : memref<18x18x4xf32, #tpu.memory_space<vmem>>, vector<1x18x4xf32>,
    %c17 = arith.constant 17 : index
    %c0_7 = arith.constant 0 : index
    %c0_8 = arith.constant 0 : index
    %5 = vector.load %arg7[%c17, %c0_7, %c0_8] : memref<18x18x4xf32, #tpu.memory_space<vmem>>, vector<1x18x4xf32>
    tpu.vector_store %arg7[%c17, %c0_7, %c0_8], %2 {strides = array<i32>} : memref<18x18x4xf32, #tpu.memory_space<vmem>>, vector<1x18x4xf32>,
    %c1 = arith.constant 1 : index
    %c0_9 = arith.constant 0 : index
    %c0_10 = arith.constant 0 : index
    %6 = vector.load %arg7[%c1, %c0_9, %c0_10] : memref<18x18x4xf32, #tpu.memory_space<vmem>>, vector<16x1x4xf32>
    tpu.vector_store %arg7[%c1, %c0_9, %c0_10], %3 {strides = array<i32>} : memref<18x18x4xf32, #tpu.memory_space<vmem>>, vector<16x1x4xf32>,
    %c1_11 = arith.constant 1 : index
    %c17_12 = arith.constant 17 : index
    %c0_13 = arith.constant 0 : index
    %7 = vector.load %arg7[%c1_11, %c17_12, %c0_13] : memref<18x18x4xf32, #tpu.memory_space<vmem>>, vector<16x1x4xf32>
    tpu.vector_store %arg7[%c1_11, %c17_12, %c0_13], %3 {strides = array<i32>} : memref<18x18x4xf32, #tpu.memory_space<vmem>>, vector<16x1x4xf32>,
    %cst_14 = arith.constant 0.000000e+00 : f32
    %8 = vector.broadcast %cst_14 : f32 to vector<16x16x4xf32>
    %9 = arith.maximumf %1, %8 : vector<16x16x4xf32>
    %c1_15 = arith.constant 1 : index
    %c1_16 = arith.constant 1 : index
    %c0_17 = arith.constant 0 : index
    %10 = vector.load %arg7[%c1_15, %c1_16, %c0_17] : memref<18x18x4xf32, #tpu.memory_space<vmem>>, vector<16x16x4xf32>
    tpu.vector_store %arg7[%c1_15, %c1_16, %c0_17], %9 {strides = array<i32>} : memref<18x18x4xf32, #tpu.memory_space<vmem>>, vector<16x16x4xf32>,
    %c0_18 = arith.constant 0 : index
    %c0_19 = arith.constant 0 : index
    %11 = vector.load %arg2[%c0_18, %c0_19] : memref<36x4xf32, #tpu.memory_space<vmem>>, vector<36x4xf32>
    %c0_20 = arith.constant 0 : index
    %c0_21 = arith.constant 0 : index
    %c0_22 = arith.constant 0 : index
    %12 = vector.load %arg7[%c0_20, %c0_21, %c0_22] : memref<18x18x4xf32, #tpu.memory_space<vmem>>, vector<16x16x4xf32>
    %13 = vector.shape_cast %12 : vector<16x16x4xf32> to vector<256x4xf32>
    %c0_23 = arith.constant 0 : index
    %c1_24 = arith.constant 1 : index
    %c0_25 = arith.constant 0 : index
    %14 = vector.load %arg7[%c0_23, %c1_24, %c0_25] : memref<18x18x4xf32, #tpu.memory_space<vmem>>, vector<16x16x4xf32>
    %15 = vector.shape_cast %14 : vector<16x16x4xf32> to vector<256x4xf32>
    %c0_26 = arith.constant 0 : index
    %c2 = arith.constant 2 : index
    %c0_27 = arith.constant 0 : index
    %16 = vector.load %arg7[%c0_26, %c2, %c0_27] : memref<18x18x4xf32, #tpu.memory_space<vmem>>, vector<16x16x4xf32>
    %17 = vector.shape_cast %16 : vector<16x16x4xf32> to vector<256x4xf32>
    %c1_28 = arith.constant 1 : index
    %c0_29 = arith.constant 0 : index
    %c0_30 = arith.constant 0 : index
    %18 = vector.load %arg7[%c1_28, %c0_29, %c0_30] : memref<18x18x4xf32, #tpu.memory_space<vmem>>, vector<16x16x4xf32>
    %19 = vector.shape_cast %18 : vector<16x16x4xf32> to vector<256x4xf32>
    %c1_31 = arith.constant 1 : index
    %c1_32 = arith.constant 1 : index
    %c0_33 = arith.constant 0 : index
    %20 = vector.load %arg7[%c1_31, %c1_32, %c0_33] : memref<18x18x4xf32, #tpu.memory_space<vmem>>, vector<16x16x4xf32>
    %21 = vector.shape_cast %20 : vector<16x16x4xf32> to vector<256x4xf32>
    %c1_34 = arith.constant 1 : index
    %c2_35 = arith.constant 2 : index
    %c0_36 = arith.constant 0 : index
    %22 = vector.load %arg7[%c1_34, %c2_35, %c0_36] : memref<18x18x4xf32, #tpu.memory_space<vmem>>, vector<16x16x4xf32>
    %23 = vector.shape_cast %22 : vector<16x16x4xf32> to vector<256x4xf32>
    %c2_37 = arith.constant 2 : index
    %c0_38 = arith.constant 0 : index
    %c0_39 = arith.constant 0 : index
    %24 = vector.load %arg7[%c2_37, %c0_38, %c0_39] : memref<18x18x4xf32, #tpu.memory_space<vmem>>, vector<16x16x4xf32>
    %25 = vector.shape_cast %24 : vector<16x16x4xf32> to vector<256x4xf32>
    %c2_40 = arith.constant 2 : index
    %c1_41 = arith.constant 1 : index
    %c0_42 = arith.constant 0 : index
    %26 = vector.load %arg7[%c2_40, %c1_41, %c0_42] : memref<18x18x4xf32, #tpu.memory_space<vmem>>, vector<16x16x4xf32>
    %27 = vector.shape_cast %26 : vector<16x16x4xf32> to vector<256x4xf32>
    %c2_43 = arith.constant 2 : index
    %c2_44 = arith.constant 2 : index
    %c0_45 = arith.constant 0 : index
    %28 = vector.load %arg7[%c2_43, %c2_44, %c0_45] : memref<18x18x4xf32, #tpu.memory_space<vmem>>, vector<16x16x4xf32>
    %29 = vector.shape_cast %28 : vector<16x16x4xf32> to vector<256x4xf32>
    %30 = tpu.concatenate %13, %15, %17, %19, %21, %23, %25, %27, %29 in 1 : vector<256x4xf32>, vector<256x4xf32>, vector<256x4xf32>, vector<256x4xf32>, vector<256x4xf32>, vector<256x4xf32>, vector<256x4xf32>, vector<256x4xf32>, vector<256x4xf32> -> vector<256x36xf32>
    %cst_46 = arith.constant dense<0.000000e+00> : vector<256x4xf32>
    %31 = tpu.matmul %30, %11, %cst_46 {dimension_numbers = #tpu.dot_dimension_numbers<[1], [0], [0], [1], [0, 0, 1, 1], [], []>} : vector<256x36xf32>, vector<36x4xf32>, vector<256x4xf32> -> vector<256x4xf32>
    %c0_47 = arith.constant 0 : index
    %c0_48 = arith.constant 0 : index
    %32 = vector.load %arg3[%c0_47, %c0_48] : memref<1x4xf32, #tpu.memory_space<vmem>>, vector<1x4xf32>
    %33 = vector.broadcast %32 : vector<1x4xf32> to vector<256x4xf32>
    %34 = arith.addf %31, %33 : vector<256x4xf32>
    %cst_49 = arith.constant 0.000000e+00 : f32
    %35 = vector.broadcast %cst_49 : f32 to vector<256x4xf32>
    %36 = arith.maximumf %34, %35 : vector<256x4xf32>
    %37 = vector.shape_cast %36 : vector<256x4xf32> to vector<16x16x4xf32>
    %c1_50 = arith.constant 1 : index
    %c1_51 = arith.constant 1 : index
    %c0_52 = arith.constant 0 : index
    %38 = vector.load %arg7[%c1_50, %c1_51, %c0_52] : memref<18x18x4xf32, #tpu.memory_space<vmem>>, vector<16x16x4xf32>
    tpu.vector_store %arg7[%c1_50, %c1_51, %c0_52], %37 {strides = array<i32>} : memref<18x18x4xf32, #tpu.memory_space<vmem>>, vector<16x16x4xf32>,
    %c0_53 = arith.constant 0 : index
    %c0_54 = arith.constant 0 : index
    %39 = vector.load %arg4[%c0_53, %c0_54] : memref<36x4xf32, #tpu.memory_space<vmem>>, vector<36x4xf32>
    %c0_55 = arith.constant 0 : index
    %c0_56 = arith.constant 0 : index
    %c0_57 = arith.constant 0 : index
    %40 = vector.load %arg7[%c0_55, %c0_56, %c0_57] : memref<18x18x4xf32, #tpu.memory_space<vmem>>, vector<16x16x4xf32>
    %41 = vector.shape_cast %40 : vector<16x16x4xf32> to vector<256x4xf32>
    %c0_58 = arith.constant 0 : index
    %c1_59 = arith.constant 1 : index
    %c0_60 = arith.constant 0 : index
    %42 = vector.load %arg7[%c0_58, %c1_59, %c0_60] : memref<18x18x4xf32, #tpu.memory_space<vmem>>, vector<16x16x4xf32>
    %43 = vector.shape_cast %42 : vector<16x16x4xf32> to vector<256x4xf32>
    %c0_61 = arith.constant 0 : index
    %c2_62 = arith.constant 2 : index
    %c0_63 = arith.constant 0 : index
    %44 = vector.load %arg7[%c0_61, %c2_62, %c0_63] : memref<18x18x4xf32, #tpu.memory_space<vmem>>, vector<16x16x4xf32>
    %45 = vector.shape_cast %44 : vector<16x16x4xf32> to vector<256x4xf32>
    %c1_64 = arith.constant 1 : index
    %c0_65 = arith.constant 0 : index
    %c0_66 = arith.constant 0 : index
    %46 = vector.load %arg7[%c1_64, %c0_65, %c0_66] : memref<18x18x4xf32, #tpu.memory_space<vmem>>, vector<16x16x4xf32>
    %47 = vector.shape_cast %46 : vector<16x16x4xf32> to vector<256x4xf32>
    %c1_67 = arith.constant 1 : index
    %c1_68 = arith.constant 1 : index
    %c0_69 = arith.constant 0 : index
    %48 = vector.load %arg7[%c1_67, %c1_68, %c0_69] : memref<18x18x4xf32, #tpu.memory_space<vmem>>, vector<16x16x4xf32>
    %49 = vector.shape_cast %48 : vector<16x16x4xf32> to vector<256x4xf32>
    %c1_70 = arith.constant 1 : index
    %c2_71 = arith.constant 2 : index
    %c0_72 = arith.constant 0 : index
    %50 = vector.load %arg7[%c1_70, %c2_71, %c0_72] : memref<18x18x4xf32, #tpu.memory_space<vmem>>, vector<16x16x4xf32>
    %51 = vector.shape_cast %50 : vector<16x16x4xf32> to vector<256x4xf32>
    %c2_73 = arith.constant 2 : index
    %c0_74 = arith.constant 0 : index
    %c0_75 = arith.constant 0 : index
    %52 = vector.load %arg7[%c2_73, %c0_74, %c0_75] : memref<18x18x4xf32, #tpu.memory_space<vmem>>, vector<16x16x4xf32>
    %53 = vector.shape_cast %52 : vector<16x16x4xf32> to vector<256x4xf32>
    %c2_76 = arith.constant 2 : index
    %c1_77 = arith.constant 1 : index
    %c0_78 = arith.constant 0 : index
    %54 = vector.load %arg7[%c2_76, %c1_77, %c0_78] : memref<18x18x4xf32, #tpu.memory_space<vmem>>, vector<16x16x4xf32>
    %55 = vector.shape_cast %54 : vector<16x16x4xf32> to vector<256x4xf32>
    %c2_79 = arith.constant 2 : index
    %c2_80 = arith.constant 2 : index
    %c0_81 = arith.constant 0 : index
    %56 = vector.load %arg7[%c2_79, %c2_80, %c0_81] : memref<18x18x4xf32, #tpu.memory_space<vmem>>, vector<16x16x4xf32>
    %57 = vector.shape_cast %56 : vector<16x16x4xf32> to vector<256x4xf32>
    %58 = tpu.concatenate %41, %43, %45, %47, %49, %51, %53, %55, %57 in 1 : vector<256x4xf32>, vector<256x4xf32>, vector<256x4xf32>, vector<256x4xf32>, vector<256x4xf32>, vector<256x4xf32>, vector<256x4xf32>, vector<256x4xf32>, vector<256x4xf32> -> vector<256x36xf32>
    %cst_82 = arith.constant dense<0.000000e+00> : vector<256x4xf32>
    %59 = tpu.matmul %58, %39, %cst_82 {dimension_numbers = #tpu.dot_dimension_numbers<[1], [0], [0], [1], [0, 0, 1, 1], [], []>} : vector<256x36xf32>, vector<36x4xf32>, vector<256x4xf32> -> vector<256x4xf32>
    %c0_83 = arith.constant 0 : index
    %c0_84 = arith.constant 0 : index
    %60 = vector.load %arg5[%c0_83, %c0_84] : memref<1x4xf32, #tpu.memory_space<vmem>>, vector<1x4xf32>
    %61 = vector.broadcast %60 : vector<1x4xf32> to vector<256x4xf32>
    %62 = arith.addf %59, %61 : vector<256x4xf32>
    %63 = vector.shape_cast %62 : vector<256x4xf32> to vector<16x16x4xf32>
    %64 = arith.addf %63, %1 : vector<16x16x4xf32>
    %c0_85 = arith.constant 0 : index
    %c0_86 = arith.constant 0 : index
    %c0_87 = arith.constant 0 : index
    %c0_88 = arith.constant 0 : index
    %65 = vector.load %arg6[%c0_85, %c0_86, %c0_87, %c0_88] : memref<1x16x16x4xf32, #tpu.memory_space<vmem>>, vector<1x16x16x4xf32>
    %66 = vector.shape_cast %65 : vector<1x16x16x4xf32> to vector<16x16x4xf32>
    %67 = vector.shape_cast %64 : vector<16x16x4xf32> to vector<1x16x16x4xf32>
    tpu.vector_store %arg6[%c0_85, %c0_86, %c0_87, %c0_88], %67 {strides = array<i32>} : memref<1x16x16x4xf32, #tpu.memory_space<vmem>>, vector<1x16x16x4xf32>,
    return
  }
  func.func @transform_0(%arg0: i32) -> (i32, i32, i32, i32) {
    %c0_i32 = arith.constant 0 : i32
    %c0_i32_0 = arith.constant 0 : i32
    %c0_i32_1 = arith.constant 0 : i32
    %c0_i32_2 = arith.constant 0 : i32
    return %arg0, %c0_i32, %c0_i32_0, %c0_i32_1 : i32, i32, i32, i32
  }
  func.func @transform_1(%arg0: i32) -> (i32, i32) {
    %c0_i32 = arith.constant 0 : i32
    %c0_i32_0 = arith.constant 0 : i32
    %c0_i32_1 = arith.constant 0 : i32
    return %c0_i32, %c0_i32_0 : i32, i32
  }
  func.func @transform_2(%arg0: i32) -> (i32, i32) {
    %c0_i32 = arith.constant 0 : i32
    %c0_i32_0 = arith.constant 0 : i32
    %c0_i32_1 = arith.constant 0 : i32
    return %c0_i32, %c0_i32_0 : i32, i32
  }
  func.func @transform_3(%arg0: i32) -> (i32, i32) {
    %c0_i32 = arith.constant 0 : i32
    %c0_i32_0 = arith.constant 0 : i32
    %c0_i32_1 = arith.constant 0 : i32
    return %c0_i32, %c0_i32_0 : i32, i32
  }
  func.func @transform_4(%arg0: i32) -> (i32, i32) {
    %c0_i32 = arith.constant 0 : i32
    %c0_i32_0 = arith.constant 0 : i32
    %c0_i32_1 = arith.constant 0 : i32
    return %c0_i32, %c0_i32_0 : i32, i32
  }
  func.func @transform_5(%arg0: i32) -> (i32, i32, i32, i32) {
    %c0_i32 = arith.constant 0 : i32
    %c0_i32_0 = arith.constant 0 : i32
    %c0_i32_1 = arith.constant 0 : i32
    %c0_i32_2 = arith.constant 0 : i32
    return %arg0, %c0_i32, %c0_i32_0, %c0_i32_1 : i32, i32, i32, i32
  }
}

</mosaic_0001>

<bundles_post_ra>
// kernel: tpu_custom_call.1
= control target key start
LH: loop header
LB: loop body
LE: loop exit
PB: predicated region body
PF: predicated region fallthrough
CT: control target
= control target key end

     0   :  { %s4785_s18 = smov 0   ;;  %s7730_s0 = inlined_call_operand.vmem [shape: f32[2,16,16,4], index: 0, kind: input, shape index: {}]   ;;  %s7731_s1 = inlined_call_operand.vmem [shape: f32[36,4], index: 1, kind: input, shape index: {}]   ;;  %s7732_s2 = inlined_call_operand.vmem [shape: f32[1,4], index: 2, kind: input, shape index: {}]   ;;  %s7733_s3 = inlined_call_operand.vmem [shape: f32[36,4], index: 3, kind: input, shape index: {}]   ;;  %s7734_s4 = inlined_call_operand.vmem [shape: f32[1,4], index: 4, kind: input, shape index: {}]   ;;  %s7735_s5 = inlined_call_operand.vmem [shape: f32[2,16,16,4], index: 5, kind: output, shape index: {}]  }
   0x1 LB: > { %s4365_s19 = sadd.s32 4294967295, %s4744_s18   ;;  %p4369_p0 = scmp.ge.s32.totalorder %s4744_s18, 1  ;;  %s4744_s18 = sphi %s4785_s18, %s15_s18  }
   0x2   : > { %p187_p1 = scmp.lt.s32.totalorder %s4744_s18, 3 }
   0x4   : > { %p188_p2 = pnand %p4369_p0, %p187_p1 }
   0x6   : > { %191 = sbr.rel (%p188_p2) target bundleno = 1665 (0x681), region = 40 }
   0xd   : > { %vm257_vm0 = vcmask 31744   ;;  %vm260_vm1 = vcmask 25600   ;;  %p4795_p3 = scmp.lt.s32.totalorder %s4365_s19, 1  ;;  %vm267_vm2 = vcmask 24576   ;;  %v4746_v0 = vmov 0.0   ;;  %s4747_s25 = smov 4  }
   0xe   : > { %258 = vst.msk [vmem:[#allocation2] sm:$0xff] %vm257_vm0, %v4746_v0  ;;  %259 = vst.msk [vmem:[#allocation2 + $0x8] sm:$0xff] %vm257_vm0, %v4746_v0  ;;  %s4748_s26 = smov 8   ;;  %s4749_s27 = smov 12   ;;  %vm2049_vm3 = vcmask 1043456   ;;  %vm1714_vm4 = vcmask 64512  }
   0xf   : > { %263 = vst.msk [vmem:[#allocation2 + $0x198] sm:$0xff] %vm257_vm0, %v4746_v0  ;;  %264 = vst.msk [vmem:[#allocation2 + $0x1a0] sm:$0xff] %vm257_vm0, %v4746_v0  ;;  %s8254_s19 = smov (!%p4795_p3, %s4365_s19), 1  ;;  %s4750_s28 = smov 16   ;;  %vm1747_vm5 = vcmask 97280   ;;  %vm1780_vm6 = vcmask 130048  }
  0x10   : > { %261 = vst.msk [vmem:[#allocation2 + $0x10] sm:$0x3] %vm260_vm1, %v4746_v0  ;;  %265 = vst.msk [vmem:[#allocation2 + $0x1a8] sm:$0x3] %vm260_vm1, %v4746_v0  ;;  %s4444_s21 = sshll.u32 %s8254_s19, 8  ;;  %s4751_s29 = smov 20  }
  0x11   : > { %284 = vst.msk [vmem:[#allocation2 + $0x29] sm:$0x1] %vm267_vm2, %v4746_v0  ;;  %268 = vst.msk [vmem:[#allocation2 + $0x18] sm:$0x1] %vm267_vm2, %v4746_v0  ;;  %s4847_s24 = scalar_lea.vmem %s7730_s0, %s4444_s21  ;;  %s4752_s30 = smov 24   ;;  %vm1813_vm7 = vcmask 162816  }
  0x12   : > { %269 = vst.msk [vmem:[#allocation2 + $0x30] sm:$0x1] %vm267_vm2, %v4746_v0  ;;  %270 = vst.msk [vmem:[#allocation2 + $0x48] sm:$0x1] %vm267_vm2, %v4746_v0  ;;  %v227_v1 = vld [vmem:[%s4847_s24 + $0x10] sm:$0xff]  ;;  %v225_v2 = vld [vmem:[%s4847_s24] sm:$0xff]  ;;  %s7489_s13 = scalar_lea.vmem %s7735_s5, %s4444_s21 }
  0x13   : > { %271 = vst.msk [vmem:[#allocation2 + $0x60] sm:$0x1] %vm267_vm2, %v4746_v0  ;;  %272 = vst.msk [vmem:[#allocation2 + $0x78] sm:$0x1] %vm267_vm2, %v4746_v0  ;;  %v229_v3 = vld [vmem:[%s4847_s24 + $0x20] sm:$0xff]  ;;  %v302_v4 = vmax.f32 %v227_v1, 0.0 }
  0x14   : > { %273 = vst.msk [vmem:[#allocation2 + $0x90] sm:$0x1] %vm267_vm2, %v4746_v0  ;;  %274 = vst.msk [vmem:[#allocation2 + $0xa8] sm:$0x1] %vm267_vm2, %v4746_v0  ;;  %v300_v5 = vmax.f32 %v225_v2, 0.0  ;;  %v304_v6 = vmax.f32 %v229_v3, 0.0 }
  0x15   : > { %275 = vst.msk [vmem:[#allocation2 + $0xc0] sm:$0x1] %vm267_vm2, %v4746_v0  ;;  %276 = vst.msk [vmem:[#allocation2 + $0xd8] sm:$0x1] %vm267_vm2, %v4746_v0  ;;  %v226_v7 = vld [vmem:[%s4847_s24 + $0x8] sm:$0xff]  ;;  %v231_v8 = vld [vmem:[%s4847_s24 + $0x30] sm:$0xff] }
  0x16   : > { %277 = vst.msk [vmem:[#allocation2 + $0xf0] sm:$0x1] %vm267_vm2, %v4746_v0  ;;  %278 = vst.msk [vmem:[#allocation2 + $0x108] sm:$0x1] %vm267_vm2, %v4746_v0  ;;  %v228_v9 = vld [vmem:[%s4847_s24 + $0x18] sm:$0xff]  ;;  %v401_v10 = vld [vmem:[#allocation2 + $0x1] sm:$0xff] }
  0x17   : > { %279 = vst.msk [vmem:[#allocation2 + $0x120] sm:$0x1] %vm267_vm2, %v4746_v0  ;;  %280 = vst.msk [vmem:[#allocation2 + $0x138] sm:$0x1] %vm267_vm2, %v4746_v0  ;;  %v402_v11 = vld [vmem:[#allocation2 + $0x9] sm:$0xff]  ;;  %v301_v12 = vmax.f32 %v226_v7, 0.0  ;;  %690 = vrot.lane.b32.xlu0 %v401_v10, %s4747_s25 }
  0x18   : > { %281 = vst.msk [vmem:[#allocation2 + $0x150] sm:$0x1] %vm267_vm2, %v4746_v0  ;;  %282 = vst.msk [vmem:[#allocation2 + $0x168] sm:$0x1] %vm267_vm2, %v4746_v0  ;;  %v306_v13 = vmax.f32 %v231_v8, 0.0  ;;  %v303_v14 = vmax.f32 %v228_v9, 0.0 }
  0x19   : > { %283 = vst.msk [vmem:[#allocation2 + $0x180] sm:$0x1] %vm267_vm2, %v4746_v0  ;;  %285 = vst.msk [vmem:[#allocation2 + $0x41] sm:$0x1] %vm267_vm2, %v4746_v0  ;;  %v233_v15 = vld [vmem:[%s4847_s24 + $0x40] sm:$0xff]  ;;  %v230_v17 = vld [vmem:[%s4847_s24 + $0x28] sm:$0xff] }
  0x1a   : > { %286 = vst.msk [vmem:[#allocation2 + $0x59] sm:$0x1] %vm267_vm2, %v4746_v0  ;;  %287 = vst.msk [vmem:[#allocation2 + $0x71] sm:$0x1] %vm267_vm2, %v4746_v0  ;;  %v308_v16 = vmax.f32 %v233_v15, 0.0  ;;  %v235_v18 = vld [vmem:[%s4847_s24 + $0x50] sm:$0xff] }
  0x1b   : > { %288 = vst.msk [vmem:[#allocation2 + $0x89] sm:$0x1] %vm267_vm2, %v4746_v0  ;;  %289 = vst.msk [vmem:[#allocation2 + $0xa1] sm:$0x1] %vm267_vm2, %v4746_v0  ;;  %v232_v19 = vld [vmem:[%s4847_s24 + $0x38] sm:$0xff]  ;;  %v305_v20 = vmax.f32 %v230_v17, 0.0  ;;  %692 = vrot.lane.b32.xlu0 %v402_v11, %s4747_s25 }
  0x1c   : > { %290 = vst.msk [vmem:[#allocation2 + $0xb9] sm:$0x1] %vm267_vm2, %v4746_v0  ;;  %291 = vst.msk [vmem:[#allocation2 + $0xd1] sm:$0x1] %vm267_vm2, %v4746_v0  ;;  %v310_v21 = vmax.f32 %v235_v18, 0.0  ;;  %v307_v22 = vmax.f32 %v232_v19, 0.0 }
  0x1d   : > { %292 = vst.msk [vmem:[#allocation2 + $0xe9] sm:$0x1] %vm267_vm2, %v4746_v0  ;;  %293 = vst.msk [vmem:[#allocation2 + $0x101] sm:$0x1] %vm267_vm2, %v4746_v0  ;;  %v237_v23 = vld [vmem:[%s4847_s24 + $0x60] sm:$0xff]  ;;  %v234_v24 = vld [vmem:[%s4847_s24 + $0x48] sm:$0xff] }
  0x1e   : > { %294 = vst.msk [vmem:[#allocation2 + $0x119] sm:$0x1] %vm267_vm2, %v4746_v0  ;;  %295 = vst.msk [vmem:[#allocation2 + $0x131] sm:$0x1] %vm267_vm2, %v4746_v0  ;;  %v239_v25 = vld [vmem:[%s4847_s24 + $0x70] sm:$0xff]  ;;  %v312_v26 = vmax.f32 %v237_v23, 0.0 }
  0x1f   : > { %296 = vst.msk [vmem:[#allocation2 + $0x149] sm:$0x1] %vm267_vm2, %v4746_v0  ;;  %297 = vst.msk [vmem:[#allocation2 + $0x161] sm:$0x1] %vm267_vm2, %v4746_v0  ;;  %v309_v27 = vmax.f32 %v234_v24, 0.0  ;;  %v314_v28 = vmax.f32 %v239_v25, 0.0 }
  0x20   : > { %298 = vst.msk [vmem:[#allocation2 + $0x179] sm:$0x1] %vm267_vm2, %v4746_v0  ;;  %299 = vst.msk [vmem:[#allocation2 + $0x191] sm:$0x1] %vm267_vm2, %v4746_v0  ;;  %v236_v29 = vld [vmem:[%s4847_s24 + $0x58] sm:$0xff]  ;;  %v241_v30 = vld [vmem:[%s4847_s24 + $0x80] sm:$0xff] }
  0x21   : > { %334 = vst.msk [vmem:[#allocation2 + $0x31] sm:$0xff] %vm257_vm0, %v302_v4  ;;  %332 = vst.msk [vmem:[#allocation2 + $0x19] sm:$0xff] %vm257_vm0, %v300_v5  ;;  %v238_v31 = vld [vmem:[%s4847_s24 + $0x68] sm:$0xff]  ;;  %v311_v32 = vmax.f32 %v236_v29, 0.0  ;;  %v316_v33 = vmax.f32 %v241_v30, 0.0  ;;  %v243_v35 = vld [vmem:[%s4847_s24 + $0x90] sm:$0xff] }
  0x22   : > { %336 = vst.msk [vmem:[#allocation2 + $0x49] sm:$0xff] %vm257_vm0, %v304_v6  ;;  %333 = vst.msk [vmem:[#allocation2 + $0x21] sm:$0xff] %vm257_vm0, %v301_v12  ;;  %v313_v34 = vmax.f32 %v238_v31, 0.0  ;;  %v240_v36 = vld [vmem:[%s4847_s24 + $0x78] sm:$0xff]  ;;  %v245_v37 = vld [vmem:[%s4847_s24 + $0xa0] sm:$0xff]  ;;  %v318_v38 = vmax.f32 %v243_v35, 0.0 }
  0x23   : > { %338 = vst.msk [vmem:[#allocation2 + $0x61] sm:$0xff] %vm257_vm0, %v306_v13  ;;  %335 = vst.msk [vmem:[#allocation2 + $0x39] sm:$0xff] %vm257_vm0, %v303_v14  ;;  %v315_v39 = vmax.f32 %v240_v36, 0.0  ;;  %v320_v40 = vmax.f32 %v245_v37, 0.0  ;;  %v242_v41 = vld [vmem:[%s4847_s24 + $0x88] sm:$0xff]  ;;  %v247_v42 = vld [vmem:[%s4847_s24 + $0xb0] sm:$0xff] }
  0x24   : > { %340 = vst.msk [vmem:[#allocation2 + $0x79] sm:$0xff] %vm257_vm0, %v308_v16  ;;  %337 = vst.msk [vmem:[#allocation2 + $0x51] sm:$0xff] %vm257_vm0, %v305_v20  ;;  %v244_v43 = vld [vmem:[%s4847_s24 + $0x98] sm:$0xff]  ;;  %v317_v44 = vmax.f32 %v242_v41, 0.0  ;;  %v322_v45 = vmax.f32 %v247_v42, 0.0  ;;  %v249_v47 = vld [vmem:[%s4847_s24 + $0xc0] sm:$0xff] }
  0x25   : > { %342 = vst.msk [vmem:[#allocation2 + $0x91] sm:$0xff] %vm257_vm0, %v310_v21  ;;  %339 = vst.msk [vmem:[#allocation2 + $0x69] sm:$0xff] %vm257_vm0, %v307_v22  ;;  %v319_v46 = vmax.f32 %v244_v43, 0.0  ;;  %v246_v48 = vld [vmem:[%s4847_s24 + $0xa8] sm:$0xff]  ;;  %v251_v49 = vld [vmem:[%s4847_s24 + $0xd0] sm:$0xff]  ;;  %v324_v50 = vmax.f32 %v249_v47, 0.0 }
  0x26   : > { %344 = vst.msk [vmem:[#allocation2 + $0xa9] sm:$0xff] %vm257_vm0, %v312_v26  ;;  %341 = vst.msk [vmem:[#allocation2 + $0x81] sm:$0xff] %vm257_vm0, %v309_v27  ;;  %v321_v51 = vmax.f32 %v246_v48, 0.0  ;;  %v326_v52 = vmax.f32 %v251_v49, 0.0  ;;  %v248_v53 = vld [vmem:[%s4847_s24 + $0xb8] sm:$0xff]  ;;  %v253_v54 = vld [vmem:[%s4847_s24 + $0xe0] sm:$0xff] }
  0x27   : > { %346 = vst.msk [vmem:[#allocation2 + $0xc1] sm:$0xff] %vm257_vm0, %v314_v28  ;;  %343 = vst.msk [vmem:[#allocation2 + $0x99] sm:$0xff] %vm257_vm0, %v311_v32  ;;  %v250_v55 = vld [vmem:[%s4847_s24 + $0xc8] sm:$0xff]  ;;  %v323_v58 = vmax.f32 %v248_v53, 0.0  ;;  %v328_v59 = vmax.f32 %v253_v54, 0.0  ;;  %v252_v63 = vld [vmem:[%s4847_s24 + $0xd8] sm:$0xff] }
  0x28   : > { %348 = vst.msk [vmem:[#allocation2 + $0xd9] sm:$0xff] %vm257_vm0, %v316_v33  ;;  %345 = vst.msk [vmem:[#allocation2 + $0xb1] sm:$0xff] %vm257_vm0, %v313_v34  ;;  %v4898_v56 = vld [vmem:[#allocation2 + $0x31] sm:$0xff]  ;;  %v4900_v57 = vld [vmem:[#allocation2 + $0x19] sm:$0xff]  ;;  %v325_v60 = vmax.f32 %v250_v55, 0.0  ;;  %v327_v0 = vmax.f32 %v252_v63, 0.0 }
  0x29   : > { %350 = vst.msk [vmem:[#allocation2 + $0xf1] sm:$0xff] %vm257_vm0, %v318_v38  ;;  %347 = vst.msk [vmem:[#allocation2 + $0xc9] sm:$0xff] %vm257_vm0, %v315_v39  ;;  %698 = vrot.lane.b32.xlu0 %v4898_v56, %s4747_s25  ;;  %694 = vrot.lane.b32.xlu1 %v4900_v57, %s4747_s25  ;;  %v4912_v61 = vld [vmem:[#allocation2 + $0x49] sm:$0xff]  ;;  %v4914_v62 = vld [vmem:[#allocation2 + $0x21] sm:$0xff]  ;;  %s4753_s14 = smov 28   ;;  %s4754_s17 = smov 32  }
  0x2a   : > { %352 = vst.msk [vmem:[#allocation2 + $0x109] sm:$0xff] %vm257_vm0, %v320_v40  ;;  %349 = vst.msk [vmem:[#allocation2 + $0xe1] sm:$0xff] %vm257_vm0, %v317_v44  ;;  %v4925_v1 = vld [vmem:[#allocation2 + $0x61] sm:$0xff]  ;;  %v4927_v2 = vld [vmem:[#allocation2 + $0x39] sm:$0xff]  ;;  %vm1846_vm8 = vcmask 195584   ;;  %vm1879_vm9 = vcmask 228352  }
  0x2b   : > { %354 = vst.msk [vmem:[#allocation2 + $0x121] sm:$0xff] %vm257_vm0, %v322_v45  ;;  %351 = vst.msk [vmem:[#allocation2 + $0xf9] sm:$0xff] %vm257_vm0, %v319_v46  ;;  %v4933_v3 = vld [vmem:[#allocation2 + $0x79] sm:$0xff]  ;;  %v4935_v4 = vld [vmem:[#allocation2 + $0x51] sm:$0xff]  ;;  %vm1912_vm10 = vcmask 261120   ;;  %vm1952_vm11 = vcmask 293888  }
  0x2c   : > { %356 = vst.msk [vmem:[#allocation2 + $0x139] sm:$0xff] %vm257_vm0, %v324_v50  ;;  %353 = vst.msk [vmem:[#allocation2 + $0x111] sm:$0xff] %vm257_vm0, %v321_v51  ;;  %v254_v5 = vld [vmem:[%s4847_s24 + $0xe8] sm:$0xff]  ;;  %v4943_v7 = vld [vmem:[#allocation2 + $0x91] sm:$0xff] }
  0x2d   : > { %358 = vst.msk [vmem:[#allocation2 + $0x151] sm:$0xff] %vm257_vm0, %v326_v52  ;;  %355 = vst.msk [vmem:[#allocation2 + $0x129] sm:$0xff] %vm257_vm0, %v323_v58  ;;  %702 = vrot.lane.b32.xlu0 %v4912_v61, %s4747_s25  ;;  %696 = vrot.lane.b32.xlu1 %v4914_v62, %s4747_s25  ;;  %v329_v6 = vmax.f32 %v254_v5, 0.0  ;;  %v4945_v8 = vld [vmem:[#allocation2 + $0x69] sm:$0xff]  ;;  %v4953_v10 = vld [vmem:[#allocation2 + $0x81] sm:$0xff] }
  0x2e   : > { %360 = vst.msk [vmem:[#allocation2 + $0x169] sm:$0xff] %vm257_vm0, %v328_v59  ;;  %357 = vst.msk [vmem:[#allocation2 + $0x141] sm:$0xff] %vm257_vm0, %v325_v60  ;;  %v4951_v9 = vld [vmem:[#allocation2 + $0xa9] sm:$0xff]  ;;  %v4959_v11 = vld [vmem:[#allocation2 + $0xc1] sm:$0xff] }
  0x2f   : > { %359 = vst.msk [vmem:[#allocation2 + $0x159] sm:$0xff] %vm257_vm0, %v327_v0  ;;  %361 = vst.msk [vmem:[#allocation2 + $0x171] sm:$0xff] %vm257_vm0, %v329_v6  ;;  %v4961_v12 = vld [vmem:[#allocation2 + $0x99] sm:$0xff]  ;;  %v4969_v14 = vld [vmem:[#allocation2 + $0xb1] sm:$0xff] }
  0x30   : > { %v4967_v13 = vld [vmem:[#allocation2 + $0xd9] sm:$0xff]  ;;  %v4975_v15 = vld [vmem:[#allocation2 + $0xf1] sm:$0xff]  ;;  %v4977_v16 = vld [vmem:[#allocation2 + $0xc9] sm:$0xff] }
  0x31   : > { %706 = vrot.lane.b32.xlu0 %v4925_v1, %s4747_s25  ;;  %700 = vrot.lane.b32.xlu1 %v4927_v2, %s4747_s25  ;;  %v4983_v17 = vld [vmem:[#allocation2 + $0x109] sm:$0xff]  ;;  %v4985_v18 = vld [vmem:[#allocation2 + $0xe1] sm:$0xff]  ;;  %v256_v29 = vld [vmem:[%s4847_s24 + $0xf8] sm:$0xff] }
  0x32   : > { %v4991_v19 = vld [vmem:[#allocation2 + $0x121] sm:$0xff]  ;;  %v4993_v20 = vld [vmem:[#allocation2 + $0xf9] sm:$0xff]  ;;  %v255_v23 = vld [vmem:[%s4847_s24 + $0xf0] sm:$0xff]  ;;  %v331_v30 = vmax.f32 %v256_v29, 0.0 }
  0x33   : > { %v4999_v21 = vld [vmem:[#allocation2 + $0x139] sm:$0xff]  ;;  %v5001_v22 = vld [vmem:[#allocation2 + $0x111] sm:$0xff]  ;;  %v330_v24 = vmax.f32 %v255_v23, 0.0  ;;  %v433_v31 = vld [vmem:[#allocation2 + $0x2] sm:$0xff] }
  0x34   : > { %v5009_v25 = vld [vmem:[#allocation2 + $0x151] sm:$0xff]  ;;  %v5011_v26 = vld [vmem:[#allocation2 + $0x129] sm:$0xff]  ;;  %363 = vst.msk [vmem:[#allocation2 + $0x189] sm:$0xff] %vm257_vm0, %v331_v30  ;;  %v5032_v33 = vld [vmem:[#allocation2 + $0x1a] sm:$0xff] }
  0x35   : > { %710 = vrot.lane.b32.xlu0 %v4933_v3, %s4747_s25  ;;  %704 = vrot.lane.b32.xlu1 %v4935_v4, %s4747_s25  ;;  %362 = vst.msk [vmem:[#allocation2 + $0x181] sm:$0xff] %vm257_vm0, %v330_v24  ;;  %v5017_v27 = vld [vmem:[#allocation2 + $0x169] sm:$0xff]  ;;  %v5019_v28 = vld [vmem:[#allocation2 + $0x141] sm:$0xff]  ;;  %v5040_v35 = vld [vmem:[#allocation2 + $0x32] sm:$0xff] }
  0x36   : > { %v5027_v32 = vld [vmem:[#allocation2 + $0x159] sm:$0xff]  ;;  %v5034_v34 = vld [vmem:[#allocation2 + $0x171] sm:$0xff]  ;;  %v5047_v38 = vld [vmem:[#allocation2 + $0x22] sm:$0xff] }
  0x37   : > { %v434_v36 = vld [vmem:[#allocation2 + $0xa] sm:$0xff]  ;;  %v5053_v39 = vld [vmem:[#allocation2 + $0x62] sm:$0xff]  ;;  %v5055_v40 = vld [vmem:[#allocation2 + $0x3a] sm:$0xff] }
  0x38   : > { %v5045_v37 = vld [vmem:[#allocation2 + $0x4a] sm:$0xff]  ;;  %v5061_v41 = vld [vmem:[#allocation2 + $0x7a] sm:$0xff]  ;;  %v5063_v42 = vld [vmem:[#allocation2 + $0x52] sm:$0xff] }
  0x39   : > { %714 = vrot.lane.b32.xlu0 %v4943_v7, %s4747_s25  ;;  %708 = vrot.lane.b32.xlu1 %v4945_v8, %s4747_s25  ;;  %v5069_v43 = vld [vmem:[#allocation2 + $0x92] sm:$0xff]  ;;  %v5071_v44 = vld [vmem:[#allocation2 + $0x6a] sm:$0xff]  ;;  %v5079_v46 = vld [vmem:[#allocation2 + $0x82] sm:$0xff] }
  0x3a   : > { %v5077_v45 = vld [vmem:[#allocation2 + $0xaa] sm:$0xff]  ;;  %v5085_v47 = vld [vmem:[#allocation2 + $0xc2] sm:$0xff]  ;;  %v5087_v48 = vld [vmem:[#allocation2 + $0x9a] sm:$0xff] }
  0x3b   : > { %v5093_v49 = vld [vmem:[#allocation2 + $0xda] sm:$0xff]  ;;  %v5095_v50 = vld [vmem:[#allocation2 + $0xb2] sm:$0xff]  ;;  %v5103_v52 = vld [vmem:[#allocation2 + $0xca] sm:$0xff] }
  0x3c   : > { %v5101_v51 = vld [vmem:[#allocation2 + $0xf2] sm:$0xff]  ;;  %v5109_v53 = vld [vmem:[#allocation2 + $0x10a] sm:$0xff]  ;;  %v5111_v54 = vld [vmem:[#allocation2 + $0xe2] sm:$0xff] }
  0x3d   : > { %718 = vrot.lane.b32.xlu0 %v4951_v9, %s4747_s25  ;;  %712 = vrot.lane.b32.xlu1 %v4953_v10, %s4747_s25  ;;  %v5117_v55 = vld [vmem:[#allocation2 + $0x122] sm:$0xff]  ;;  %v5119_v58 = vld [vmem:[#allocation2 + $0xfa] sm:$0xff]  ;;  %v5127_v60 = vld [vmem:[#allocation2 + $0x112] sm:$0xff] }
  0x3e   : > { %v5125_v59 = vld [vmem:[#allocation2 + $0x13a] sm:$0xff]  ;;  %v5135_v0 = vld [vmem:[#allocation2 + $0x152] sm:$0xff]  ;;  %v5137_v5 = vld [vmem:[#allocation2 + $0x12a] sm:$0xff] }
  0x3f   : > { %7776 = vst [vmem:[#allocation4_spill] sm:$0xff] %v5137_v5  ;;  %v5145_v23 = vld [vmem:[#allocation2 + $0x16a] sm:$0xff]  ;;  %v5147_v24 = vld [vmem:[#allocation2 + $0x142] sm:$0xff] }
  0x40   : > { %7778 = vst [vmem:[#allocation6_spill] sm:$0xff] %v5145_v23  ;;  %7779 = vst [vmem:[#allocation7_spill] sm:$0xff] %v5147_v24 }
  0x41   : > { %722 = vrot.lane.b32.xlu0 %v4959_v11, %s4747_s25  ;;  %716 = vrot.lane.b32.xlu1 %v4961_v12, %s4747_s25 }
  0x45   : > { %726 = vrot.lane.b32.xlu0 %v4967_v13, %s4747_s25  ;;  %720 = vrot.lane.b32.xlu1 %v4969_v14, %s4747_s25 }
  0x49   : > { %730 = vrot.lane.b32.xlu0 %v4975_v15, %s4747_s25  ;;  %724 = vrot.lane.b32.xlu1 %v4977_v16, %s4747_s25 }
  0x4d   : > { %734 = vrot.lane.b32.xlu0 %v4983_v17, %s4747_s25  ;;  %728 = vrot.lane.b32.xlu1 %v4985_v18, %s4747_s25 }
  0x51   : > { %738 = vrot.lane.b32.xlu0 %v4991_v19, %s4747_s25  ;;  %732 = vrot.lane.b32.xlu1 %v4993_v20, %s4747_s25 }
  0x55   : > { %742 = vrot.lane.b32.xlu0 %v4999_v21, %s4747_s25  ;;  %736 = vrot.lane.b32.xlu1 %v5001_v22, %s4747_s25 }
  0x59   : > { %746 = vrot.lane.b32.xlu0 %v5009_v25, %s4747_s25  ;;  %740 = vrot.lane.b32.xlu1 %v5011_v26, %s4747_s25 }
  0x5d   : > { %750 = vrot.lane.b32.xlu0 %v5017_v27, %s4747_s25  ;;  %744 = vrot.lane.b32.xlu1 %v5019_v28, %s4747_s25 }
  0x61   : > { %818 = vrot.lane.b32.xlu0 %v433_v31, %s4748_s26  ;;  %748 = vrot.lane.b32.xlu1 %v5027_v32, %s4747_s25  ;;  %v5157_v31 = vld [vmem:[#allocation2 + $0x15a] sm:$0xff] }
  0x62   : > { %7782 = vst [vmem:[#allocation10_spill] sm:$0xff] %v5157_v31 }
  0x65   : > { %822 = vrot.lane.b32.xlu0 %v5032_v33, %s4748_s26  ;;  %752 = vrot.lane.b32.xlu1 %v5034_v34, %s4747_s25 }
  0x69   : > { %826 = vrot.lane.b32.xlu0 %v5040_v35, %s4748_s26  ;;  %820 = vrot.lane.b32.xlu1 %v434_v36, %s4748_s26 }
  0x6d   : > { %830 = vrot.lane.b32.xlu0 %v5045_v37, %s4748_s26  ;;  %824 = vrot.lane.b32.xlu1 %v5047_v38, %s4748_s26 }
  0x71   : > { %834 = vrot.lane.b32.xlu0 %v5053_v39, %s4748_s26  ;;  %828 = vrot.lane.b32.xlu1 %v5055_v40, %s4748_s26 }
  0x75   : > { %838 = vrot.lane.b32.xlu0 %v5061_v41, %s4748_s26  ;;  %832 = vrot.lane.b32.xlu1 %v5063_v42, %s4748_s26 }
  0x79   : > { %842 = vrot.lane.b32.xlu0 %v5069_v43, %s4748_s26  ;;  %836 = vrot.lane.b32.xlu1 %v5071_v44, %s4748_s26 }
  0x7d   : > { %846 = vrot.lane.b32.xlu0 %v5077_v45, %s4748_s26  ;;  %840 = vrot.lane.b32.xlu1 %v5079_v46, %s4748_s26 }
  0x81   : > { %850 = vrot.lane.b32.xlu0 %v5085_v47, %s4748_s26  ;;  %844 = vrot.lane.b32.xlu1 %v5087_v48, %s4748_s26 }
  0x85   : > { %854 = vrot.lane.b32.xlu0 %v5093_v49, %s4748_s26  ;;  %848 = vrot.lane.b32.xlu1 %v5095_v50, %s4748_s26 }
  0x89   : > { %858 = vrot.lane.b32.xlu0 %v5101_v51, %s4748_s26  ;;  %852 = vrot.lane.b32.xlu1 %v5103_v52, %s4748_s26  ;;  %v5129_v63 = vpop.permute.xlu0 %690 }
  0x8a   : > { %7775 = vst [vmem:[#allocation3_spill] sm:$0xff] %v5129_v63  ;;  %v371_v63 = vld [vmem:[#allocation2 + $0x18] sm:$0xff] }
  0x8d   : > { %862 = vrot.lane.b32.xlu0 %v5109_v53, %s4748_s26  ;;  %856 = vrot.lane.b32.xlu1 %v5111_v54, %s4748_s26  ;;  %v5139_v6 = vpop.permute.xlu0 %692 }
  0x8e   : > { %7777 = vst [vmem:[#allocation5_spill] sm:$0xff] %v5139_v6 }
  0x91   : > { %866 = vrot.lane.b32.xlu0 %v5117_v55, %s4748_s26  ;;  %860 = vrot.lane.b32.xlu1 %v5119_v58, %s4748_s26 }
  0x95   : > { %870 = vrot.lane.b32.xlu0 %v5125_v59, %s4748_s26  ;;  %864 = vrot.lane.b32.xlu1 %v5127_v60, %s4748_s26 }
  0x99   : > { %874 = vrot.lane.b32.xlu0 %v5135_v0, %s4748_s26  ;;  %868 = vrot.lane.b32.xlu1 %v5137_v5, %s4748_s26  ;;  %v5193_v5 = vld [vmem:[#allocation2 + $0x38] sm:$0xff] }
  0x9a   : > { %7794 = vst [vmem:[#allocation22_spill] sm:$0xff] %v5193_v5 }
  0x9b   : > { %v5149_v29 = vpop.permute.xlu0 %698  ;;  %v5151_v30 = vpop.permute.xlu1 %694 }
  0x9c   : > { %7780 = vst [vmem:[#allocation8_spill] sm:$0xff] %v5149_v29  ;;  %7781 = vst [vmem:[#allocation9_spill] sm:$0xff] %v5151_v30  ;;  %v5166_v29 = vld [vmem:[#allocation2 + $0x172] sm:$0xff] }
  0x9d   : > { %878 = vrot.lane.b32.xlu0 %v5145_v23, %s4748_s26  ;;  %872 = vrot.lane.b32.xlu1 %v5147_v24, %s4748_s26  ;;  %v5172_v24 = vld [vmem:[#allocation2 + $0x30] sm:$0xff] }
  0x9e   : > { %7787 = vst [vmem:[#allocation15_spill] sm:$0xff] %v5172_v24 }
  0x9f   : > { %v5159_v36 = vpop.permute.xlu0 %702  ;;  %v5161_v6 = vpop.permute.xlu1 %696 }
  0xa0   : > { %7783 = vst [vmem:[#allocation11_spill] sm:$0xff] %v5159_v36  ;;  %7784 = vst [vmem:[#allocation12_spill] sm:$0xff] %v5161_v6  ;;  %v5182_v6 = vld [vmem:[#allocation2 + $0x48] sm:$0xff] }
  0xa1   : > { %946 = vrot.lane.b32.xlu0 %v371_v63, %s4749_s27  ;;  %876 = vrot.lane.b32.xlu1 %v5157_v31, %s4748_s26  ;;  %7790 = vst [vmem:[#allocation18_spill] sm:$0xff] %v5182_v6  ;;  %v372_v31 = vld [vmem:[#allocation2 + $0x20] sm:$0xff] }
  0xa3   : > { %v5168_v30 = vpop.permute.xlu0 %706  ;;  %v5170_v23 = vpop.permute.xlu1 %700 }
  0xa4   : > { %7785 = vst [vmem:[#allocation13_spill] sm:$0xff] %v5168_v30  ;;  %7786 = vst [vmem:[#allocation14_spill] sm:$0xff] %v5170_v23 }
  0xa5   : > { %950 = vrot.lane.b32.xlu0 %v5172_v24, %s4749_s27  ;;  %880 = vrot.lane.b32.xlu1 %v5166_v29, %s4748_s26  ;;  %v5191_v24 = vld [vmem:[#allocation2 + $0x60] sm:$0xff] }
  0xa6   : > { %7793 = vst [vmem:[#allocation21_spill] sm:$0xff] %v5191_v24 }
  0xa7   : > { %v5178_v36 = vpop.permute.xlu0 %710  ;;  %v5180_v63 = vpop.permute.xlu1 %704 }
  0xa8   : > { %7788 = vst [vmem:[#allocation16_spill] sm:$0xff] %v5178_v36  ;;  %7789 = vst [vmem:[#allocation17_spill] sm:$0xff] %v5180_v63 }
  0xa9   : > { %954 = vrot.lane.b32.xlu0 %v5182_v6, %s4749_s27  ;;  %948 = vrot.lane.b32.xlu1 %v372_v31, %s4749_s27  ;;  %v5203_v6 = vld [vmem:[#allocation2 + $0x78] sm:$0xff]  ;;  %v5205_v31 = vld [vmem:[#allocation2 + $0x50] sm:$0xff] }
  0xaa   : > { %7797 = vst [vmem:[#allocation25_spill] sm:$0xff] %v5203_v6  ;;  %7798 = vst [vmem:[#allocation26_spill] sm:$0xff] %v5205_v31 }
  0xab   : > { %v5187_v30 = vpop.permute.xlu0 %714  ;;  %v5189_v23 = vpop.permute.xlu1 %708 }
  0xac   : > { %7791 = vst [vmem:[#allocation19_spill] sm:$0xff] %v5187_v30  ;;  %7792 = vst [vmem:[#allocation20_spill] sm:$0xff] %v5189_v23 }
  0xad   : > { %958 = vrot.lane.b32.xlu0 %v5191_v24, %s4749_s27  ;;  %952 = vrot.lane.b32.xlu1 %v5193_v5, %s4749_s27  ;;  %v5215_v24 = vld [vmem:[#allocation2 + $0x90] sm:$0xff]  ;;  %v5217_v5 = vld [vmem:[#allocation2 + $0x68] sm:$0xff] }
  0xae   : > { %7801 = vst [vmem:[#allocation29_spill] sm:$0xff] %v5215_v24  ;;  %7802 = vst [vmem:[#allocation30_spill] sm:$0xff] %v5217_v5 }
  0xaf   : > { %v5199_v36 = vpop.permute.xlu0 %718  ;;  %v5201_v63 = vpop.permute.xlu1 %712 }
  0xb0   : > { %7795 = vst [vmem:[#allocation23_spill] sm:$0xff] %v5199_v36  ;;  %7796 = vst [vmem:[#allocation24_spill] sm:$0xff] %v5201_v63 }
  0xb1   : > { %962 = vrot.lane.b32.xlu0 %v5203_v6, %s4749_s27  ;;  %956 = vrot.lane.b32.xlu1 %v5205_v31, %s4749_s27  ;;  %v5227_v6 = vld [vmem:[#allocation2 + $0xa8] sm:$0xff]  ;;  %v5229_v31 = vld [vmem:[#allocation2 + $0x80] sm:$0xff] }
  0xb2   : > { %7805 = vst [vmem:[#allocation33_spill] sm:$0xff] %v5227_v6  ;;  %7806 = vst [vmem:[#allocation34_spill] sm:$0xff] %v5229_v31 }
  0xb3   : > { %v5211_v30 = vpop.permute.xlu0 %722  ;;  %v5213_v23 = vpop.permute.xlu1 %716 }
  0xb4   : > { %7799 = vst [vmem:[#allocation27_spill] sm:$0xff] %v5211_v30  ;;  %7800 = vst [vmem:[#allocation28_spill] sm:$0xff] %v5213_v23 }
  0xb5   : > { %966 = vrot.lane.b32.xlu0 %v5215_v24, %s4749_s27  ;;  %960 = vrot.lane.b32.xlu1 %v5217_v5, %s4749_s27  ;;  %v5239_v24 = vld [vmem:[#allocation2 + $0xc0] sm:$0xff]  ;;  %v5241_v5 = vld [vmem:[#allocation2 + $0x98] sm:$0xff] }
  0xb6   : > { %7809 = vst [vmem:[#allocation37_spill] sm:$0xff] %v5239_v24  ;;  %7810 = vst [vmem:[#allocation38_spill] sm:$0xff] %v5241_v5 }
  0xb7   : > { %v5223_v36 = vpop.permute.xlu0 %726  ;;  %v5225_v63 = vpop.permute.xlu1 %720 }
  0xb8   : > { %7803 = vst [vmem:[#allocation31_spill] sm:$0xff] %v5223_v36  ;;  %7804 = vst [vmem:[#allocation32_spill] sm:$0xff] %v5225_v63 }
  0xb9   : > { %970 = vrot.lane.b32.xlu0 %v5227_v6, %s4749_s27  ;;  %964 = vrot.lane.b32.xlu1 %v5229_v31, %s4749_s27  ;;  %v5251_v6 = vld [vmem:[#allocation2 + $0xd8] sm:$0xff]  ;;  %v5253_v31 = vld [vmem:[#allocation2 + $0xb0] sm:$0xff] }
  0xba   : > { %7813 = vst [vmem:[#allocation41_spill] sm:$0xff] %v5251_v6  ;;  %7814 = vst [vmem:[#allocation42_spill] sm:$0xff] %v5253_v31 }
  0xbb   : > { %v5235_v30 = vpop.permute.xlu0 %730  ;;  %v5237_v23 = vpop.permute.xlu1 %724 }
  0xbc   : > { %7807 = vst [vmem:[#allocation35_spill] sm:$0xff] %v5235_v30  ;;  %7808 = vst [vmem:[#allocation36_spill] sm:$0xff] %v5237_v23 }
  0xbd   : > { %974 = vrot.lane.b32.xlu0 %v5239_v24, %s4749_s27  ;;  %968 = vrot.lane.b32.xlu1 %v5241_v5, %s4749_s27  ;;  %v5263_v24 = vld [vmem:[#allocation2 + $0xf0] sm:$0xff]  ;;  %v5265_v5 = vld [vmem:[#allocation2 + $0xc8] sm:$0xff] }
  0xbe   : > { %7817 = vst [vmem:[#allocation45_spill] sm:$0xff] %v5263_v24  ;;  %7818 = vst [vmem:[#allocation46_spill] sm:$0xff] %v5265_v5 }
  0xbf   : > { %v5247_v36 = vpop.permute.xlu0 %734  ;;  %v5249_v63 = vpop.permute.xlu1 %728 }
  0xc0   : > { %7811 = vst [vmem:[#allocation39_spill] sm:$0xff] %v5247_v36  ;;  %7812 = vst [vmem:[#allocation40_spill] sm:$0xff] %v5249_v63 }
  0xc1   : > { %978 = vrot.lane.b32.xlu0 %v5251_v6, %s4749_s27  ;;  %972 = vrot.lane.b32.xlu1 %v5253_v31, %s4749_s27  ;;  %v5275_v6 = vld [vmem:[#allocation2 + $0x108] sm:$0xff]  ;;  %v5277_v31 = vld [vmem:[#allocation2 + $0xe0] sm:$0xff] }
  0xc2   : > { %7821 = vst [vmem:[#allocation49_spill] sm:$0xff] %v5275_v6  ;;  %7822 = vst [vmem:[#allocation50_spill] sm:$0xff] %v5277_v31 }
  0xc3   : > { %v5259_v30 = vpop.permute.xlu0 %738  ;;  %v5261_v23 = vpop.permute.xlu1 %732 }
  0xc4   : > { %7815 = vst [vmem:[#allocation43_spill] sm:$0xff] %v5259_v30  ;;  %7816 = vst [vmem:[#allocation44_spill] sm:$0xff] %v5261_v23 }
  0xc5   : > { %982 = vrot.lane.b32.xlu0 %v5263_v24, %s4749_s27  ;;  %976 = vrot.lane.b32.xlu1 %v5265_v5, %s4749_s27  ;;  %v5287_v24 = vld [vmem:[#allocation2 + $0x120] sm:$0xff]  ;;  %v5289_v5 = vld [vmem:[#allocation2 + $0xf8] sm:$0xff] }
  0xc6   : > { %7825 = vst [vmem:[#allocation53_spill] sm:$0xff] %v5287_v24  ;;  %7826 = vst [vmem:[#allocation54_spill] sm:$0xff] %v5289_v5 }
  0xc7   : > { %v5271_v36 = vpop.permute.xlu0 %742  ;;  %v5273_v63 = vpop.permute.xlu1 %736 }
  0xc8   : > { %7819 = vst [vmem:[#allocation47_spill] sm:$0xff] %v5271_v36  ;;  %7820 = vst [vmem:[#allocation48_spill] sm:$0xff] %v5273_v63 }
  0xc9   : > { %986 = vrot.lane.b32.xlu0 %v5275_v6, %s4749_s27  ;;  %980 = vrot.lane.b32.xlu1 %v5277_v31, %s4749_s27  ;;  %v5299_v6 = vld [vmem:[#allocation2 + $0x138] sm:$0xff]  ;;  %v5301_v31 = vld [vmem:[#allocation2 + $0x110] sm:$0xff] }
  0xca   : > { %7829 = vst [vmem:[#allocation57_spill] sm:$0xff] %v5299_v6  ;;  %7830 = vst [vmem:[#allocation58_spill] sm:$0xff] %v5301_v31 }
  0xcb   : > { %v5283_v30 = vpop.permute.xlu0 %746  ;;  %v5285_v23 = vpop.permute.xlu1 %740 }
  0xcc   : > { %7823 = vst [vmem:[#allocation51_spill] sm:$0xff] %v5283_v30  ;;  %7824 = vst [vmem:[#allocation52_spill] sm:$0xff] %v5285_v23 }
  0xcd   : > { %990 = vrot.lane.b32.xlu0 %v5287_v24, %s4749_s27  ;;  %984 = vrot.lane.b32.xlu1 %v5289_v5, %s4749_s27  ;;  %v5311_v24 = vld [vmem:[#allocation2 + $0x150] sm:$0xff]  ;;  %v5313_v5 = vld [vmem:[#allocation2 + $0x128] sm:$0xff] }
  0xce   : > { %7833 = vst [vmem:[#allocation61_spill] sm:$0xff] %v5311_v24  ;;  %7834 = vst [vmem:[#allocation62_spill] sm:$0xff] %v5313_v5 }
  0xcf   : > { %v5295_v36 = vpop.permute.xlu0 %750  ;;  %v5297_v63 = vpop.permute.xlu1 %744 }
  0xd0   : > { %7827 = vst [vmem:[#allocation55_spill] sm:$0xff] %v5295_v36  ;;  %7828 = vst [vmem:[#allocation56_spill] sm:$0xff] %v5297_v63 }
  0xd1   : > { %994 = vrot.lane.b32.xlu0 %v5299_v6, %s4749_s27  ;;  %988 = vrot.lane.b32.xlu1 %v5301_v31, %s4749_s27  ;;  %v5323_v6 = vld [vmem:[#allocation2 + $0x168] sm:$0xff]  ;;  %v5325_v31 = vld [vmem:[#allocation2 + $0x140] sm:$0xff] }
  0xd2   : > { %7837 = vst [vmem:[#allocation65_spill] sm:$0xff] %v5323_v6 }
  0xd3   : > { %v5307_v30 = vpop.permute.xlu0 %818  ;;  %v5309_v23 = vpop.permute.xlu1 %748 }
  0xd4   : > { %7831 = vst [vmem:[#allocation59_spill] sm:$0xff] %v5307_v30  ;;  %7832 = vst [vmem:[#allocation60_spill] sm:$0xff] %v5309_v23  ;;  %v5331_v23 = vld [vmem:[#allocation2 + $0x180] sm:$0xff] }
  0xd5   : > { %998 = vrot.lane.b32.xlu0 %v5311_v24, %s4749_s27  ;;  %992 = vrot.lane.b32.xlu1 %v5313_v5, %s4749_s27  ;;  %7838 = vst [vmem:[#allocation66_spill] sm:$0xff] %v5331_v23  ;;  %v5337_v5 = vld [vmem:[#allocation2 + $0x158] sm:$0xff] }
  0xd7   : > { %v5319_v36 = vpop.permute.xlu0 %822  ;;  %v5321_v63 = vpop.permute.xlu1 %752 }
  0xd8   : > { %7835 = vst [vmem:[#allocation63_spill] sm:$0xff] %v5319_v36  ;;  %7836 = vst [vmem:[#allocation64_spill] sm:$0xff] %v5321_v63 }
  0xd9   : > { %1002 = vrot.lane.b32.xlu0 %v5323_v6, %s4749_s27  ;;  %996 = vrot.lane.b32.xlu1 %v5325_v31, %s4749_s27  ;;  %v5347_v6 = vld [vmem:[#allocation2 + $0x170] sm:$0xff] }
  0xdb   : > { %v5333_v30 = vpop.permute.xlu0 %826  ;;  %v5335_v24 = vpop.permute.xlu1 %820 }
  0xdc   : > { %7839 = vst [vmem:[#allocation67_spill] sm:$0xff] %v5333_v30  ;;  %7840 = vst [vmem:[#allocation68_spill] sm:$0xff] %v5335_v24  ;;  %v5353_v30 = vld [vmem:[#allocation2 + $0x188] sm:$0xff] }
  0xdd   : > { %1006 = vrot.lane.b32.xlu0 %v5331_v23, %s4749_s27  ;;  %1000 = vrot.lane.b32.xlu1 %v5337_v5, %s4749_s27 }
  0xdf   : > { %v5343_v63 = vpop.permute.xlu0 %830  ;;  %v5345_v36 = vpop.permute.xlu1 %824 }
  0xe0   : > { %7841 = vst [vmem:[#allocation69_spill] sm:$0xff] %v5343_v63  ;;  %7842 = vst [vmem:[#allocation70_spill] sm:$0xff] %v5345_v36 }
  0xe1   : > { %1074 = vrot.lane.b32.xlu0 %v4900_v57, %s4750_s28  ;;  %1004 = vrot.lane.b32.xlu1 %v5347_v6, %s4749_s27 }
  0xe3   : > { %v5355_v24 = vpop.permute.xlu0 %834  ;;  %v5357_v23 = vpop.permute.xlu1 %828 }
  0xe4   : > { %7843 = vst [vmem:[#allocation71_spill] sm:$0xff] %v5355_v24 }
  0xe5   : > { %1078 = vrot.lane.b32.xlu0 %v4898_v56, %s4750_s28  ;;  %1008 = vrot.lane.b32.xlu1 %v5353_v30, %s4749_s27 }
  0xe7   : > { %v5363_v63 = vpop.permute.xlu0 %838  ;;  %v5365_v36 = vpop.permute.xlu1 %832 }
  0xe8   : > { %7844 = vst [vmem:[#allocation72_spill] sm:$0xff] %v5363_v63 }
  0xe9   : > { %1082 = vrot.lane.b32.xlu0 %v4912_v61, %s4750_s28  ;;  %1076 = vrot.lane.b32.xlu1 %v4914_v62, %s4750_s28 }
  0xeb   : > { %v5371_v57 = vpop.permute.xlu0 %842  ;;  %v5373_v24 = vpop.permute.xlu1 %836 }
  0xed   : > { %1086 = vrot.lane.b32.xlu0 %v4925_v1, %s4750_s28  ;;  %1080 = vrot.lane.b32.xlu1 %v4927_v2, %s4750_s28 }
  0xef   : > { %v5379_v56 = vpop.permute.xlu0 %846  ;;  %v5381_v63 = vpop.permute.xlu1 %840 }
  0xf0   : > { %7845 = vst [vmem:[#allocation73_spill] sm:$0xff] %v5379_v56  ;;  %7846 = vst [vmem:[#allocation74_spill] sm:$0xff] %v5381_v63 }
  0xf1   : > { %1090 = vrot.lane.b32.xlu0 %v4933_v3, %s4750_s28  ;;  %1084 = vrot.lane.b32.xlu1 %v4935_v4, %s4750_s28 }
  0xf3   : > { %v5387_v61 = vpop.permute.xlu0 %850  ;;  %v5389_v62 = vpop.permute.xlu1 %844 }
  0xf4   : > { %7847 = vst [vmem:[#allocation75_spill] sm:$0xff] %v5387_v61  ;;  %7848 = vst [vmem:[#allocation76_spill] sm:$0xff] %v5389_v62 }
  0xf5   : > { %1094 = vrot.lane.b32.xlu0 %v4943_v7, %s4750_s28  ;;  %1088 = vrot.lane.b32.xlu1 %v4945_v8, %s4750_s28 }
  0xf7   : > { %v5395_v1 = vpop.permute.xlu0 %854  ;;  %v5397_v2 = vpop.permute.xlu1 %848 }
  0xf8   : > { %7849 = vst [vmem:[#allocation77_spill] sm:$0xff] %v5395_v1  ;;  %7850 = vst [vmem:[#allocation78_spill] sm:$0xff] %v5397_v2 }
  0xf9   : > { %1098 = vrot.lane.b32.xlu0 %v4951_v9, %s4750_s28  ;;  %1092 = vrot.lane.b32.xlu1 %v4953_v10, %s4750_s28 }
  0xfb   : > { %v5403_v3 = vpop.permute.xlu0 %858  ;;  %v5405_v4 = vpop.permute.xlu1 %852 }
  0xfc   : > { %7851 = vst [vmem:[#allocation79_spill] sm:$0xff] %v5403_v3  ;;  %7852 = vst [vmem:[#allocation80_spill] sm:$0xff] %v5405_v4  ;;  %v598_v4 = vld [vmem:[#allocation2 + $0x61] sm:$0xff] }
  0xfd   : > { %1102 = vrot.lane.b32.xlu0 %v4959_v11, %s4750_s28  ;;  %1096 = vrot.lane.b32.xlu1 %v4961_v12, %s4750_s28 }
  0xff   : > { %v5411_v7 = vpop.permute.xlu0 %862  ;;  %v5413_v8 = vpop.permute.xlu1 %856 }
 0x100   : > { %7853 = vst [vmem:[#allocation81_spill] sm:$0xff] %v5411_v7  ;;  %7854 = vst [vmem:[#allocation82_spill] sm:$0xff] %v5413_v8  ;;  %v7911_v8 = vld [vmem:[#allocation41_spill] sm:$0xff] }
 0x101   : > { %1106 = vrot.lane.b32.xlu0 %v4967_v13, %s4750_s28  ;;  %1100 = vrot.lane.b32.xlu1 %v4969_v14, %s4750_s28 }
 0x103   : > { %v5419_v9 = vpop.permute.xlu0 %866  ;;  %v5421_v10 = vpop.permute.xlu1 %860 }
 0x104   : > { %7855 = vst [vmem:[#allocation83_spill] sm:$0xff] %v5419_v9  ;;  %7856 = vst [vmem:[#allocation84_spill] sm:$0xff] %v5421_v10  ;;  %v7903_v10 = vld [vmem:[#allocation33_spill] sm:$0xff] }
 0x105   : > { %1110 = vrot.lane.b32.xlu0 %v4975_v15, %s4750_s28  ;;  %1104 = vrot.lane.b32.xlu1 %v4977_v16, %s4750_s28 }
 0x107   : > { %v5427_v11 = vpop.permute.xlu0 %870  ;;  %v5429_v12 = vpop.permute.xlu1 %864 }
 0x108   : > { %7857 = vst [vmem:[#allocation85_spill] sm:$0xff] %v5427_v11  ;;  %7858 = vst [vmem:[#allocation86_spill] sm:$0xff] %v5429_v12 }
 0x109   : > { %1114 = vrot.lane.b32.xlu0 %v4983_v17, %s4750_s28  ;;  %1108 = vrot.lane.b32.xlu1 %v4985_v18, %s4750_s28 }
 0x10b   : > { %v5435_v13 = vpop.permute.xlu0 %874  ;;  %v5437_v14 = vpop.permute.xlu1 %868 }
 0x10c   : > { %7859 = vst [vmem:[#allocation87_spill] sm:$0xff] %v5435_v13  ;;  %7860 = vst [vmem:[#allocation88_spill] sm:$0xff] %v5437_v14 }
 0x10d   : > { %1118 = vrot.lane.b32.xlu0 %v4991_v19, %s4750_s28  ;;  %1112 = vrot.lane.b32.xlu1 %v4993_v20, %s4750_s28 }
 0x10f   : > { %v5443_v15 = vpop.permute.xlu0 %878  ;;  %v5445_v16 = vpop.permute.xlu1 %872 }
 0x110   : > { %7861 = vst [vmem:[#allocation89_spill] sm:$0xff] %v5443_v15  ;;  %7862 = vst [vmem:[#allocation90_spill] sm:$0xff] %v5445_v16 }
 0x111   : > { %1122 = vrot.lane.b32.xlu0 %v4999_v21, %s4750_s28  ;;  %1116 = vrot.lane.b32.xlu1 %v5001_v22, %s4750_s28  ;;  %v5467_v21 = vld [vmem:[#allocation2 + $0x181] sm:$0xff] }
 0x113   : > { %v5451_v17 = vpop.permute.xlu0 %946  ;;  %v5453_v18 = vpop.permute.xlu1 %876 }
 0x114   : > { %7863 = vst [vmem:[#allocation91_spill] sm:$0xff] %v5453_v18 }
 0x115   : > { %1126 = vrot.lane.b32.xlu0 %v5009_v25, %s4750_s28  ;;  %1120 = vrot.lane.b32.xlu1 %v5011_v26, %s4750_s28 }
 0x117   : > { %v5459_v19 = vpop.permute.xlu0 %950  ;;  %v5461_v20 = vpop.permute.xlu1 %880 }
 0x118   : > { %7864 = vst [vmem:[#allocation92_spill] sm:$0xff] %v5461_v20 }
 0x119   : > { %1130 = vrot.lane.b32.xlu0 %v5017_v27, %s4750_s28  ;;  %1124 = vrot.lane.b32.xlu1 %v5019_v28, %s4750_s28  ;;  %v5485_v27 = vld [vmem:[#allocation2 + $0x189] sm:$0xff] }
 0x11b   : > { %v5469_v22 = vpop.permute.xlu0 %954  ;;  %v5471_v18 = vpop.permute.xlu1 %948 }
 0x11d   : > { %1134 = vrot.lane.b32.xlu0 %v5467_v21, %s4750_s28  ;;  %1128 = vrot.lane.b32.xlu1 %v5027_v32, %s4750_s28 }
 0x11f   : > { %v5477_v25 = vpop.permute.xlu0 %958  ;;  %v5479_v26 = vpop.permute.xlu1 %952 }
 0x121   : > { %1202 = vrot.lane.b32.xlu0 %v5032_v33, %s4751_s29  ;;  %1132 = vrot.lane.b32.xlu1 %v5034_v34, %s4750_s28 }
 0x123   : > { %v5487_v28 = vpop.permute.xlu0 %962  ;;  %v5489_v20 = vpop.permute.xlu1 %956 }
 0x125   : > { %1206 = vrot.lane.b32.xlu0 %v5040_v35, %s4751_s29  ;;  %1136 = vrot.lane.b32.xlu1 %v5485_v27, %s4750_s28 }
 0x127   : > { %v5495_v32 = vpop.permute.xlu0 %966  ;;  %v5497_v15 = vpop.permute.xlu1 %960 }
 0x129   : > { %1210 = vrot.lane.b32.xlu0 %v5045_v37, %s4751_s29  ;;  %1204 = vrot.lane.b32.xlu1 %v5047_v38, %s4751_s29 }
 0x12b   : > { %v5503_v33 = vpop.permute.xlu0 %970  ;;  %v5505_v34 = vpop.permute.xlu1 %964 }
 0x12c   : > { %7865 = vst [vmem:[#allocation93_spill] sm:$0xff] %v5503_v33 }
 0x12d   : > { %1214 = vrot.lane.b32.xlu0 %v5053_v39, %s4751_s29  ;;  %1208 = vrot.lane.b32.xlu1 %v5055_v40, %s4751_s29 }
 0x12f   : > { %v5511_v35 = vpop.permute.xlu0 %974  ;;  %v5513_v16 = vpop.permute.xlu1 %968 }
 0x130   : > { %7866 = vst [vmem:[#allocation94_spill] sm:$0xff] %v5511_v35  ;;  %7867 = vst [vmem:[#allocation95_spill] sm:$0xff] %v5513_v16 }
 0x131   : > { %1218 = vrot.lane.b32.xlu0 %v5061_v41, %s4751_s29  ;;  %1212 = vrot.lane.b32.xlu1 %v5063_v42, %s4751_s29 }
 0x133   : > { %v5519_v37 = vpop.permute.xlu0 %978  ;;  %v5521_v38 = vpop.permute.xlu1 %972 }
 0x134   : > { %7868 = vst [vmem:[#allocation96_spill] sm:$0xff] %v5519_v37  ;;  %7869 = vst [vmem:[#allocation97_spill] sm:$0xff] %v5521_v38 }
 0x135   : > { %1222 = vrot.lane.b32.xlu0 %v5069_v43, %s4751_s29  ;;  %1216 = vrot.lane.b32.xlu1 %v5071_v44, %s4751_s29 }
 0x137   : > { %v5527_v39 = vpop.permute.xlu0 %982  ;;  %v5529_v40 = vpop.permute.xlu1 %976 }
 0x138   : > { %7870 = vst [vmem:[#allocation98_spill] sm:$0xff] %v5527_v39  ;;  %7871 = vst [vmem:[#allocation99_spill] sm:$0xff] %v5529_v40  ;;  %v367_v39 = vld [vmem:[%s7731_s1 + $0x18] sm:$0xff] }
 0x139   : > { %1226 = vrot.lane.b32.xlu0 %v5077_v45, %s4751_s29  ;;  %1220 = vrot.lane.b32.xlu1 %v5079_v46, %s4751_s29 }
 0x13b   : > { %v5535_v41 = vpop.permute.xlu0 %986  ;;  %v5537_v42 = vpop.permute.xlu1 %980 }
 0x13c   : > { %7872 = vst [vmem:[#allocation100_spill] sm:$0xff] %v5535_v41  ;;  %7873 = vst [vmem:[#allocation101_spill] sm:$0xff] %v5537_v42  ;;  %v366_v42 = vld [vmem:[%s7731_s1 + $0x10] sm:$0xff] }
 0x13d   : > { %1230 = vrot.lane.b32.xlu0 %v5085_v47, %s4751_s29  ;;  %1224 = vrot.lane.b32.xlu1 %v5087_v48, %s4751_s29 }
 0x13f   : > { %v5543_v43 = vpop.permute.xlu0 %990  ;;  %v5545_v44 = vpop.permute.xlu1 %984 }
 0x140   : > { %7874 = vst [vmem:[#allocation102_spill] sm:$0xff] %v5543_v43  ;;  %7875 = vst [vmem:[#allocation103_spill] sm:$0xff] %v5545_v44  ;;  %v7907_v44 = vld [vmem:[#allocation37_spill] sm:$0xff] }
 0x141   : > { %1234 = vrot.lane.b32.xlu0 %v5093_v49, %s4751_s29  ;;  %1228 = vrot.lane.b32.xlu1 %v5095_v50, %s4751_s29 }
 0x143   : > { %v5551_v45 = vpop.permute.xlu0 %994  ;;  %v5553_v46 = vpop.permute.xlu1 %988 }
 0x144   : > { %7876 = vst [vmem:[#allocation104_spill] sm:$0xff] %v5551_v45  ;;  %7877 = vst [vmem:[#allocation105_spill] sm:$0xff] %v5553_v46  ;;  %v7895_v45 = vld [vmem:[#allocation25_spill] sm:$0xff] }
 0x145   : > { %1238 = vrot.lane.b32.xlu0 %v5101_v51, %s4751_s29  ;;  %1232 = vrot.lane.b32.xlu1 %v5103_v52, %s4751_s29  ;;  %v7899_v46 = vld [vmem:[#allocation29_spill] sm:$0xff] }
 0x147   : > { %v5559_v47 = vpop.permute.xlu0 %998  ;;  %v5561_v48 = vpop.permute.xlu1 %992 }
 0x148   : > { %7878 = vst [vmem:[#allocation106_spill] sm:$0xff] %v5559_v47  ;;  %7879 = vst [vmem:[#allocation107_spill] sm:$0xff] %v5561_v48  ;;  %v7891_v47 = vld [vmem:[#allocation18_spill] sm:$0xff] }
 0x149   : > { %1242 = vrot.lane.b32.xlu0 %v5109_v53, %s4751_s29  ;;  %1236 = vrot.lane.b32.xlu1 %v5111_v54, %s4751_s29 }
 0x14b   : > { %v5567_v49 = vpop.permute.xlu0 %1002  ;;  %v5569_v50 = vpop.permute.xlu1 %996 }
 0x14c   : > { %7880 = vst [vmem:[#allocation108_spill] sm:$0xff] %v5567_v49  ;;  %7881 = vst [vmem:[#allocation109_spill] sm:$0xff] %v5569_v50 }
 0x14d   : > { %1246 = vrot.lane.b32.xlu0 %v5117_v55, %s4751_s29  ;;  %1240 = vrot.lane.b32.xlu1 %v5119_v58, %s4751_s29  ;;  %v7885_v55 = vld [vmem:[#allocation4_spill] sm:$0xff] }
 0x14f   : > { %v5575_v51 = vpop.permute.xlu0 %1006  ;;  %v5577_v52 = vpop.permute.xlu1 %1000 }
 0x150   : > { %7882 = vst [vmem:[#allocation110_spill] sm:$0xff] %v5575_v51  ;;  %7883 = vst [vmem:[#allocation111_spill] sm:$0xff] %v5577_v52  ;;  %v7887_v52 = vld [vmem:[#allocation6_spill] sm:$0xff] }
 0x151   : > { %1250 = vrot.lane.b32.xlu0 %v5125_v59, %s4751_s29  ;;  %1244 = vrot.lane.b32.xlu1 %v5127_v60, %s4751_s29  ;;  %v7888_v59 = vld [vmem:[#allocation7_spill] sm:$0xff]  ;;  %v5599_v60 = vld [vmem:[#allocation2 + $0x182] sm:$0xff] }
 0x153   : > { %v5583_v53 = vpop.permute.xlu0 %1074  ;;  %v5585_v54 = vpop.permute.xlu1 %1004 }
 0x154   : > { %7884 = vst [vmem:[#allocation112_spill] sm:$0xff] %v5585_v54 }
 0x155   : > { %1254 = vrot.lane.b32.xlu0 %v5135_v0, %s4751_s29  ;;  %1248 = vrot.lane.b32.xlu1 %v7885_v55, %s4751_s29  ;;  %v7889_v0 = vld [vmem:[#allocation10_spill] sm:$0xff] }
 0x157   : > { %v5591_v58 = vpop.permute.xlu0 %1078  ;;  %v5593_v51 = vpop.permute.xlu1 %1008 }
 0x158   : > { %7886 = vst [vmem:[#allocation4_spill] sm:$0xff] %v5593_v51 }
 0x159   : > { %1258 = vrot.lane.b32.xlu0 %v7887_v52, %s4751_s29  ;;  %1252 = vrot.lane.b32.xlu1 %v7888_v59, %s4751_s29  ;;  %v7890_v52 = vld [vmem:[#allocation15_spill] sm:$0xff] }
 0x15a   : > { %v5617_v59 = vld [vmem:[#allocation2 + $0x18a] sm:$0xff] }
 0x15b   : > { %v5601_v49 = vpop.permute.xlu0 %1082  ;;  %v5603_v54 = vpop.permute.xlu1 %1076 }
 0x15d   : > { %1262 = vrot.lane.b32.xlu0 %v5599_v60, %s4751_s29  ;;  %1256 = vrot.lane.b32.xlu1 %v7889_v0, %s4751_s29 }
 0x15f   : > { %v5609_v55 = vpop.permute.xlu0 %1086  ;;  %v5611_v51 = vpop.permute.xlu1 %1080 }
 0x161   : > { %1330 = vrot.lane.b32.xlu0 %v7890_v52, %s4752_s30  ;;  %1260 = vrot.lane.b32.xlu1 %v5166_v29, %s4751_s29  ;;  %v7892_v52 = vld [vmem:[#allocation21_spill] sm:$0xff]  ;;  %v7893_v29 = vld [vmem:[#allocation22_spill] sm:$0xff] }
 0x163   : > { %v5619_v13 = vpop.permute.xlu0 %1090  ;;  %v5621_v50 = vpop.permute.xlu1 %1084 }
 0x165   : > { %1334 = vrot.lane.b32.xlu0 %v7891_v47, %s4752_s30  ;;  %1264 = vrot.lane.b32.xlu1 %v5617_v59, %s4751_s29  ;;  %v7896_v47 = vld [vmem:[#allocation26_spill] sm:$0xff] }
 0x167   : > { %v5627_v0 = vpop.permute.xlu0 %1094  ;;  %v5629_v14 = vpop.permute.xlu1 %1088 }
 0x169   : > { %1338 = vrot.lane.b32.xlu0 %v7892_v52, %s4752_s30  ;;  %1332 = vrot.lane.b32.xlu1 %v7893_v29, %s4752_s30  ;;  %v7900_v52 = vld [vmem:[#allocation30_spill] sm:$0xff] }
 0x16b   : > { %v5635_v11 = vpop.permute.xlu0 %1098  ;;  %v5637_v48 = vpop.permute.xlu1 %1092 }
 0x16c   : > { %7894 = vst [vmem:[#allocation6_spill] sm:$0xff] %v5635_v11 }
 0x16d   : > { %1342 = vrot.lane.b32.xlu0 %v7895_v45, %s4752_s30  ;;  %1336 = vrot.lane.b32.xlu1 %v7896_v47, %s4752_s30  ;;  %v7904_v45 = vld [vmem:[#allocation34_spill] sm:$0xff] }
 0x16f   : > { %v5643_v12 = vpop.permute.xlu0 %1102  ;;  %v5645_v9 = vpop.permute.xlu1 %1096 }
 0x170   : > { %7897 = vst [vmem:[#allocation7_spill] sm:$0xff] %v5643_v12  ;;  %7898 = vst [vmem:[#allocation10_spill] sm:$0xff] %v5645_v9 }
 0x171   : > { %1346 = vrot.lane.b32.xlu0 %v7899_v46, %s4752_s30  ;;  %1340 = vrot.lane.b32.xlu1 %v7900_v52, %s4752_s30  ;;  %v7908_v46 = vld [vmem:[#allocation38_spill] sm:$0xff] }
 0x173   : > { %v5651_v29 = vpop.permute.xlu0 %1106  ;;  %v5653_v43 = vpop.permute.xlu1 %1100 }
 0x174   : > { %7901 = vst [vmem:[#allocation15_spill] sm:$0xff] %v5651_v29  ;;  %7902 = vst [vmem:[#allocation18_spill] sm:$0xff] %v5653_v43  ;;  %v599_v29 = vld [vmem:[#allocation2 + $0x69] sm:$0xff] }
 0x175   : > { %1350 = vrot.lane.b32.xlu0 %v7903_v10, %s4752_s30  ;;  %1344 = vrot.lane.b32.xlu1 %v7904_v45, %s4752_s30  ;;  %v7912_v10 = vld [vmem:[#allocation42_spill] sm:$0xff] }
 0x177   : > { %v5659_v47 = vpop.permute.xlu0 %1110  ;;  %v5661_v7 = vpop.permute.xlu1 %1104 }
 0x178   : > { %7905 = vst [vmem:[#allocation21_spill] sm:$0xff] %v5659_v47  ;;  %7906 = vst [vmem:[#allocation22_spill] sm:$0xff] %v5661_v7  ;;  %v7915_v47 = vld [vmem:[#allocation45_spill] sm:$0xff]  ;;  %v628_v7 = vld [vmem:[#allocation2 + $0x4a] sm:$0xff] }
 0x179   : > { %1354 = vrot.lane.b32.xlu0 %v7907_v44, %s4752_s30  ;;  %1348 = vrot.lane.b32.xlu1 %v7908_v46, %s4752_s30  ;;  %v7916_v44 = vld [vmem:[#allocation46_spill] sm:$0xff] }
 0x17b   : > { %v5667_v52 = vpop.permute.xlu0 %1114  ;;  %v5669_v41 = vpop.permute.xlu1 %1108 }
 0x17c   : > { %7909 = vst [vmem:[#allocation25_spill] sm:$0xff] %v5667_v52  ;;  %7910 = vst [vmem:[#allocation26_spill] sm:$0xff] %v5669_v41  ;;  %v7919_v41 = vld [vmem:[#allocation49_spill] sm:$0xff] }
 0x17d   : > { %1358 = vrot.lane.b32.xlu0 %v7911_v8, %s4752_s30  ;;  %1352 = vrot.lane.b32.xlu1 %v7912_v10, %s4752_s30  ;;  %v7920_v8 = vld [vmem:[#allocation50_spill] sm:$0xff] }
 0x17f   : > { %v5675_v45 = vpop.permute.xlu0 %1118  ;;  %v5677_v3 = vpop.permute.xlu1 %1112 }
 0x180   : > { %7913 = vst [vmem:[#allocation29_spill] sm:$0xff] %v5675_v45  ;;  %7914 = vst [vmem:[#allocation30_spill] sm:$0xff] %v5677_v3  ;;  %v7923_v3 = vld [vmem:[#allocation53_spill] sm:$0xff] }
 0x181   : > { %1362 = vrot.lane.b32.xlu0 %v7915_v47, %s4752_s30  ;;  %1356 = vrot.lane.b32.xlu1 %v7916_v44, %s4752_s30  ;;  %v7924_v47 = vld [vmem:[#allocation54_spill] sm:$0xff] }
 0x183   : > { %v5683_v46 = vpop.permute.xlu0 %1122  ;;  %v5685_v52 = vpop.permute.xlu1 %1116 }
 0x184   : > { %7917 = vst [vmem:[#allocation33_spill] sm:$0xff] %v5683_v46  ;;  %7918 = vst [vmem:[#allocation34_spill] sm:$0xff] %v5685_v52  ;;  %v7927_v52 = vld [vmem:[#allocation57_spill] sm:$0xff] }
 0x185   : > { %1366 = vrot.lane.b32.xlu0 %v7919_v41, %s4752_s30  ;;  %1360 = vrot.lane.b32.xlu1 %v7920_v8, %s4752_s30  ;;  %v7928_v41 = vld [vmem:[#allocation58_spill] sm:$0xff] }
 0x187   : > { %v5691_v10 = vpop.permute.xlu0 %1126  ;;  %v5693_v45 = vpop.permute.xlu1 %1120 }
 0x188   : > { %7921 = vst [vmem:[#allocation37_spill] sm:$0xff] %v5691_v10  ;;  %7922 = vst [vmem:[#allocation38_spill] sm:$0xff] %v5693_v45  ;;  %v7931_v45 = vld [vmem:[#allocation61_spill] sm:$0xff] }
 0x189   : > { %1370 = vrot.lane.b32.xlu0 %v7923_v3, %s4752_s30  ;;  %1364 = vrot.lane.b32.xlu1 %v7924_v47, %s4752_s30  ;;  %v7932_v3 = vld [vmem:[#allocation62_spill] sm:$0xff] }
 0x18b   : > { %v5699_v44 = vpop.permute.xlu0 %1130  ;;  %v5701_v46 = vpop.permute.xlu1 %1124 }
 0x18c   : > { %7925 = vst [vmem:[#allocation41_spill] sm:$0xff] %v5699_v44  ;;  %7926 = vst [vmem:[#allocation42_spill] sm:$0xff] %v5701_v46  ;;  %v7934_v46 = vld [vmem:[#allocation65_spill] sm:$0xff] }
 0x18d   : > { %1374 = vrot.lane.b32.xlu0 %v7927_v52, %s4752_s30  ;;  %1368 = vrot.lane.b32.xlu1 %v7928_v41, %s4752_s30 }
 0x18f   : > { %v5707_v8 = vpop.permute.xlu0 %1134  ;;  %v5709_v10 = vpop.permute.xlu1 %1128 }
 0x190   : > { %7929 = vst [vmem:[#allocation45_spill] sm:$0xff] %v5707_v8  ;;  %7930 = vst [vmem:[#allocation46_spill] sm:$0xff] %v5709_v10  ;;  %v7936_v8 = vld [vmem:[#allocation66_spill] sm:$0xff] }
 0x191   : > { %1378 = vrot.lane.b32.xlu0 %v7931_v45, %s4752_s30  ;;  %1372 = vrot.lane.b32.xlu1 %v7932_v3, %s4752_s30  ;;  %v592_v45 = vld [vmem:[#allocation2 + $0x198] sm:$0xff] }
 0x193   : > { %v5715_v47 = vpop.permute.xlu0 %1202  ;;  %v5717_v44 = vpop.permute.xlu1 %1132 }
 0x194   : > { %7933 = vst [vmem:[#allocation49_spill] sm:$0xff] %v5717_v44 }
 0x195   : > { %1382 = vrot.lane.b32.xlu0 %v7934_v46, %s4752_s30  ;;  %1376 = vrot.lane.b32.xlu1 %v5325_v31, %s4752_s30  ;;  %v364_v46 = vld [vmem:[%s7731_s1] sm:$0xff]  ;;  %v365_v31 = vld [vmem:[%s7731_s1 + $0x8] sm:$0xff] }
 0x197   : > { %v5723_v52 = vpop.permute.xlu0 %1206  ;;  %v5725_v41 = vpop.permute.xlu1 %1136 }
 0x198   : > { %7935 = vst [vmem:[#allocation50_spill] sm:$0xff] %v5725_v41 }
 0x199   : > { %1386 = vrot.lane.b32.xlu0 %v7936_v8, %s4752_s30  ;;  %1380 = vrot.lane.b32.xlu1 %v5337_v5, %s4752_s30  ;;  %v4636_v8 = vpack.c.bf16 %v365_v31, %v364_v46  ;;  %v594_v5 = vld [vmem:[#allocation2 + $0x31] sm:$0xff]  ;;  %v593_v46 = vld [vmem:[#allocation2 + $0x1a0] sm:$0xff] }
 0x19b   : > { %v5731_v3 = vpop.permute.xlu0 %1210  ;;  %v5733_v44 = vpop.permute.xlu1 %1204  ;;  %4637 = vmatprep.subr.bf16.mxu0 %v4636_v8 }
 0x19c   : > { %4639 = vmatpush3.bf16.msra.mxu0 %v4636_v8 }
 0x19d   : > { %1390 = vrot.lane.b32.xlu0 %v592_v45, %s4752_s30  ;;  %1384 = vrot.lane.b32.xlu1 %v5347_v6, %s4752_s30  ;;  %v4640_v6 = vpack.c.bf16 %v367_v39, %v366_v42  ;;  %v596_v45 = vld [vmem:[#allocation2 + $0x49] sm:$0xff] }
 0x19f   : > { %v5744_v41 = vpop.permute.xlu0 %1214  ;;  %v5746_v10 = vpop.permute.xlu1 %1208  ;;  %4641 = vmatprep.subr.bf16.mxu0 %v4640_v6 }
 0x1a0   : > { %4643 = vmatpush3.bf16.msra.mxu0 %v4640_v6  ;;  %v626_v6 = vld [vmem:[#allocation2 + $0x32] sm:$0xff] }
 0x1a1   : > { %1458 = vrot.lane.b32.xlu0 %v594_v5, %s4753_s14  ;;  %1388 = vrot.lane.b32.xlu1 %v5353_v30, %s4752_s30  ;;  %v368_v5 = vld [vmem:[%s7731_s1 + $0x20] sm:$0xf] }
 0x1a2   : > { %v595_v30 = vld [vmem:[#allocation2 + $0x39] sm:$0xff]  ;;  %4528 = vmatprep.subr.msk.mxu0 %vm2049_vm3, %v368_v5 }
 0x1a3   : > { %v5757_v31 = vpop.permute.xlu0 %1218  ;;  %v5759_v8 = vpop.permute.xlu1 %1212 }
 0x1a4   : > { %4529 = vmatpush3.msk.msra.mxu0 %vm2049_vm3, %v368_v5 }
 0x1a5   : > { %1462 = vrot.lane.b32.xlu0 %v596_v45, %s4753_s14  ;;  %1392 = vrot.lane.b32.xlu1 %v593_v46, %s4752_s30  ;;  %v597_v45 = vld [vmem:[#allocation2 + $0x51] sm:$0xff] }
 0x1a7   : > { %v5767_v39 = vpop.permute.xlu0 %1222  ;;  %v5769_v42 = vpop.permute.xlu1 %1216 }
 0x1a9   : > { %1466 = vrot.lane.b32.xlu0 %v598_v4, %s4753_s14  ;;  %1460 = vrot.lane.b32.xlu1 %v595_v30, %s4753_s14  ;;  %v630_v4 = vld [vmem:[#allocation2 + $0x62] sm:$0xff]  ;;  %v627_v30 = vld [vmem:[#allocation2 + $0x3a] sm:$0xff] }
 0x1ab   : > { %v5774_v46 = vpop.permute.xlu0 %1226  ;;  %v5776_v1 = vpop.permute.xlu1 %1220 }
 0x1ac   : > { %7937 = vst [vmem:[#allocation53_spill] sm:$0xff] %v5774_v46 }
 0x1ad   : > { %1586 = vrot.lane.b32.xlu0 %v626_v6, %s4754_s17  ;;  %1464 = vrot.lane.b32.xlu1 %v597_v45, %s4753_s14  ;;  %v600_v6 = vld [vmem:[#allocation2 + $0x79] sm:$0xff] }
 0x1ae   : > { %v629_v45 = vld [vmem:[#allocation2 + $0x52] sm:$0xff] }
 0x1af   : > { %v5780_v40 = vpop.permute.xlu0 %1230  ;;  %v5782_v5 = vpop.permute.xlu1 %1224 }
 0x1b0   : > { %7938 = vst [vmem:[#allocation54_spill] sm:$0xff] %v5780_v40  ;;  %7939 = vst [vmem:[#allocation57_spill] sm:$0xff] %v5782_v5 }
 0x1b1   : > { %1590 = vrot.lane.b32.xlu0 %v628_v7, %s4754_s17  ;;  %1468 = vrot.lane.b32.xlu1 %v599_v29, %s4753_s14  ;;  %v632_v7 = vld [vmem:[#allocation2 + $0x7a] sm:$0xff]  ;;  %v631_v29 = vld [vmem:[#allocation2 + $0x6a] sm:$0xff] }
 0x1b3   : > { %v5786_v37 = vpop.permute.xlu0 %1234  ;;  %v5788_v2 = vpop.permute.xlu1 %1228 }
 0x1b4   : > { %7940 = vst [vmem:[#allocation58_spill] sm:$0xff] %v5786_v37  ;;  %7941 = vst [vmem:[#allocation61_spill] sm:$0xff] %v5788_v2 }
 0x1b5   : > { %1594 = vrot.lane.b32.xlu0 %v630_v4, %s4754_s17  ;;  %1588 = vrot.lane.b32.xlu1 %v627_v30, %s4754_s17  ;;  %v602_v4 = vld [vmem:[#allocation2 + $0x91] sm:$0xff]  ;;  %v601_v30 = vld [vmem:[#allocation2 + $0x81] sm:$0xff] }
 0x1b7   : > { %v5792_v61 = vpop.permute.xlu0 %1238  ;;  %v5794_v40 = vpop.permute.xlu1 %1232 }
 0x1b8   : > { %7942 = vst [vmem:[#allocation62_spill] sm:$0xff] %v5792_v61  ;;  %7943 = vst [vmem:[#allocation65_spill] sm:$0xff] %v5794_v40 }
 0x1b9   : > { %1470 = vrot.lane.b32.xlu0 %v600_v6, %s4753_s14  ;;  %1592 = vrot.lane.b32.xlu1 %v629_v45, %s4754_s17  ;;  %v634_v6 = vld [vmem:[#allocation2 + $0x92] sm:$0xff]  ;;  %v633_v45 = vld [vmem:[#allocation2 + $0x82] sm:$0xff] }
 0x1bb   : > { %v5798_v43 = vpop.permute.xlu0 %1242  ;;  %v5800_v37 = vpop.permute.xlu1 %1236 }
 0x1bc   : > { %7944 = vst [vmem:[#allocation66_spill] sm:$0xff] %v5798_v43  ;;  %7945 = vst [vmem:[#allocation113_spill] sm:$0xff] %v5800_v37 }
 0x1bd   : > { %1598 = vrot.lane.b32.xlu0 %v632_v7, %s4754_s17  ;;  %1596 = vrot.lane.b32.xlu1 %v631_v29, %s4754_s17  ;;  %v604_v7 = vld [vmem:[#allocation2 + $0xa9] sm:$0xff]  ;;  %v603_v29 = vld [vmem:[#allocation2 + $0x99] sm:$0xff] }
 0x1bf   : > { %v5804_v2 = vpop.permute.xlu0 %1246  ;;  %v5806_v61 = vpop.permute.xlu1 %1240 }
 0x1c0   : > { %7946 = vst [vmem:[#allocation114_spill] sm:$0xff] %v5804_v2  ;;  %7947 = vst [vmem:[#allocation115_spill] sm:$0xff] %v5806_v61 }
 0x1c1   : > { %1474 = vrot.lane.b32.xlu0 %v602_v4, %s4753_s14  ;;  %1472 = vrot.lane.b32.xlu1 %v601_v30, %s4753_s14  ;;  %v636_v4 = vld [vmem:[#allocation2 + $0xaa] sm:$0xff]  ;;  %v635_v30 = vld [vmem:[#allocation2 + $0x9a] sm:$0xff] }
 0x1c3   : > { %v5810_v40 = vpop.permute.xlu0 %1250  ;;  %v5812_v43 = vpop.permute.xlu1 %1244 }
 0x1c4   : > { %7948 = vst [vmem:[#allocation116_spill] sm:$0xff] %v5810_v40  ;;  %7949 = vst [vmem:[#allocation117_spill] sm:$0xff] %v5812_v43 }
 0x1c5   : > { %1602 = vrot.lane.b32.xlu0 %v634_v6, %s4754_s17  ;;  %1600 = vrot.lane.b32.xlu1 %v633_v45, %s4754_s17  ;;  %v606_v6 = vld [vmem:[#allocation2 + $0xc1] sm:$0xff]  ;;  %v605_v45 = vld [vmem:[#allocation2 + $0xb1] sm:$0xff] }
 0x1c7   : > { %v5816_v37 = vpop.permute.xlu0 %1254  ;;  %v5818_v2 = vpop.permute.xlu1 %1248 }
 0x1c8   : > { %7950 = vst [vmem:[#allocation118_spill] sm:$0xff] %v5816_v37  ;;  %7951 = vst [vmem:[#allocation119_spill] sm:$0xff] %v5818_v2 }
 0x1c9   : > { %1478 = vrot.lane.b32.xlu0 %v604_v7, %s4753_s14  ;;  %1476 = vrot.lane.b32.xlu1 %v603_v29, %s4753_s14  ;;  %v638_v7 = vld [vmem:[#allocation2 + $0xc2] sm:$0xff]  ;;  %v637_v29 = vld [vmem:[#allocation2 + $0xb2] sm:$0xff] }
 0x1cb   : > { %v5822_v61 = vpop.permute.xlu0 %1258  ;;  %v5824_v40 = vpop.permute.xlu1 %1252 }
 0x1cc   : > { %7952 = vst [vmem:[#allocation120_spill] sm:$0xff] %v5822_v61  ;;  %7953 = vst [vmem:[#allocation121_spill] sm:$0xff] %v5824_v40 }
 0x1cd   : > { %1606 = vrot.lane.b32.xlu0 %v636_v4, %s4754_s17  ;;  %1604 = vrot.lane.b32.xlu1 %v635_v30, %s4754_s17  ;;  %v608_v4 = vld [vmem:[#allocation2 + $0xd9] sm:$0xff]  ;;  %v607_v30 = vld [vmem:[#allocation2 + $0xc9] sm:$0xff] }
 0x1cf   : > { %v5828_v43 = vpop.permute.xlu0 %1262  ;;  %v5830_v37 = vpop.permute.xlu1 %1256 }
 0x1d0   : > { %7954 = vst [vmem:[#allocation122_spill] sm:$0xff] %v5828_v43  ;;  %7955 = vst [vmem:[#allocation123_spill] sm:$0xff] %v5830_v37 }
 0x1d1   : > { %1482 = vrot.lane.b32.xlu0 %v606_v6, %s4753_s14  ;;  %1480 = vrot.lane.b32.xlu1 %v605_v45, %s4753_s14  ;;  %v640_v6 = vld [vmem:[#allocation2 + $0xda] sm:$0xff]  ;;  %v639_v45 = vld [vmem:[#allocation2 + $0xca] sm:$0xff] }
 0x1d3   : > { %v5834_v2 = vpop.permute.xlu0 %1330  ;;  %v5836_v61 = vpop.permute.xlu1 %1260 }
 0x1d4   : > { %7956 = vst [vmem:[#allocation124_spill] sm:$0xff] %v5836_v61 }
 0x1d5   : > { %1610 = vrot.lane.b32.xlu0 %v638_v7, %s4754_s17  ;;  %1608 = vrot.lane.b32.xlu1 %v637_v29, %s4754_s17  ;;  %v610_v7 = vld [vmem:[#allocation2 + $0xf1] sm:$0xff]  ;;  %v609_v29 = vld [vmem:[#allocation2 + $0xe1] sm:$0xff] }
 0x1d7   : > { %v5840_v40 = vpop.permute.xlu0 %1334  ;;  %v5842_v43 = vpop.permute.xlu1 %1264 }
 0x1d8   : > { %7957 = vst [vmem:[#allocation125_spill] sm:$0xff] %v5842_v43 }
 0x1d9   : > { %1486 = vrot.lane.b32.xlu0 %v608_v4, %s4753_s14  ;;  %1484 = vrot.lane.b32.xlu1 %v607_v30, %s4753_s14  ;;  %v642_v4 = vld [vmem:[#allocation2 + $0xf2] sm:$0xff]  ;;  %v641_v30 = vld [vmem:[#allocation2 + $0xe2] sm:$0xff] }
 0x1db   : > { %v5846_v37 = vpop.permute.xlu0 %1338  ;;  %v5848_v12 = vpop.permute.xlu1 %1332 }
 0x1dd   : > { %1614 = vrot.lane.b32.xlu0 %v640_v6, %s4754_s17  ;;  %1612 = vrot.lane.b32.xlu1 %v639_v45, %s4754_s17  ;;  %v612_v6 = vld [vmem:[#allocation2 + $0x109] sm:$0xff]  ;;  %v611_v45 = vld [vmem:[#allocation2 + $0xf9] sm:$0xff] }
 0x1df   : > { %v5852_v61 = vpop.permute.xlu0 %1342  ;;  %v5854_v38 = vpop.permute.xlu1 %1336 }
 0x1e1   : > { %1490 = vrot.lane.b32.xlu0 %v610_v7, %s4753_s14  ;;  %1488 = vrot.lane.b32.xlu1 %v609_v29, %s4753_s14  ;;  %v644_v7 = vld [vmem:[#allocation2 + $0x10a] sm:$0xff]  ;;  %v643_v29 = vld [vmem:[#allocation2 + $0xfa] sm:$0xff] }
 0x1e3   : > { %v5858_v43 = vpop.permute.xlu0 %1346  ;;  %v5860_v35 = vpop.permute.xlu1 %1340 }
 0x1e5   : > { %1618 = vrot.lane.b32.xlu0 %v642_v4, %s4754_s17  ;;  %1616 = vrot.lane.b32.xlu1 %v641_v30, %s4754_s17  ;;  %v614_v4 = vld [vmem:[#allocation2 + $0x121] sm:$0xff]  ;;  %v613_v30 = vld [vmem:[#allocation2 + $0x111] sm:$0xff] }
 0x1e7   : > { %v5864_v62 = vpop.permute.xlu0 %1350  ;;  %v5866_v56 = vpop.permute.xlu1 %1344 }
 0x1e9   : > { %1494 = vrot.lane.b32.xlu0 %v612_v6, %s4753_s14  ;;  %1492 = vrot.lane.b32.xlu1 %v611_v45, %s4753_s14  ;;  %v646_v6 = vld [vmem:[#allocation2 + $0x122] sm:$0xff]  ;;  %v645_v45 = vld [vmem:[#allocation2 + $0x112] sm:$0xff] }
 0x1eb   : > { %v5870_v5 = vpop.permute.xlu0 %1354  ;;  %v5872_v46 = vpop.permute.xlu1 %1348 }
 0x1ec   : > { %7958 = vst [vmem:[#allocation126_spill] sm:$0xff] %v5870_v5 }
 0x1ed   : > { %1622 = vrot.lane.b32.xlu0 %v644_v7, %s4754_s17  ;;  %1620 = vrot.lane.b32.xlu1 %v643_v29, %s4754_s17  ;;  %v616_v7 = vld [vmem:[#allocation2 + $0x139] sm:$0xff]  ;;  %v615_v29 = vld [vmem:[#allocation2 + $0x129] sm:$0xff] }
 0x1ef   : > { %v5876_v9 = vpop.permute.xlu0 %1358  ;;  %v5878_v11 = vpop.permute.xlu1 %1352 }
 0x1f0   : > { %7959 = vst [vmem:[#allocation127_spill] sm:$0xff] %v5876_v9  ;;  %7960 = vst [vmem:[#allocation128_spill] sm:$0xff] %v5878_v11 }
 0x1f1   : > { %1498 = vrot.lane.b32.xlu0 %v614_v4, %s4753_s14  ;;  %1496 = vrot.lane.b32.xlu1 %v613_v30, %s4753_s14  ;;  %v648_v4 = vld [vmem:[#allocation2 + $0x13a] sm:$0xff]  ;;  %v647_v30 = vld [vmem:[#allocation2 + $0x12a] sm:$0xff] }
 0x1f3   : > { %v5882_v16 = vpop.permute.xlu0 %1362  ;;  %v5884_v5 = vpop.permute.xlu1 %1356 }
 0x1f4   : > { %7961 = vst [vmem:[#allocation129_spill] sm:$0xff] %v5882_v16  ;;  %7962 = vst [vmem:[#allocation130_spill] sm:$0xff] %v5884_v5 }
 0x1f5   : > { %1626 = vrot.lane.b32.xlu0 %v646_v6, %s4754_s17  ;;  %1624 = vrot.lane.b32.xlu1 %v645_v45, %s4754_s17  ;;  %v618_v6 = vld [vmem:[#allocation2 + $0x151] sm:$0xff]  ;;  %v617_v45 = vld [vmem:[#allocation2 + $0x141] sm:$0xff] }
 0x1f7   : > { %v5888_v33 = vpop.permute.xlu0 %1366  ;;  %v5890_v9 = vpop.permute.xlu1 %1360 }
 0x1f8   : > { %7963 = vst [vmem:[#allocation131_spill] sm:$0xff] %v5888_v33  ;;  %7964 = vst [vmem:[#allocation132_spill] sm:$0xff] %v5890_v9 }
 0x1f9   : > { %1502 = vrot.lane.b32.xlu0 %v616_v7, %s4753_s14  ;;  %1500 = vrot.lane.b32.xlu1 %v615_v29, %s4753_s14  ;;  %v650_v7 = vld [vmem:[#allocation2 + $0x152] sm:$0xff]  ;;  %v649_v29 = vld [vmem:[#allocation2 + $0x142] sm:$0xff] }
 0x1fb   : > { %v5894_v11 = vpop.permute.xlu0 %1370  ;;  %v5896_v16 = vpop.permute.xlu1 %1364 }
 0x1fc   : > { %7965 = vst [vmem:[#allocation133_spill] sm:$0xff] %v5894_v11  ;;  %7966 = vst [vmem:[#allocation134_spill] sm:$0xff] %v5896_v16 }
 0x1fd   : > { %1630 = vrot.lane.b32.xlu0 %v648_v4, %s4754_s17  ;;  %1628 = vrot.lane.b32.xlu1 %v647_v30, %s4754_s17  ;;  %v620_v4 = vld [vmem:[#allocation2 + $0x169] sm:$0xff]  ;;  %v619_v30 = vld [vmem:[#allocation2 + $0x159] sm:$0xff] }
 0x1ff   : > { %v5900_v5 = vpop.permute.xlu0 %1374  ;;  %v5902_v33 = vpop.permute.xlu1 %1368 }
 0x200   : > { %7967 = vst [vmem:[#allocation135_spill] sm:$0xff] %v5900_v5  ;;  %7968 = vst [vmem:[#allocation136_spill] sm:$0xff] %v5902_v33 }
 0x201   : > { %1506 = vrot.lane.b32.xlu0 %v618_v6, %s4753_s14  ;;  %1504 = vrot.lane.b32.xlu1 %v617_v45, %s4753_s14  ;;  %v652_v6 = vld [vmem:[#allocation2 + $0x16a] sm:$0xff]  ;;  %v651_v45 = vld [vmem:[#allocation2 + $0x15a] sm:$0xff] }
 0x203   : > { %v5906_v9 = vpop.permute.xlu0 %1378  ;;  %v5908_v11 = vpop.permute.xlu1 %1372 }
 0x204   : > { %7969 = vst [vmem:[#allocation137_spill] sm:$0xff] %v5906_v9  ;;  %7970 = vst [vmem:[#allocation138_spill] sm:$0xff] %v5908_v11  ;;  %v657_v11 = vld [vmem:[#allocation2 + $0x1a2] sm:$0xff] }
 0x205   : > { %1634 = vrot.lane.b32.xlu0 %v650_v7, %s4754_s17  ;;  %1632 = vrot.lane.b32.xlu1 %v649_v29, %s4754_s17  ;;  %v621_v7 = vld [vmem:[#allocation2 + $0x171] sm:$0xff] }
 0x207   : > { %v5912_v16 = vpop.permute.xlu0 %1382  ;;  %v5914_v5 = vpop.permute.xlu1 %1376 }
 0x208   : > { %7971 = vst [vmem:[#allocation139_spill] sm:$0xff] %v5912_v16  ;;  %7972 = vst [vmem:[#allocation140_spill] sm:$0xff] %v5914_v5 }
 0x209   : > { %1510 = vrot.lane.b32.xlu0 %v620_v4, %s4753_s14  ;;  %1508 = vrot.lane.b32.xlu1 %v619_v30, %s4753_s14  ;;  %v653_v4 = vld [vmem:[#allocation2 + $0x172] sm:$0xff] }
 0x20b   : > { %v5918_v33 = vpop.permute.xlu0 %1386  ;;  %v5920_v9 = vpop.permute.xlu1 %1380 }
 0x20c   : > { %7973 = vst [vmem:[#allocation141_spill] sm:$0xff] %v5918_v33  ;;  %7974 = vst [vmem:[#allocation142_spill] sm:$0xff] %v5920_v9 }
 0x20d   : > { %1638 = vrot.lane.b32.xlu0 %v652_v6, %s4754_s17  ;;  %1636 = vrot.lane.b32.xlu1 %v651_v45, %s4754_s17  ;;  %v369_v6 = vld [vmem:[#allocation2] sm:$0xff] }
 0x20e   : > { %v624_v45 = vld [vmem:[#allocation2 + $0x199] sm:$0xff] }
 0x20f   : > { %v5924_v29 = vpop.permute.xlu0 %1390  ;;  %v5926_v16 = vpop.permute.xlu1 %1384 }
 0x210   : > { %7975 = vst [vmem:[#allocation143_spill] sm:$0xff] %v5924_v29  ;;  %7976 = vst [vmem:[#allocation144_spill] sm:$0xff] %v5926_v16  ;;  %v7979_v16 = vld [vmem:[#allocation3_spill] sm:$0xff] }
 0x211   : > { %1514 = vrot.lane.b32.xlu0 %v5467_v21, %s4753_s14  ;;  %1512 = vrot.lane.b32.xlu1 %v621_v7, %s4753_s14  ;;  %v1682_v21 = vsel %vm257_vm0, %v369_v6, %v7979_v16  ;;  %v7980_v7 = vld [vmem:[#allocation59_spill] sm:$0xff] }
 0x213   : > { %v1459_v30 = vpop.permute.xlu0 %1458  ;;  %v5931_v5 = vpop.permute.xlu1 %1388 }
 0x214   : > { %7977 = vst [vmem:[#allocation145_spill] sm:$0xff] %v5931_v5 }
 0x215   : > { %1642 = vrot.lane.b32.xlu0 %v5599_v60, %s4754_s17  ;;  %1640 = vrot.lane.b32.xlu1 %v653_v4, %s4754_s17  ;;  %v1715_v60 = vsel %vm1714_vm4, %v1682_v21, %v7980_v7  ;;  %v656_v4 = vld [vmem:[#allocation2 + $0x19a] sm:$0xff] }
 0x216   : > { %v1748_v5 = vsel %vm1747_vm5, %v1715_v60, %v5451_v17  ;;  %v7981_v60 = vld [vmem:[#allocation5_spill] sm:$0xff] }
 0x217   : > { %v1463_v29 = vpop.permute.xlu0 %1462  ;;  %v5936_v33 = vpop.permute.xlu1 %1392  ;;  %v1781_v16 = vsel %vm1780_vm6, %v1748_v5, %v5583_v53 }
 0x218   : > { %7978 = vst [vmem:[#allocation146_spill] sm:$0xff] %v5936_v33  ;;  %v1814_v6 = vsel %vm1813_vm7, %v1781_v16, %v5715_v47 }
 0x219   : > { %1518 = vrot.lane.b32.xlu0 %v624_v45, %s4753_s14  ;;  %1516 = vrot.lane.b32.xlu1 %v5485_v27, %s4753_s14  ;;  %v370_v27 = vld [vmem:[#allocation2 + $0x8] sm:$0xff]  ;;  %v1847_v17 = vsel %vm1846_vm8, %v1814_v6, %v5834_v2  ;;  %v7983_v2 = vld [vmem:[#allocation68_spill] sm:$0xff] }
 0x21a   : > { %v625_v45 = vld [vmem:[#allocation2 + $0x1a1] sm:$0xff]  ;;  %v1880_v21 = vsel %vm1879_vm9, %v1847_v17, %v1459_v30  ;;  %v1683_v47 = vsel %vm257_vm0, %v370_v27, %v7981_v60  ;;  %v7984_v30 = vld [vmem:[#allocation63_spill] sm:$0xff] }
 0x21b   : > { %v5947_v33 = vpop.permute.xlu0 %1466  ;;  %v1461_v9 = vpop.permute.xlu1 %1460  ;;  %v1716_v6 = vsel %vm1714_vm4, %v1683_v47, %v7983_v2  ;;  %v4670_v60 = vld [vmem:[#allocation2 + $0x30] sm:$0xff]  ;;  %v4671_v47 = vld [vmem:[#allocation2 + $0x20] sm:$0xff]  ;;  %v7986_v2 = vld [vmem:[#allocation12_spill] sm:$0xff] }
 0x21c   : > { %v1685_v63 = vsel %vm257_vm0, %v4671_v47, %v7986_v2  ;;  %v4673_v2 = vld [vmem:[#allocation2 + $0x38] sm:$0xff] }
 0x21d   : > { %1646 = vrot.lane.b32.xlu0 %v656_v4, %s4754_s17  ;;  %1644 = vrot.lane.b32.xlu1 %v5617_v59, %s4754_s17  ;;  %v4669_v59 = vld [vmem:[#allocation2 + $0x18] sm:$0xff]  ;;  %v7982_v4 = vld [vmem:[#allocation9_spill] sm:$0xff] }
 0x21e   : > { %v1684_v16 = vsel %vm257_vm0, %v4669_v59, %v7982_v4  ;;  %v7985_v59 = vld [vmem:[#allocation8_spill] sm:$0xff] }
 0x21f   : > { %v1587_v7 = vpop.permute.xlu0 %1586  ;;  %v1465_v53 = vpop.permute.xlu1 %1464  ;;  %v1717_v17 = vsel %vm1714_vm4, %v1684_v16, %v7984_v30  ;;  %v1686_v4 = vsel %vm257_vm0, %v4670_v60, %v7985_v59  ;;  %v7988_v30 = vld [vmem:[#allocation70_spill] sm:$0xff]  ;;  %v7989_v59 = vld [vmem:[#allocation67_spill] sm:$0xff] }
 0x220   : > { %v1913_v5 = vsel %vm1912_vm10, %v1880_v21, %v1587_v7  ;;  %v1749_v21 = vsel %vm1747_vm5, %v1716_v6, %v5471_v18  ;;  %v7987_v6 = vld [vmem:[#allocation11_spill] sm:$0xff] }
 0x221   : > { %4530 = vmatprep.mubr.msk.f32.mxu0 %vm1952_vm11, %v1913_v5  ;;  %1520 = vrot.lane.b32.xlu1 %v625_v45, %s4753_s14  ;;  %v1750_v5 = vsel %vm1747_vm5, %v1717_v17, %v5459_v19  ;;  %v1782_v45 = vsel %vm1780_vm6, %v1749_v21, %v5603_v54  ;;  %v4672_v19 = vld [vmem:[#allocation2 + $0x48] sm:$0xff]  ;;  %v1718_v17 = vsel %vm1714_vm4, %v1685_v63, %v7988_v30 }
 0x222   : > { %v1783_v16 = vsel %vm1780_vm6, %v1750_v5, %v5591_v58  ;;  %v1815_v18 = vsel %vm1813_vm7, %v1782_v45, %v5733_v44  ;;  %v1688_v54 = vsel %vm257_vm0, %v4672_v19, %v7987_v6  ;;  %v1719_v58 = vsel %vm1714_vm4, %v1686_v4, %v7989_v59 }
 0x223   : > { %v1591_v7 = vpop.permute.xlu0 %1590  ;;  %v1469_v27 = vpop.permute.xlu1 %1468  ;;  %v1816_v21 = vsel %vm1813_vm7, %v1783_v16, %v5723_v52  ;;  %v1848_v60 = vsel %vm1846_vm8, %v1815_v18, %v5848_v12  ;;  %v1751_v44 = vsel %vm1747_vm5, %v1718_v17, %v5479_v26  ;;  %v1752_v63 = vsel %vm1747_vm5, %v1719_v58, %v5469_v22  ;;  %v7990_v16 = vld [vmem:[#allocation14_spill] sm:$0xff]  ;;  %v7991_v22 = vld [vmem:[#allocation69_spill] sm:$0xff] }
 0x224   : > { %v1881_v5 = vsel %vm1879_vm9, %v1848_v60, %v1461_v9  ;;  %v1784_v52 = vsel %vm1780_vm6, %v1751_v44, %v5611_v51  ;;  %v1687_v26 = vsel %vm257_vm0, %v4673_v2, %v7990_v16  ;;  %v1721_v51 = vsel %vm1714_vm4, %v1688_v54, %v7991_v22  ;;  %v4674_v58 = vld [vmem:[#allocation2 + $0x60] sm:$0xff] }
 0x225   : > { %1648 = vrot.lane.b32.xlu1 %v657_v11, %s4754_s17  ;;  %v1849_v11 = vsel %vm1846_vm8, %v1816_v21, %v5840_v40  ;;  %v1785_v40 = vsel %vm1780_vm6, %v1752_v63, %v5601_v49  ;;  %v1817_v9 = vsel %vm1813_vm7, %v1784_v52, %v5746_v10  ;;  %v1754_v49 = vsel %vm1747_vm5, %v1721_v51, %v5477_v25  ;;  %v7992_v44 = vld [vmem:[#allocation13_spill] sm:$0xff]  ;;  %v7995_v51 = vld [vmem:[#allocation16_spill] sm:$0xff] }
 0x226   : > { %v1882_v12 = vsel %vm1879_vm9, %v1849_v11, %v1463_v29  ;;  %v1720_v29 = vsel %vm1714_vm4, %v1687_v26, %v5357_v23  ;;  %v1818_v19 = vsel %vm1813_vm7, %v1785_v40, %v5731_v3  ;;  %v1850_v6 = vsel %vm1846_vm8, %v1817_v9, %v5854_v38 }
 0x227   : > { %v1595_v45 = vpop.permute.xlu0 %1594  ;;  %v1589_v47 = vpop.permute.xlu1 %1588  ;;  %v1915_v18 = vsel %vm1912_vm10, %v1882_v12, %v1591_v7  ;;  %v1753_v10 = vsel %vm1747_vm5, %v1720_v29, %v5489_v20  ;;  %v1851_v7 = vsel %vm1846_vm8, %v1818_v19, %v5846_v37  ;;  %v1883_v54 = vsel %vm1879_vm9, %v1850_v6, %v1465_v53  ;;  %v4677_v29 = vld [vmem:[#allocation2 + $0x68] sm:$0xff]  ;;  %v7996_v19 = vld [vmem:[#allocation20_spill] sm:$0xff] }
 0x228   : > { %v1914_v4 = vsel %vm1912_vm10, %v1881_v5, %v1589_v47  ;;  %v1787_v3 = vsel %vm1780_vm6, %v1754_v49, %v5609_v55  ;;  %v1786_v38 = vsel %vm1780_vm6, %v1753_v10, %v5621_v50  ;;  %v1884_v17 = vsel %vm1879_vm9, %v1851_v7, %v5947_v33  ;;  %v7993_v5 = vld [vmem:[#allocation17_spill] sm:$0xff] }
 0x229   : > { %4531 = vmatmul.mubr.msk.f32.vlgmr.msra.gmra.mrb[0].mxu0 %vm1952_vm11, %v1914_v4  ;;  %v1820_v20 = vsel %vm1813_vm7, %v1787_v3, %v5744_v41  ;;  %v1819_v37 = vsel %vm1813_vm7, %v1786_v38, %v5759_v8  ;;  %v1917_v53 = vsel %vm1912_vm10, %v1884_v17, %v1595_v45  ;;  %v1690_v11 = vsel %vm257_vm0, %v4674_v58, %v7992_v44  ;;  %v7994_v45 = vld [vmem:[#allocation71_spill] sm:$0xff] }
 0x22a   : > { %4533 = vmatprep.mubr.msk.f32.mxu0 %vm1952_vm11, %v1915_v18  ;;  %v1853_v55 = vsel %vm1846_vm8, %v1820_v20, %v5852_v61  ;;  %v1852_v50 = vsel %vm1846_vm8, %v1819_v37, %v5860_v35  ;;  %v4675_v61 = vld [vmem:[#allocation2 + $0x50] sm:$0xff] }
 0x22b   : > { %v1471_v23 = vpop.permute.xlu0 %1470  ;;  %v1593_v30 = vpop.permute.xlu1 %1592  ;;  %v1885_v33 = vsel %vm1879_vm9, %v1852_v50, %v1469_v27  ;;  %v1689_v35 = vsel %vm257_vm0, %v4675_v61, %v7993_v5  ;;  %v1723_v27 = vsel %vm1714_vm4, %v1690_v11, %v7994_v45  ;;  %v7999_v50 = vld [vmem:[#allocation24_spill] sm:$0xff]  ;;  %v8003_v11 = vld [vmem:[#allocation6_spill] sm:$0xff] }
 0x22c   : > { %v1916_v25 = vsel %vm1912_vm10, %v1883_v54, %v1593_v30  ;;  %v1886_v21 = vsel %vm1879_vm9, %v1853_v55, %v1471_v23  ;;  %v1722_v47 = vsel %vm1714_vm4, %v1689_v35, %v5365_v36  ;;  %v1756_v63 = vsel %vm1747_vm5, %v1723_v27, %v5487_v28  ;;  %v4679_v55 = vld [vmem:[#allocation2 + $0x80] sm:$0xff]  ;;  %v8004_v5 = vld [vmem:[#allocation10_spill] sm:$0xff] }
 0x22d   : > { %4534 = vmatmul.mubr.msk.f32.gmra.mrb[2].mxu0 %vm1952_vm11, %v1916_v25  ;;  %v1755_v52 = vsel %vm1747_vm5, %v1722_v47, %v5497_v15  ;;  %v1789_v2 = vsel %vm1780_vm6, %v1756_v63, %v5619_v13  ;;  %v8006_v27 = vld [vmem:[#allocation57_spill] sm:$0xff]  ;;  %v8007_v63 = vld [vmem:[#allocation126_spill] sm:$0xff] }
 0x22e   : > { %4536 = vmatprep.mubr.msk.f32.mxu0 %vm1952_vm11, %v1917_v53  ;;  %v1788_v16 = vsel %vm1780_vm6, %v1755_v52, %v5629_v14  ;;  %v1822_v26 = vsel %vm1813_vm7, %v1789_v2, %v5757_v31  ;;  %v4676_v31 = vld [vmem:[#allocation2 + $0x78] sm:$0xff]  ;;  %v7998_v53 = vld [vmem:[#allocation19_spill] sm:$0xff] }
 0x22f   : > { %v1599_v41 = vpop.permute.xlu0 %1598  ;;  %v1597_v60 = vpop.permute.xlu1 %1596  ;;  %v1821_v36 = vsel %vm1813_vm7, %v1788_v16, %v5769_v42  ;;  %v1855_v28 = vsel %vm1846_vm8, %v1822_v26, %v5858_v43  ;;  %v1692_v42 = vsel %vm257_vm0, %v4676_v31, %v7995_v51  ;;  %v1691_v43 = vsel %vm257_vm0, %v4677_v29, %v7996_v19  ;;  %v8011_v31 = vld [vmem:[#allocation73_spill] sm:$0xff]  ;;  %v8013_v19 = vld [vmem:[#allocation94_spill] sm:$0xff] }
 0x230   : > { %v1919_v8 = vsel %vm1912_vm10, %v1886_v21, %v1599_v41  ;;  %v1918_v59 = vsel %vm1912_vm10, %v1885_v33, %v1597_v60  ;;  %v1854_v15 = vsel %vm1846_vm8, %v1821_v36, %v5866_v56  ;;  %v7997_v56 = vld [vmem:[#allocation72_spill] sm:$0xff]  ;;  %v1724_v49 = vsel %vm1714_vm4, %v1691_v43, %v5373_v24  ;;  %v8000_v33 = vld [vmem:[#allocation74_spill] sm:$0xff]  ;;  %v8001_v41 = vld [vmem:[#allocation93_spill] sm:$0xff] }
 0x231   : > { %4537 = vmatmul.mubr.msk.f32.gmra.mrb[4].mxu0 %vm1952_vm11, %v1918_v59  ;;  %v1725_v6 = vsel %vm1714_vm4, %v1692_v42, %v7997_v56  ;;  %v1757_v7 = vsel %vm1747_vm5, %v1724_v49, %v5505_v34  ;;  %v8012_v42 = vld [vmem:[#allocation76_spill] sm:$0xff]  ;;  %v8014_v56 = vld [vmem:[#allocation97_spill] sm:$0xff] }
 0x232   : > { %4539 = vmatprep.mubr.msk.f32.mxu0 %vm1952_vm11, %v1919_v8  ;;  %v1758_v10 = vsel %vm1747_vm5, %v1725_v6, %v5495_v32  ;;  %v1790_v3 = vsel %vm1780_vm6, %v1757_v7, %v5637_v48  ;;  %v8002_v8 = vld [vmem:[#allocation95_spill] sm:$0xff] }
 0x233   : > { %v1475_v12 = vpop.permute.xlu0 %1474  ;;  %v1473_v4 = vpop.permute.xlu1 %1472  ;;  %v1791_v30 = vsel %vm1780_vm6, %v1758_v10, %v5627_v0  ;;  %v1823_v24 = vsel %vm1813_vm7, %v1790_v3, %v5776_v1  ;;  %v8015_v7 = vld [vmem:[#allocation7_spill] sm:$0xff]  ;;  %v8017_v3 = vld [vmem:[#allocation54_spill] sm:$0xff] }
 0x234   : > { %v1888_v40 = vsel %vm1879_vm9, %v1855_v28, %v1475_v12  ;;  %v1887_v9 = vsel %vm1879_vm9, %v1854_v15, %v1473_v4  ;;  %v1824_v38 = vsel %vm1813_vm7, %v1791_v30, %v5767_v39  ;;  %v1856_v34 = vsel %vm1846_vm8, %v1823_v24, %v5872_v46  ;;  %v4678_v39 = vld [vmem:[#allocation2 + $0x90] sm:$0xff]  ;;  %v8008_v12 = vld [vmem:[#allocation128_spill] sm:$0xff]  ;;  %v8018_v24 = vld [vmem:[#allocation61_spill] sm:$0xff] }
 0x235   : > { %v1857_v32 = vsel %vm1846_vm8, %v1824_v38, %v5864_v62  ;;  %v1694_v1 = vsel %vm257_vm0, %v4678_v39, %v7998_v53  ;;  %v1693_v62 = vsel %vm257_vm0, %v4679_v55, %v7999_v50  ;;  %v4682_v55 = vld [vmem:[#allocation2 + $0xc0] sm:$0xff]  ;;  %v8021_v50 = vld [vmem:[#allocation27_spill] sm:$0xff] }
 0x236   : > { %v1727_v46 = vsel %vm1714_vm4, %v1694_v1, %v5371_v57  ;;  %v1726_v21 = vsel %vm1714_vm4, %v1693_v62, %v8000_v33  ;;  %v8005_v57 = vld [vmem:[#allocation53_spill] sm:$0xff]  ;;  %v1698_v62 = vsel %vm257_vm0, %v4682_v55, %v8021_v50  ;;  %v8022_v33 = vld [vmem:[#allocation32_spill] sm:$0xff] }
 0x237   : > { %v1603_v13 = vpop.permute.xlu0 %1602  ;;  %v1601_v18 = vpop.permute.xlu1 %1600  ;;  %v1760_v60 = vsel %vm1747_vm5, %v1727_v46, %v8001_v41  ;;  %v1759_v59 = vsel %vm1747_vm5, %v1726_v21, %v8002_v8  ;;  %v4683_v46 = vld [vmem:[#allocation2 + $0xb0] sm:$0xff]  ;;  %v8024_v8 = vld [vmem:[#allocation78_spill] sm:$0xff] }
 0x238   : > { %v1921_v14 = vsel %vm1912_vm10, %v1888_v40, %v1603_v13  ;;  %v1920_v22 = vsel %vm1912_vm10, %v1887_v9, %v1601_v18  ;;  %v1793_v61 = vsel %vm1780_vm6, %v1760_v60, %v8003_v11  ;;  %v1792_v35 = vsel %vm1780_vm6, %v1759_v59, %v8004_v5  ;;  %v4680_v40 = vld [vmem:[#allocation2 + $0xa8] sm:$0xff]  ;;  %v8009_v9 = vld [vmem:[#allocation23_spill] sm:$0xff]  ;;  %v4681_v18 = vld [vmem:[#allocation2 + $0x98] sm:$0xff] }
 0x239   : > { %4540 = vmatmul.mubr.msk.f32.gmra.mrb[6].mxu0 %vm1952_vm11, %v1920_v22  ;;  %v1826_v45 = vsel %vm1813_vm7, %v1793_v61, %v8005_v57  ;;  %v1825_v47 = vsel %vm1813_vm7, %v1792_v35, %v8006_v27  ;;  %v1696_v13 = vsel %vm257_vm0, %v4680_v40, %v8009_v9  ;;  %v1697_v21 = vsel %vm257_vm0, %v4683_v46, %v8022_v33  ;;  %v8023_v41 = vld [vmem:[#allocation75_spill] sm:$0xff]  ;;  %v8028_v27 = vld [vmem:[#allocation22_spill] sm:$0xff] }
 0x23a   : > { %4542 = vmatprep.mubr.msk.f32.mxu0 %vm1952_vm11, %v1921_v14  ;;  %v1859_v52 = vsel %vm1846_vm8, %v1826_v45, %v8007_v63  ;;  %v1858_v4 = vsel %vm1846_vm8, %v1825_v47, %v8008_v12  ;;  %v8010_v14 = vld [vmem:[#allocation28_spill] sm:$0xff]  ;;  %v1729_v51 = vsel %vm1714_vm4, %v1696_v13, %v8011_v31  ;;  %v1731_v60 = vsel %vm1714_vm4, %v1698_v62, %v8023_v41  ;;  %v8026_v11 = vld [vmem:[#allocation99_spill] sm:$0xff]  ;;  %v8029_v63 = vld [vmem:[#allocation58_spill] sm:$0xff] }
 0x23b   : > { %v1479_v54 = vpop.permute.xlu0 %1478  ;;  %v1477_v23 = vpop.permute.xlu1 %1476  ;;  %v1695_v22 = vsel %vm257_vm0, %v4681_v18, %v8010_v14  ;;  %v1762_v43 = vsel %vm1747_vm5, %v1729_v51, %v8013_v19  ;;  %v1730_v59 = vsel %vm1714_vm4, %v1697_v21, %v8024_v8  ;;  %v8027_v57 = vld [vmem:[#allocation15_spill] sm:$0xff]  ;;  %v8030_v12 = vld [vmem:[#allocation65_spill] sm:$0xff]  ;;  %v4684_v14 = vld [vmem:[#allocation2 + $0xd8] sm:$0xff] }
 0x23c   : > { %v1890_v17 = vsel %vm1879_vm9, %v1857_v32, %v1479_v54  ;;  %v1889_v25 = vsel %vm1879_vm9, %v1856_v34, %v1477_v23  ;;  %v1728_v29 = vsel %vm1714_vm4, %v1695_v22, %v8012_v42  ;;  %v1795_v54 = vsel %vm1780_vm6, %v1762_v43, %v8015_v7  ;;  %v8016_v23 = vld [vmem:[#allocation18_spill] sm:$0xff]  ;;  %v8019_v34 = vld [vmem:[#allocation127_spill] sm:$0xff]  ;;  %v8034_v42 = vld [vmem:[#allocation36_spill] sm:$0xff] }
 0x23d   : > { %v1761_v6 = vsel %vm1747_vm5, %v1728_v29, %v8014_v56  ;;  %v1828_v38 = vsel %vm1813_vm7, %v1795_v54, %v8017_v3  ;;  %v1763_v61 = vsel %vm1747_vm5, %v1730_v59, %v8026_v11  ;;  %v8033_v22 = vld [vmem:[#allocation31_spill] sm:$0xff]  ;;  %v4685_v51 = vld [vmem:[#allocation2 + $0xc8] sm:$0xff]  ;;  %v8035_v19 = vld [vmem:[#allocation77_spill] sm:$0xff] }
 0x23e   : > { %v1794_v30 = vsel %vm1780_vm6, %v1761_v6, %v8016_v23  ;;  %v1796_v47 = vsel %vm1780_vm6, %v1763_v61, %v8028_v27  ;;  %v1700_v31 = vsel %vm257_vm0, %v4684_v14, %v8033_v22  ;;  %v1699_v29 = vsel %vm257_vm0, %v4685_v51, %v8034_v42  ;;  %v8036_v56 = vld [vmem:[#allocation80_spill] sm:$0xff]  ;;  %v8038_v7 = vld [vmem:[#allocation101_spill] sm:$0xff]  ;;  %v4686_v33 = vld [vmem:[#allocation2 + $0xf0] sm:$0xff] }
 0x23f   : > { %v1607_v0 = vpop.permute.xlu0 %1606  ;;  %v1605_v20 = vpop.permute.xlu1 %1604  ;;  %v1827_v32 = vsel %vm1813_vm7, %v1794_v30, %v8018_v24  ;;  %v1733_v43 = vsel %vm1714_vm4, %v1700_v31, %v8035_v19  ;;  %v1732_v6 = vsel %vm1714_vm4, %v1699_v29, %v8036_v56  ;;  %v8039_v3 = vld [vmem:[#allocation21_spill] sm:$0xff]  ;;  %v8040_v24 = vld [vmem:[#allocation26_spill] sm:$0xff]  ;;  %v8045_v21 = vld [vmem:[#allocation35_spill] sm:$0xff] }
 0x240   : > { %v1923_v48 = vsel %vm1912_vm10, %v1890_v17, %v1607_v0  ;;  %v1922_v37 = vsel %vm1912_vm10, %v1889_v25, %v1605_v20  ;;  %v1861_v17 = vsel %vm1846_vm8, %v1828_v38, %v8019_v34  ;;  %v8020_v25 = vld [vmem:[#allocation130_spill] sm:$0xff]  ;;  %v1765_v54 = vsel %vm1747_vm5, %v1732_v6, %v8038_v7  ;;  %v8046_v8 = vld [vmem:[#allocation40_spill] sm:$0xff]  ;;  %v8057_v29 = vld [vmem:[#allocation39_spill] sm:$0xff] }
 0x241   : > { %4543 = vmatmul.mubr.msk.f32.gmra.mrb[8].mxu0 %vm1952_vm11, %v1922_v37  ;;  %v1860_v0 = vsel %vm1846_vm8, %v1827_v32, %v8020_v25  ;;  %v1798_v32 = vsel %vm1780_vm6, %v1765_v54, %v8040_v24  ;;  %v8041_v34 = vld [vmem:[#allocation62_spill] sm:$0xff]  ;;  %v8042_v25 = vld [vmem:[#allocation113_spill] sm:$0xff]  ;;  %v1702_v41 = vsel %vm257_vm0, %v4686_v33, %v8045_v21  ;;  %v8058_v56 = vld [vmem:[#allocation44_spill] sm:$0xff] }
 0x242   : > { %4545 = vmatprep.mubr.msk.f32.mxu0 %vm1952_vm11, %v1923_v48  ;;  %v8048_v11 = vld [vmem:[#allocation82_spill] sm:$0xff]  ;;  %v8060_v7 = vld [vmem:[#allocation84_spill] sm:$0xff] }
 0x243   : > { %v1483_v58 = vpop.permute.xlu0 %1482  ;;  %v1481_v44 = vpop.permute.xlu1 %1480  ;;  %v4688_v42 = vld [vmem:[#allocation2 + $0x108] sm:$0xff] }
 0x244   : > { %v1892_v2 = vsel %vm1879_vm9, %v1859_v52, %v1483_v58  ;;  %v1891_v16 = vsel %vm1879_vm9, %v1858_v4, %v1481_v44  ;;  %v8025_v58 = vld [vmem:[#allocation96_spill] sm:$0xff]  ;;  %v1829_v4 = vsel %vm1813_vm7, %v1796_v47, %v8030_v12  ;;  %v8052_v12 = vld [vmem:[#allocation30_spill] sm:$0xff]  ;;  %v1704_v19 = vsel %vm257_vm0, %v4688_v42, %v8057_v29 }
 0x245   : > { %v1764_v44 = vsel %vm1747_vm5, %v1731_v60, %v8025_v58  ;;  %v4687_v60 = vld [vmem:[#allocation2 + $0xe0] sm:$0xff]  ;;  %v8047_v58 = vld [vmem:[#allocation79_spill] sm:$0xff] }
 0x246   : > { %v1797_v45 = vsel %vm1780_vm6, %v1764_v44, %v8027_v57  ;;  %v1701_v59 = vsel %vm257_vm0, %v4687_v60, %v8046_v8  ;;  %v1735_v44 = vsel %vm1714_vm4, %v1702_v41, %v8047_v58  ;;  %v8050_v57 = vld [vmem:[#allocation103_spill] sm:$0xff]  ;;  %v4690_v8 = vld [vmem:[#allocation2 + $0x120] sm:$0xff] }
 0x247   : > { %v1611_v26 = vpop.permute.xlu0 %1610  ;;  %v1609_v36 = vpop.permute.xlu1 %1608  ;;  %v1830_v52 = vsel %vm1813_vm7, %v1797_v45, %v8029_v63  ;;  %v1734_v61 = vsel %vm1714_vm4, %v1701_v59, %v8048_v11  ;;  %v8051_v63 = vld [vmem:[#allocation25_spill] sm:$0xff]  ;;  %v8069_v59 = vld [vmem:[#allocation43_spill] sm:$0xff]  ;;  %v8070_v11 = vld [vmem:[#allocation48_spill] sm:$0xff] }
 0x248   : > { %v1925_v28 = vsel %vm1912_vm10, %v1892_v2, %v1611_v26  ;;  %v1924_v15 = vsel %vm1912_vm10, %v1891_v16, %v1609_v36  ;;  %v8031_v2 = vld [vmem:[#allocation129_spill] sm:$0xff]  ;;  %v8032_v26 = vld [vmem:[#allocation132_spill] sm:$0xff]  ;;  %v1767_v45 = vsel %vm1747_vm5, %v1734_v61, %v8050_v57  ;;  %v1706_v58 = vsel %vm257_vm0, %v4690_v8, %v8069_v59  ;;  %v8072_v57 = vld [vmem:[#allocation86_spill] sm:$0xff] }
 0x249   : > { %4546 = vmatmul.mubr.msk.f32.gmra.mrb[10].mxu0 %vm1952_vm11, %v1924_v15  ;;  %v1863_v16 = vsel %vm1846_vm8, %v1830_v52, %v8031_v2  ;;  %v1862_v36 = vsel %vm1846_vm8, %v1829_v4, %v8032_v26  ;;  %v1800_v4 = vsel %vm1780_vm6, %v1767_v45, %v8052_v12  ;;  %v8053_v2 = vld [vmem:[#allocation66_spill] sm:$0xff]  ;;  %v8054_v26 = vld [vmem:[#allocation115_spill] sm:$0xff] }
 0x24a   : > { %4548 = vmatprep.mubr.msk.f32.mxu0 %vm1952_vm11, %v1925_v28 }
 0x24b   : > { %v1487_v49 = vpop.permute.xlu0 %1486  ;;  %v1485_v10 = vpop.permute.xlu1 %1484 }
 0x24c   : > { %v1894_v20 = vsel %vm1879_vm9, %v1861_v17, %v1487_v49  ;;  %v1893_v48 = vsel %vm1879_vm9, %v1860_v0, %v1485_v10  ;;  %v8037_v49 = vld [vmem:[#allocation98_spill] sm:$0xff]  ;;  %v1831_v0 = vsel %vm1813_vm7, %v1798_v32, %v8042_v25 }
 0x24d   : > { %v1766_v10 = vsel %vm1747_vm5, %v1733_v43, %v8037_v49  ;;  %v4689_v43 = vld [vmem:[#allocation2 + $0xf8] sm:$0xff]  ;;  %v8059_v49 = vld [vmem:[#allocation81_spill] sm:$0xff]  ;;  %v8064_v25 = vld [vmem:[#allocation34_spill] sm:$0xff] }
 0x24e   : > { %v1799_v38 = vsel %vm1780_vm6, %v1766_v10, %v8039_v3  ;;  %v1703_v6 = vsel %vm257_vm0, %v4689_v43, %v8058_v56  ;;  %v1737_v10 = vsel %vm1714_vm4, %v1704_v19, %v8059_v49  ;;  %v8062_v3 = vld [vmem:[#allocation105_spill] sm:$0xff]  ;;  %v4692_v56 = vld [vmem:[#allocation2 + $0x138] sm:$0xff] }
 0x24f   : > { %v1615_v37 = vpop.permute.xlu0 %1614  ;;  %v1613_v39 = vpop.permute.xlu1 %1612  ;;  %v1832_v17 = vsel %vm1813_vm7, %v1799_v38, %v8041_v34  ;;  %v1736_v54 = vsel %vm1714_vm4, %v1703_v6, %v8060_v7  ;;  %v8063_v34 = vld [vmem:[#allocation29_spill] sm:$0xff]  ;;  %v8081_v6 = vld [vmem:[#allocation47_spill] sm:$0xff]  ;;  %v8082_v7 = vld [vmem:[#allocation52_spill] sm:$0xff] }
 0x250   : > { %v1927_v53 = vsel %vm1912_vm10, %v1894_v20, %v1615_v37  ;;  %v1926_v1 = vsel %vm1912_vm10, %v1893_v48, %v1613_v39  ;;  %v8043_v20 = vld [vmem:[#allocation131_spill] sm:$0xff]  ;;  %v8044_v37 = vld [vmem:[#allocation134_spill] sm:$0xff]  ;;  %v1769_v38 = vsel %vm1747_vm5, %v1736_v54, %v8062_v3  ;;  %v1708_v49 = vsel %vm257_vm0, %v4692_v56, %v8081_v6  ;;  %v8084_v3 = vld [vmem:[#allocation88_spill] sm:$0xff] }
 0x251   : > { %4549 = vmatmul.mubr.msk.f32.gmra.mrb[12].mxu0 %vm1952_vm11, %v1926_v1  ;;  %v1865_v48 = vsel %vm1846_vm8, %v1832_v17, %v8043_v20  ;;  %v1864_v39 = vsel %vm1846_vm8, %v1831_v0, %v8044_v37  ;;  %v1802_v0 = vsel %vm1780_vm6, %v1769_v38, %v8064_v25  ;;  %v8065_v20 = vld [vmem:[#allocation114_spill] sm:$0xff]  ;;  %v8066_v37 = vld [vmem:[#allocation117_spill] sm:$0xff] }
 0x252   : > { %4551 = vmatprep.mubr.msk.f32.mxu0 %vm1952_vm11, %v1927_v53 }
 0x253   : > { %v1491_v5 = vpop.permute.xlu0 %1490  ;;  %v1489_v35 = vpop.permute.xlu1 %1488 }
 0x254   : > { %v1896_v28 = vsel %vm1879_vm9, %v1863_v16, %v1491_v5  ;;  %v1895_v15 = vsel %vm1879_vm9, %v1862_v36, %v1489_v35  ;;  %v8049_v5 = vld [vmem:[#allocation100_spill] sm:$0xff]  ;;  %v1833_v36 = vsel %vm1813_vm7, %v1800_v4, %v8054_v26  ;;  %v8076_v26 = vld [vmem:[#allocation38_spill] sm:$0xff] }
 0x255   : > { %v1768_v35 = vsel %vm1747_vm5, %v1735_v44, %v8049_v5  ;;  %v4691_v44 = vld [vmem:[#allocation2 + $0x110] sm:$0xff] }
 0x256   : > { %v1801_v52 = vsel %vm1780_vm6, %v1768_v35, %v8051_v63  ;;  %v1705_v61 = vsel %vm257_vm0, %v4691_v44, %v8070_v11  ;;  %v8071_v5 = vld [vmem:[#allocation83_spill] sm:$0xff] }
 0x257   : > { %v1619_v40 = vpop.permute.xlu0 %1618  ;;  %v1617_v9 = vpop.permute.xlu1 %1616  ;;  %v1834_v16 = vsel %vm1813_vm7, %v1801_v52, %v8053_v2  ;;  %v1739_v35 = vsel %vm1714_vm4, %v1706_v58, %v8071_v5  ;;  %v1738_v45 = vsel %vm1714_vm4, %v1705_v61, %v8072_v57  ;;  %v8074_v63 = vld [vmem:[#allocation107_spill] sm:$0xff]  ;;  %v8075_v2 = vld [vmem:[#allocation33_spill] sm:$0xff]  ;;  %v8094_v57 = vld [vmem:[#allocation56_spill] sm:$0xff] }
 0x258   : > { %v1929_v13 = vsel %vm1912_vm10, %v1896_v28, %v1619_v40  ;;  %v1928_v18 = vsel %vm1912_vm10, %v1895_v15, %v1617_v9  ;;  %v8055_v28 = vld [vmem:[#allocation133_spill] sm:$0xff]  ;;  %v8056_v40 = vld [vmem:[#allocation136_spill] sm:$0xff]  ;;  %v1771_v52 = vsel %vm1747_vm5, %v1738_v45, %v8074_v63  ;;  %v4694_v11 = vld [vmem:[#allocation2 + $0x150] sm:$0xff] }
 0x259   : > { %4552 = vmatmul.mubr.msk.f32.gmra.mrb[14].mxu0 %vm1952_vm11, %v1928_v18  ;;  %v1867_v15 = vsel %vm1846_vm8, %v1834_v16, %v8055_v28  ;;  %v1866_v9 = vsel %vm1846_vm8, %v1833_v36, %v8056_v40  ;;  %v1804_v36 = vsel %vm1780_vm6, %v1771_v52, %v8076_v26  ;;  %v8077_v28 = vld [vmem:[#allocation116_spill] sm:$0xff]  ;;  %v8078_v40 = vld [vmem:[#allocation119_spill] sm:$0xff]  ;;  %v8096_v63 = vld [vmem:[#allocation90_spill] sm:$0xff] }
 0x25a   : > { %4554 = vmatprep.mubr.msk.f32.mxu0 %vm1952_vm11, %v1929_v13  ;;  %v8093_v61 = vld [vmem:[#allocation51_spill] sm:$0xff] }
 0x25b   : > { %v1495_v23 = vpop.permute.xlu0 %1494  ;;  %v1493_v30 = vpop.permute.xlu1 %1492  ;;  %v1710_v5 = vsel %vm257_vm0, %v4694_v11, %v8093_v61 }
 0x25c   : > { %v1898_v53 = vsel %vm1879_vm9, %v1865_v48, %v1495_v23  ;;  %v1897_v1 = vsel %vm1879_vm9, %v1864_v39, %v1493_v30  ;;  %v8061_v23 = vld [vmem:[#allocation102_spill] sm:$0xff]  ;;  %v1835_v39 = vsel %vm1813_vm7, %v1802_v0, %v8066_v37 }
 0x25d   : > { %v1770_v30 = vsel %vm1747_vm5, %v1737_v10, %v8061_v23  ;;  %v4693_v10 = vld [vmem:[#allocation2 + $0x128] sm:$0xff]  ;;  %v8083_v23 = vld [vmem:[#allocation85_spill] sm:$0xff] }
 0x25e   : > { %v1803_v17 = vsel %vm1780_vm6, %v1770_v30, %v8063_v34  ;;  %v1707_v54 = vsel %vm257_vm0, %v4693_v10, %v8082_v7  ;;  %v1741_v30 = vsel %vm1714_vm4, %v1708_v49, %v8083_v23  ;;  %v8086_v34 = vld [vmem:[#allocation109_spill] sm:$0xff]  ;;  %v8088_v37 = vld [vmem:[#allocation42_spill] sm:$0xff] }
 0x25f   : > { %v1623_v55 = vpop.permute.xlu0 %1622  ;;  %v1621_v50 = vpop.permute.xlu1 %1620  ;;  %v1836_v48 = vsel %vm1813_vm7, %v1803_v17, %v8065_v20  ;;  %v1740_v38 = vsel %vm1714_vm4, %v1707_v54, %v8084_v3  ;;  %v8087_v20 = vld [vmem:[#allocation37_spill] sm:$0xff]  ;;  %v4696_v23 = vld [vmem:[#allocation2 + $0x168] sm:$0xff] }
 0x260   : > { %v1931_v62 = vsel %vm1912_vm10, %v1898_v53, %v1623_v55  ;;  %v1930_v46 = vsel %vm1912_vm10, %v1897_v1, %v1621_v50  ;;  %v8067_v53 = vld [vmem:[#allocation135_spill] sm:$0xff]  ;;  %v8068_v55 = vld [vmem:[#allocation138_spill] sm:$0xff]  ;;  %v1773_v17 = vsel %vm1747_vm5, %v1740_v38, %v8086_v34  ;;  %v4697_v38 = vld [vmem:[#allocation2 + $0x158] sm:$0xff] }
 0x261   : > { %4555 = vmatmul.mubr.msk.f32.gmra.mrb[16].mxu0 %vm1952_vm11, %v1930_v46  ;;  %v1869_v1 = vsel %vm1846_vm8, %v1836_v48, %v8067_v53  ;;  %v1868_v50 = vsel %vm1846_vm8, %v1835_v39, %v8068_v55  ;;  %v1806_v39 = vsel %vm1780_vm6, %v1773_v17, %v8088_v37  ;;  %v8089_v53 = vld [vmem:[#allocation118_spill] sm:$0xff]  ;;  %v8090_v55 = vld [vmem:[#allocation121_spill] sm:$0xff]  ;;  %v8110_v37 = vld [vmem:[#allocation112_spill] sm:$0xff] }
 0x262   : > { %4557 = vmatprep.mubr.msk.f32.mxu0 %vm1952_vm11, %v1931_v62  ;;  %v8107_v34 = vld [vmem:[#allocation89_spill] sm:$0xff] }
 0x263   : > { %v1499_v27 = vpop.permute.xlu0 %1498  ;;  %v1497_v47 = vpop.permute.xlu1 %1496 }
 0x264   : > { %v1900_v13 = vsel %vm1879_vm9, %v1867_v15, %v1499_v27  ;;  %v1899_v18 = vsel %vm1879_vm9, %v1866_v9, %v1497_v47  ;;  %v8073_v27 = vld [vmem:[#allocation104_spill] sm:$0xff]  ;;  %v1837_v9 = vsel %vm1813_vm7, %v1804_v36, %v8078_v40  ;;  %v8100_v40 = vld [vmem:[#allocation46_spill] sm:$0xff] }
 0x265   : > { %v1772_v47 = vsel %vm1747_vm5, %v1739_v35, %v8073_v27  ;;  %v4695_v35 = vld [vmem:[#allocation2 + $0x140] sm:$0xff]  ;;  %v8095_v27 = vld [vmem:[#allocation87_spill] sm:$0xff] }
 0x266   : > { %v1805_v16 = vsel %vm1780_vm6, %v1772_v47, %v8075_v2  ;;  %v1709_v45 = vsel %vm257_vm0, %v4695_v35, %v8094_v57  ;;  %v1743_v47 = vsel %vm1714_vm4, %v1710_v5, %v8095_v27  ;;  %v8098_v2 = vld [vmem:[#allocation111_spill] sm:$0xff] }
 0x267   : > { %v1627_v14 = vpop.permute.xlu0 %1626  ;;  %v1625_v22 = vpop.permute.xlu1 %1624  ;;  %v1838_v15 = vsel %vm1813_vm7, %v1805_v16, %v8077_v28  ;;  %v1742_v52 = vsel %vm1714_vm4, %v1709_v45, %v8096_v63  ;;  %v8099_v28 = vld [vmem:[#allocation41_spill] sm:$0xff]  ;;  %v4698_v27 = vld [vmem:[#allocation2 + $0x170] sm:$0xff] }
 0x268   : > { %v1933_v31 = vsel %vm1912_vm10, %v1900_v13, %v1627_v14  ;;  %v1932_v51 = vsel %vm1912_vm10, %v1899_v18, %v1625_v22  ;;  %v8079_v13 = vld [vmem:[#allocation137_spill] sm:$0xff]  ;;  %v8080_v14 = vld [vmem:[#allocation140_spill] sm:$0xff]  ;;  %v1775_v16 = vsel %vm1747_vm5, %v1742_v52, %v8098_v2 }
 0x269   : > { %4558 = vmatmul.mubr.msk.f32.gmra.mrb[18].mxu0 %vm1952_vm11, %v1932_v51  ;;  %v1871_v18 = vsel %vm1846_vm8, %v1838_v15, %v8079_v13  ;;  %v1870_v22 = vsel %vm1846_vm8, %v1837_v9, %v8080_v14  ;;  %v1808_v9 = vsel %vm1780_vm6, %v1775_v16, %v8100_v40  ;;  %v2380_v13 = vld [vmem:[#allocation2 + $0x9] sm:$0xff]  ;;  %v8118_v52 = vld [vmem:[#allocation92_spill] sm:$0xff] }
 0x26a   : > { %4560 = vmatprep.mubr.msk.f32.mxu0 %vm1952_vm11, %v1933_v31  ;;  %2669 = vrot.lane.b32.xlu1 %v2380_v13, %s4747_s25  ;;  %v8122_v40 = vld [vmem:[#allocation146_spill] sm:$0xff] }
 0x26b   : > { %v1503_v24 = vpop.permute.xlu0 %1502  ;;  %v1501_v32 = vpop.permute.xlu1 %1500 }
 0x26c   : > { %v1902_v62 = vsel %vm1879_vm9, %v1869_v1, %v1503_v24  ;;  %v1901_v46 = vsel %vm1879_vm9, %v1868_v50, %v1501_v32  ;;  %v8085_v24 = vld [vmem:[#allocation106_spill] sm:$0xff]  ;;  %v1839_v50 = vsel %vm1813_vm7, %v1806_v39, %v8090_v55  ;;  %v8111_v55 = vld [vmem:[#allocation45_spill] sm:$0xff] }
 0x26d   : > { %v1774_v32 = vsel %vm1747_vm5, %v1741_v30, %v8085_v24  ;;  %v8105_v30 = vld [vmem:[#allocation55_spill] sm:$0xff]  ;;  %v8106_v24 = vld [vmem:[#allocation60_spill] sm:$0xff] }
 0x26e   : > { %v1807_v48 = vsel %vm1780_vm6, %v1774_v32, %v8087_v20  ;;  %v1712_v3 = vsel %vm257_vm0, %v4696_v23, %v8105_v30  ;;  %v1711_v32 = vsel %vm257_vm0, %v4697_v38, %v8106_v24  ;;  %v8109_v20 = vld [vmem:[#allocation110_spill] sm:$0xff] }
 0x26f   : > { %v1631_v33 = vpop.permute.xlu0 %1630  ;;  %v1629_v21 = vpop.permute.xlu1 %1628  ;;  %v1840_v1 = vsel %vm1813_vm7, %v1807_v48, %v8089_v53  ;;  %v1745_v17 = vsel %vm1714_vm4, %v1712_v3, %v8107_v34 }
 0x270   : > { %v1935_v41 = vsel %vm1912_vm10, %v1902_v62, %v1631_v33  ;;  %v1934_v60 = vsel %vm1912_vm10, %v1901_v46, %v1629_v21  ;;  %v8091_v62 = vld [vmem:[#allocation139_spill] sm:$0xff]  ;;  %v8092_v33 = vld [vmem:[#allocation142_spill] sm:$0xff]  ;;  %v1778_v48 = vsel %vm1747_vm5, %v1745_v17, %v8109_v20 }
 0x271   : > { %4561 = vmatmul.mubr.msk.f32.gmra.mrb[20].mxu0 %vm1952_vm11, %v1934_v60  ;;  %v1873_v46 = vsel %vm1846_vm8, %v1840_v1, %v8091_v62  ;;  %v1872_v21 = vsel %vm1846_vm8, %v1839_v50, %v8092_v33  ;;  %v1811_v50 = vsel %vm1780_vm6, %v1778_v48, %v8111_v55  ;;  %v8112_v62 = vld [vmem:[#allocation49_spill] sm:$0xff]  ;;  %v8113_v33 = vld [vmem:[#allocation122_spill] sm:$0xff] }
 0x272   : > { %4563 = vmatprep.mubr.msk.f32.mxu0 %vm1952_vm11, %v1935_v41 }
 0x273   : > { %v1507_v12 = vpop.permute.xlu0 %1506  ;;  %v1505_v4 = vpop.permute.xlu1 %1504 }
 0x274   : > { %v1904_v31 = vsel %vm1879_vm9, %v1871_v18, %v1507_v12  ;;  %v1903_v51 = vsel %vm1879_vm9, %v1870_v22, %v1505_v4  ;;  %v8097_v12 = vld [vmem:[#allocation108_spill] sm:$0xff]  ;;  %v8102_v22 = vld [vmem:[#allocation123_spill] sm:$0xff] }
 0x275   : > { %v1776_v4 = vsel %vm1747_vm5, %v1743_v47, %v8097_v12  ;;  %v8101_v18 = vld [vmem:[#allocation120_spill] sm:$0xff] }
 0x276   : > { %v1809_v15 = vsel %vm1780_vm6, %v1776_v4, %v8099_v28  ;;  %v8117_v47 = vld [vmem:[#allocation64_spill] sm:$0xff]  ;;  %v8121_v28 = vld [vmem:[#allocation125_spill] sm:$0xff] }
 0x277   : > { %v1635_v42 = vpop.permute.xlu0 %1634  ;;  %v1633_v29 = vpop.permute.xlu1 %1632  ;;  %v1842_v14 = vsel %vm1813_vm7, %v1809_v15, %v8101_v18  ;;  %v1713_v63 = vsel %vm257_vm0, %v4698_v27, %v8117_v47  ;;  %v8119_v4 = vld [vmem:[#allocation4_spill] sm:$0xff] }
 0x278   : > { %v1937_v19 = vsel %vm1912_vm10, %v1904_v31, %v1635_v42  ;;  %v1936_v43 = vsel %vm1912_vm10, %v1903_v51, %v1633_v29  ;;  %v1841_v31 = vsel %vm1813_vm7, %v1808_v9, %v8102_v22  ;;  %v2379_v51 = vld [vmem:[#allocation2 + $0x1] sm:$0xff]  ;;  %v1746_v12 = vsel %vm1714_vm4, %v1713_v63, %v8118_v52  ;;  %v6434_v22 = vld [vmem:[%s7732_s2] ss:$0 sm:$0xff] }
 0x279   : > { %4564 = vmatmul.mubr.msk.f32.gmra.mrb[22].mxu0 %vm1952_vm11, %v1936_v43  ;;  %v8103_v42 = vld [vmem:[#allocation141_spill] sm:$0xff]  ;;  %2667 = vrot.lane.b32.xlu0 %v2379_v51, %s4747_s25  ;;  %v1779_v2 = vsel %vm1747_vm5, %v1746_v12, %v8119_v4 }
 0x27a   : > { %4566 = vmatprep.mubr.msk.f32.mxu0 %vm1952_vm11, %v1937_v19  ;;  %v1875_v29 = vsel %vm1846_vm8, %v1842_v14, %v8103_v42  ;;  %v8104_v19 = vld [vmem:[#allocation144_spill] sm:$0xff] }
 0x27b   : > { %v1511_v25 = vpop.permute.xlu0 %1510  ;;  %v1509_v0 = vpop.permute.xlu1 %1508  ;;  %v1874_v43 = vsel %vm1846_vm8, %v1841_v31, %v8104_v19 }
 0x27c   : > { %v1906_v41 = vsel %vm1879_vm9, %v1873_v46, %v1511_v25  ;;  %v1905_v60 = vsel %vm1879_vm9, %v1872_v21, %v1509_v0  ;;  %v8108_v25 = vld [vmem:[#allocation91_spill] sm:$0xff]  ;;  %v1844_v21 = vsel %vm1813_vm7, %v1811_v50, %v8113_v33 }
 0x27d   : > { %v1744_v0 = vsel %vm1714_vm4, %v1711_v32, %v8108_v25 }
 0x27e   : > { %v1777_v39 = vsel %vm1747_vm5, %v1744_v0, %v8110_v37 }
 0x27f   : > { %v1639_v8 = vpop.permute.xlu0 %1638  ;;  %v1637_v59 = vpop.permute.xlu1 %1636  ;;  %v1810_v46 = vsel %vm1780_vm6, %v1777_v39, %v8112_v62 }
 0x280   : > { %v1939_v58 = vsel %vm1912_vm10, %v1906_v41, %v1639_v8  ;;  %v1938_v44 = vsel %vm1912_vm10, %v1905_v60, %v1637_v59  ;;  %v8114_v41 = vld [vmem:[#allocation124_spill] sm:$0xff]  ;;  %v8115_v8 = vld [vmem:[#allocation143_spill] sm:$0xff] }
 0x281   : > { %4567 = vmatmul.mubr.msk.f32.gmra.mrb[24].mxu0 %vm1952_vm11, %v1938_v44  ;;  %v1843_v60 = vsel %vm1813_vm7, %v1810_v46, %v8114_v41  ;;  %v1877_v59 = vsel %vm1846_vm8, %v1844_v21, %v8115_v8 }
 0x282   : > { %4569 = vmatprep.mubr.msk.f32.mxu0 %vm1952_vm11, %v1939_v58  ;;  %v8116_v58 = vld [vmem:[#allocation145_spill] sm:$0xff] }
 0x283   : > { %v1515_v26 = vpop.permute.xlu0 %1514  ;;  %v1513_v36 = vpop.permute.xlu1 %1512  ;;  %v1876_v44 = vsel %vm1846_vm8, %v1843_v60, %v8116_v58 }
 0x284   : > { %v1908_v56 = vsel %vm1879_vm9, %v1875_v29, %v1515_v26  ;;  %v1907_v6 = vsel %vm1879_vm9, %v1874_v43, %v1513_v36  ;;  %v8120_v26 = vld [vmem:[#allocation50_spill] sm:$0xff] }
 0x285   : > { %v1812_v36 = vsel %vm1780_vm6, %v1779_v2, %v8120_v26 }
 0x286   : > { %v1845_v15 = vsel %vm1813_vm7, %v1812_v36, %v8121_v28 }
 0x287   : > { %v1643_v49 = vpop.permute.xlu0 %1642  ;;  %v1641_v10 = vpop.permute.xlu1 %1640  ;;  %v1878_v9 = vsel %vm1846_vm8, %v1845_v15, %v8122_v40 }
 0x288   : > { %v1941_v7 = vsel %vm1912_vm10, %v1908_v56, %v1643_v49  ;;  %v1940_v54 = vsel %vm1912_vm10, %v1907_v6, %v1641_v10 }
 0x289   : > { %4570 = vmatmul.mubr.msk.f32.gmra.mrb[26].mxu0 %vm1952_vm11, %v1940_v54 }
 0x28a   : > { %4572 = vmatprep.mubr.msk.f32.mxu0 %vm1952_vm11, %v1941_v7 }
 0x28b   : > { %v1519_v53 = vpop.permute.xlu0 %1518  ;;  %v1517_v1 = vpop.permute.xlu1 %1516 }
 0x28c   : > { %v1910_v11 = vsel %vm1879_vm9, %v1877_v59, %v1519_v53  ;;  %v1909_v61 = vsel %vm1879_vm9, %v1876_v44, %v1517_v1 }
 0x28f   : > { %v1647_v5 = vpop.permute.xlu0 %1646  ;;  %v1645_v35 = vpop.permute.xlu1 %1644 }
 0x290   : > { %v1943_v57 = vsel %vm1912_vm10, %v1910_v11, %v1647_v5  ;;  %v1942_v45 = vsel %vm1912_vm10, %v1909_v61, %v1645_v35 }
 0x291   : > { %4573 = vmatmul.mubr.msk.f32.gmra.mrb[28].mxu0 %vm1952_vm11, %v1942_v45 }
 0x292   : > { %4575 = vmatprep.mubr.msk.f32.mxu0 %vm1952_vm11, %v1943_v57 }
 0x293   : > { %v1521_v16 = vpop.permute.xlu1 %1520 }
 0x294   : > { %v1911_v13 = vsel %vm1879_vm9, %v1878_v9, %v1521_v16 }
 0x297   : > { %v1649_v18 = vpop.permute.xlu1 %1648 }
 0x298   : > { %v1944_v14 = vsel %vm1912_vm10, %v1911_v13, %v1649_v18 }
 0x299   : > { %4576 = vmatmul.mubr.msk.f32.gmra.mrb[30].mxu0 %vm1952_vm11, %v1944_v14 }
 0x2fc   : > { %v4532_v31 = vpop.f32.mrb[0].mxu0 }
 0x2fd   : > { %v2125_v51 = vadd.f32 %v4532_v31, %v6434_v22  ;;  %v2119_v42 = vpop.f32.mrb[1].mxu0 }
 0x2fe   : > { %v2120_v29 = vadd.f32 %v6434_v22, %v2119_v42 }
 0x2ff   : > { %v2279_v19 = vmax.f32 %v2125_v51, 0.0 }
 0x300   : > { %v2278_v43 = vmax.f32 %v2120_v29, 0.0  ;;  %v4535_v56 = vpop.f32.mrb[2].mxu0 }
 0x301   : > { %2311 = vst.msk [vmem:[#allocation2 + $0x21] sm:$0xff] %vm257_vm0, %v2279_v19  ;;  %v2135_v6 = vadd.f32 %v4535_v56, %v6434_v22  ;;  %v2129_v49 = vpop.f32.mrb[3].mxu0 }
 0x302   : > { %2310 = vst.msk [vmem:[#allocation2 + $0x19] sm:$0xff] %vm257_vm0, %v2278_v43  ;;  %v2130_v10 = vadd.f32 %v6434_v22, %v2129_v49 }
 0x303   : > { %v2281_v7 = vmax.f32 %v2135_v6, 0.0 }
 0x304   : > { %v2280_v54 = vmax.f32 %v2130_v10, 0.0  ;;  %v4538_v23 = vpop.f32.mrb[4].mxu0 }
 0x305   : > { %2313 = vst.msk [vmem:[#allocation2 + $0x39] sm:$0xff] %vm257_vm0, %v2281_v7  ;;  %v2145_v30 = vadd.f32 %v4538_v23, %v6434_v22  ;;  %v2139_v3 = vpop.f32.mrb[5].mxu0 }
 0x306   : > { %2312 = vst.msk [vmem:[#allocation2 + $0x31] sm:$0xff] %vm257_vm0, %v2280_v54  ;;  %v2140_v38 = vadd.f32 %v6434_v22, %v2139_v3 }
 0x307   : > { %v2283_v24 = vmax.f32 %v2145_v30, 0.0 }
 0x308   : > { %v2282_v32 = vmax.f32 %v2140_v38, 0.0  ;;  %v6446_v34 = vld [vmem:[#allocation2 + $0x21] sm:$0xff] }
 0x309   : > { %2315 = vst.msk [vmem:[#allocation2 + $0x51] sm:$0xff] %vm257_vm0, %v2283_v24  ;;  %2673 = vrot.lane.b32.xlu1 %v6446_v34, %s4747_s25  ;;  %v6451_v17 = vld [vmem:[#allocation2 + $0x19] sm:$0xff] }
 0x30a   : > { %2314 = vst.msk [vmem:[#allocation2 + $0x49] sm:$0xff] %vm257_vm0, %v2282_v32  ;;  %2671 = vrot.lane.b32.xlu0 %v6451_v17, %s4747_s25 }
 0x30c   : > { %v4541_v25 = vpop.f32.mrb[6].mxu0  ;;  %v6456_v0 = vld [vmem:[#allocation2 + $0x39] sm:$0xff] }
 0x30d   : > { %v2155_v20 = vadd.f32 %v4541_v25, %v6434_v22  ;;  %2677 = vrot.lane.b32.xlu1 %v6456_v0, %s4747_s25  ;;  %v2149_v48 = vpop.f32.mrb[7].mxu0  ;;  %v6461_v37 = vld [vmem:[#allocation2 + $0x31] sm:$0xff] }
 0x30e   : > { %v2150_v39 = vadd.f32 %v6434_v22, %v2149_v48  ;;  %2675 = vrot.lane.b32.xlu0 %v6461_v37, %s4747_s25 }
 0x30f   : > { %v2285_v53 = vmax.f32 %v2155_v20, 0.0 }
 0x310   : > { %v2284_v1 = vmax.f32 %v2150_v39, 0.0  ;;  %v6466_v55 = vld [vmem:[#allocation2 + $0x51] sm:$0xff] }
 0x311   : > { %2317 = vst.msk [vmem:[#allocation2 + $0x69] sm:$0xff] %vm257_vm0, %v2285_v53  ;;  %2681 = vrot.lane.b32.xlu1 %v6466_v55, %s4747_s25  ;;  %v6471_v50 = vld [vmem:[#allocation2 + $0x49] sm:$0xff] }
 0x312   : > { %2316 = vst.msk [vmem:[#allocation2 + $0x61] sm:$0xff] %vm257_vm0, %v2284_v1  ;;  %2679 = vrot.lane.b32.xlu0 %v6471_v50, %s4747_s25 }
 0x314   : > { %v4544_v62 = vpop.f32.mrb[8].mxu0 }
 0x315   : > { %v2165_v46 = vadd.f32 %v4544_v62, %v6434_v22  ;;  %v2159_v33 = vpop.f32.mrb[9].mxu0 }
 0x316   : > { %v2160_v21 = vadd.f32 %v6434_v22, %v2159_v33 }
 0x317   : > { %v2287_v41 = vmax.f32 %v2165_v46, 0.0 }
 0x318   : > { %v2286_v60 = vmax.f32 %v2160_v21, 0.0  ;;  %v6478_v8 = vld [vmem:[#allocation2 + $0x69] sm:$0xff] }
 0x319   : > { %2319 = vst.msk [vmem:[#allocation2 + $0x81] sm:$0xff] %vm257_vm0, %v2287_v41  ;;  %2685 = vrot.lane.b32.xlu1 %v6478_v8, %s4747_s25  ;;  %v6483_v59 = vld [vmem:[#allocation2 + $0x61] sm:$0xff] }
 0x31a   : > { %2318 = vst.msk [vmem:[#allocation2 + $0x79] sm:$0xff] %vm257_vm0, %v2286_v60  ;;  %2683 = vrot.lane.b32.xlu0 %v6483_v59, %s4747_s25 }
 0x31c   : > { %v4547_v58 = vpop.f32.mrb[10].mxu0 }
 0x31d   : > { %v2175_v44 = vadd.f32 %v4547_v58, %v6434_v22  ;;  %v2169_v11 = vpop.f32.mrb[11].mxu0 }
 0x31e   : > { %v2170_v61 = vadd.f32 %v6434_v22, %v2169_v11 }
 0x31f   : > { %v2289_v5 = vmax.f32 %v2175_v44, 0.0 }
 0x320   : > { %v2288_v35 = vmax.f32 %v2170_v61, 0.0  ;;  %v6490_v57 = vld [vmem:[#allocation2 + $0x81] sm:$0xff] }
 0x321   : > { %2321 = vst.msk [vmem:[#allocation2 + $0x99] sm:$0xff] %vm257_vm0, %v2289_v5  ;;  %2689 = vrot.lane.b32.xlu1 %v6490_v57, %s4747_s25  ;;  %v6495_v45 = vld [vmem:[#allocation2 + $0x79] sm:$0xff] }
 0x322   : > { %2320 = vst.msk [vmem:[#allocation2 + $0x91] sm:$0xff] %vm257_vm0, %v2288_v35  ;;  %2687 = vrot.lane.b32.xlu0 %v6495_v45, %s4747_s25 }
 0x324   : > { %v4550_v27 = vpop.f32.mrb[12].mxu0 }
 0x325   : > { %v2185_v47 = vadd.f32 %v4550_v27, %v6434_v22  ;;  %v2179_v63 = vpop.f32.mrb[13].mxu0 }
 0x326   : > { %v2180_v52 = vadd.f32 %v6434_v22, %v2179_v63 }
 0x327   : > { %v2291_v12 = vmax.f32 %v2185_v47, 0.0 }
 0x328   : > { %v2290_v4 = vmax.f32 %v2180_v52, 0.0  ;;  %v6502_v2 = vld [vmem:[#allocation2 + $0x99] sm:$0xff] }
 0x329   : > { %2323 = vst.msk [vmem:[#allocation2 + $0xb1] sm:$0xff] %vm257_vm0, %v2291_v12  ;;  %2693 = vrot.lane.b32.xlu1 %v6502_v2, %s4747_s25  ;;  %v6507_v16 = vld [vmem:[#allocation2 + $0x91] sm:$0xff] }
 0x32a   : > { %2322 = vst.msk [vmem:[#allocation2 + $0xa9] sm:$0xff] %vm257_vm0, %v2290_v4  ;;  %2691 = vrot.lane.b32.xlu0 %v6507_v16, %s4747_s25 }
 0x32c   : > { %v4553_v26 = vpop.f32.mrb[14].mxu0 }
 0x32d   : > { %v2195_v36 = vadd.f32 %v4553_v26, %v6434_v22  ;;  %v2189_v28 = vpop.f32.mrb[15].mxu0 }
 0x32e   : > { %v2190_v15 = vadd.f32 %v6434_v22, %v2189_v28 }
 0x32f   : > { %v2293_v40 = vmax.f32 %v2195_v36, 0.0 }
 0x330   : > { %v2292_v9 = vmax.f32 %v2190_v15, 0.0  ;;  %v2394_v13 = vld [vmem:[#allocation2 + $0xb1] sm:$0xff] }
 0x331   : > { %2325 = vst.msk [vmem:[#allocation2 + $0xc9] sm:$0xff] %vm257_vm0, %v2293_v40  ;;  %2697 = vrot.lane.b32.xlu1 %v2394_v13, %s4747_s25  ;;  %v2393_v18 = vld [vmem:[#allocation2 + $0xa9] sm:$0xff] }
 0x332   : > { %2324 = vst.msk [vmem:[#allocation2 + $0xc1] sm:$0xff] %vm257_vm0, %v2292_v9  ;;  %2695 = vrot.lane.b32.xlu0 %v2393_v18, %s4747_s25 }
 0x334   : > { %v4556_v14 = vpop.f32.mrb[16].mxu0 }
 0x335   : > { %v2205_v31 = vadd.f32 %v4556_v14, %v6434_v22  ;;  %v2199_v51 = vpop.f32.mrb[17].mxu0 }
 0x336   : > { %v2200_v42 = vadd.f32 %v6434_v22, %v2199_v51 }
 0x337   : > { %v2295_v29 = vmax.f32 %v2205_v31, 0.0 }
 0x338   : > { %v2294_v19 = vmax.f32 %v2200_v42, 0.0  ;;  %v2396_v43 = vld [vmem:[#allocation2 + $0xc9] sm:$0xff] }
 0x339   : > { %2327 = vst.msk [vmem:[#allocation2 + $0xe1] sm:$0xff] %vm257_vm0, %v2295_v29  ;;  %2701 = vrot.lane.b32.xlu1 %v2396_v43, %s4747_s25  ;;  %v2395_v56 = vld [vmem:[#allocation2 + $0xc1] sm:$0xff] }
 0x33a   : > { %2326 = vst.msk [vmem:[#allocation2 + $0xd9] sm:$0xff] %vm257_vm0, %v2294_v19  ;;  %2699 = vrot.lane.b32.xlu0 %v2395_v56, %s4747_s25 }
 0x33c   : > { %v4559_v6 = vpop.f32.mrb[18].mxu0 }
 0x33d   : > { %v2215_v49 = vadd.f32 %v4559_v6, %v6434_v22  ;;  %v2209_v10 = vpop.f32.mrb[19].mxu0 }
 0x33e   : > { %v2210_v7 = vadd.f32 %v6434_v22, %v2209_v10 }
 0x33f   : > { %v2297_v54 = vmax.f32 %v2215_v49, 0.0 }
 0x340   : > { %v2296_v23 = vmax.f32 %v2210_v7, 0.0  ;;  %v2398_v30 = vld [vmem:[#allocation2 + $0xe1] sm:$0xff] }
 0x341   : > { %2329 = vst.msk [vmem:[#allocation2 + $0xf9] sm:$0xff] %vm257_vm0, %v2297_v54  ;;  %2705 = vrot.lane.b32.xlu1 %v2398_v30, %s4747_s25  ;;  %v2397_v3 = vld [vmem:[#allocation2 + $0xd9] sm:$0xff]  ;;  %v2411_v30 = vld [vmem:[#allocation2 + $0x2] sm:$0xff] }
 0x342   : > { %2328 = vst.msk [vmem:[#allocation2 + $0xf1] sm:$0xff] %vm257_vm0, %v2296_v23  ;;  %2703 = vrot.lane.b32.xlu0 %v2397_v3, %s4747_s25  ;;  %v2412_v23 = vld [vmem:[#allocation2 + $0xa] sm:$0xff]  ;;  %v6568_v3 = vld [vmem:[#allocation2 + $0x22] sm:$0xff] }
 0x344   : > { %v4562_v38 = vpop.f32.mrb[20].mxu0 }
 0x345   : > { %v2225_v24 = vadd.f32 %v4562_v38, %v6434_v22  ;;  %v2219_v32 = vpop.f32.mrb[21].mxu0  ;;  %v6576_v38 = vld [vmem:[#allocation2 + $0x3a] sm:$0xff] }
 0x346   : > { %v2220_v25 = vadd.f32 %v6434_v22, %v2219_v32  ;;  %v6584_v32 = vld [vmem:[#allocation2 + $0x52] sm:$0xff] }
 0x347   : > { %v2299_v20 = vmax.f32 %v2225_v24, 0.0  ;;  %v6580_v24 = vld [vmem:[#allocation2 + $0x32] sm:$0xff] }
 0x348   : > { %v2298_v48 = vmax.f32 %v2220_v25, 0.0  ;;  %v2400_v39 = vld [vmem:[#allocation2 + $0xf9] sm:$0xff]  ;;  %v6588_v25 = vld [vmem:[#allocation2 + $0x4a] sm:$0xff] }
 0x349   : > { %2331 = vst.msk [vmem:[#allocation2 + $0x111] sm:$0xff] %vm257_vm0, %v2299_v20  ;;  %2709 = vrot.lane.b32.xlu1 %v2400_v39, %s4747_s25  ;;  %v2399_v53 = vld [vmem:[#allocation2 + $0xf1] sm:$0xff]  ;;  %v6600_v39 = vld [vmem:[#allocation2 + $0x82] sm:$0xff] }
 0x34a   : > { %2330 = vst.msk [vmem:[#allocation2 + $0x109] sm:$0xff] %vm257_vm0, %v2298_v48  ;;  %2707 = vrot.lane.b32.xlu0 %v2399_v53, %s4747_s25  ;;  %v6592_v20 = vld [vmem:[#allocation2 + $0x6a] sm:$0xff]  ;;  %v6596_v48 = vld [vmem:[#allocation2 + $0x62] sm:$0xff]  ;;  %v6604_v53 = vld [vmem:[#allocation2 + $0x7a] sm:$0xff] }
 0x34c   : > { %v4565_v1 = vpop.f32.mrb[22].mxu0 }
 0x34d   : > { %v2235_v62 = vadd.f32 %v4565_v1, %v6434_v22  ;;  %v2229_v46 = vpop.f32.mrb[23].mxu0  ;;  %v6608_v1 = vld [vmem:[#allocation2 + $0x9a] sm:$0xff] }
 0x34e   : > { %v2230_v33 = vadd.f32 %v6434_v22, %v2229_v46  ;;  %v6616_v46 = vld [vmem:[#allocation2 + $0xb2] sm:$0xff] }
 0x34f   : > { %v2301_v21 = vmax.f32 %v2235_v62, 0.0  ;;  %v6612_v62 = vld [vmem:[#allocation2 + $0x92] sm:$0xff] }
 0x350   : > { %v2300_v41 = vmax.f32 %v2230_v33, 0.0  ;;  %v2402_v60 = vld [vmem:[#allocation2 + $0x111] sm:$0xff] }
 0x351   : > { %2333 = vst.msk [vmem:[#allocation2 + $0x129] sm:$0xff] %vm257_vm0, %v2301_v21  ;;  %2713 = vrot.lane.b32.xlu1 %v2402_v60, %s4747_s25  ;;  %v2401_v58 = vld [vmem:[#allocation2 + $0x109] sm:$0xff] }
 0x352   : > { %2332 = vst.msk [vmem:[#allocation2 + $0x121] sm:$0xff] %vm257_vm0, %v2300_v41  ;;  %2711 = vrot.lane.b32.xlu0 %v2401_v58, %s4747_s25  ;;  %v6620_v33 = vld [vmem:[#allocation2 + $0xaa] sm:$0xff]  ;;  %v6628_v41 = vld [vmem:[#allocation2 + $0xc2] sm:$0xff]  ;;  %v6636_v58 = vld [vmem:[#allocation2 + $0xda] sm:$0xff] }
 0x353   : > { %v6624_v21 = vld [vmem:[#allocation2 + $0xca] sm:$0xff]  ;;  %v6632_v60 = vld [vmem:[#allocation2 + $0xe2] sm:$0xff] }
 0x354   : > { %v4568_v44 = vpop.f32.mrb[24].mxu0 }
 0x355   : > { %v2245_v11 = vadd.f32 %v4568_v44, %v6434_v22  ;;  %v2239_v61 = vpop.f32.mrb[25].mxu0  ;;  %v6640_v44 = vld [vmem:[#allocation2 + $0xfa] sm:$0xff] }
 0x356   : > { %v2240_v5 = vadd.f32 %v6434_v22, %v2239_v61  ;;  %8123 = vst [vmem:[#allocation3_spill] sm:$0xff] %v6640_v44  ;;  %v2434_v61 = vld [vmem:[#allocation2 + $0x112] sm:$0xff] }
 0x357   : > { %v2303_v35 = vmax.f32 %v2245_v11, 0.0  ;;  %v6644_v11 = vld [vmem:[#allocation2 + $0xf2] sm:$0xff] }
 0x358   : > { %v2302_v27 = vmax.f32 %v2240_v5, 0.0  ;;  %v2404_v47 = vld [vmem:[#allocation2 + $0x129] sm:$0xff]  ;;  %v6648_v5 = vpop.permute.xlu1 %2669 }
 0x359   : > { %2335 = vst.msk [vmem:[#allocation2 + $0x141] sm:$0xff] %vm257_vm0, %v2303_v35  ;;  %2717 = vrot.lane.b32.xlu1 %v2404_v47, %s4747_s25  ;;  %v2403_v63 = vld [vmem:[#allocation2 + $0x121] sm:$0xff]  ;;  %v2433_v35 = vld [vmem:[#allocation2 + $0x10a] sm:$0xff] }
 0x35a   : > { %2334 = vst.msk [vmem:[#allocation2 + $0x139] sm:$0xff] %vm257_vm0, %v2302_v27  ;;  %2715 = vrot.lane.b32.xlu0 %v2403_v63, %s4747_s25  ;;  %v6651_v27 = vpop.permute.xlu0 %2667  ;;  %v2436_v47 = vld [vmem:[#allocation2 + $0x12a] sm:$0xff]  ;;  %v2435_v63 = vld [vmem:[#allocation2 + $0x122] sm:$0xff] }
 0x35c   : > { %v4571_v52 = vpop.f32.mrb[26].mxu0 }
 0x35d   : > { %v2255_v12 = vadd.f32 %v4571_v52, %v6434_v22  ;;  %v2249_v4 = vpop.f32.mrb[27].mxu0 }
 0x35e   : > { %v2250_v26 = vadd.f32 %v6434_v22, %v2249_v4 }
 0x35f   : > { %v2305_v36 = vmax.f32 %v2255_v12, 0.0 }
 0x360   : > { %v2304_v28 = vmax.f32 %v2250_v26, 0.0  ;;  %v2406_v15 = vld [vmem:[#allocation2 + $0x141] sm:$0xff] }
 0x361   : > { %2337 = vst.msk [vmem:[#allocation2 + $0x159] sm:$0xff] %vm257_vm0, %v2305_v36  ;;  %2721 = vrot.lane.b32.xlu1 %v2406_v15, %s4747_s25  ;;  %v2405_v40 = vld [vmem:[#allocation2 + $0x139] sm:$0xff]  ;;  %v2438_v4 = vld [vmem:[#allocation2 + $0x142] sm:$0xff] }
 0x362   : > { %2336 = vst.msk [vmem:[#allocation2 + $0x151] sm:$0xff] %vm257_vm0, %v2304_v28  ;;  %2719 = vrot.lane.b32.xlu0 %v2405_v40, %s4747_s25  ;;  %v2437_v26 = vld [vmem:[#allocation2 + $0x13a] sm:$0xff] }
 0x364   : > { %v4574_v9 = vpop.f32.mrb[28].mxu0 }
 0x365   : > { %v2265_v13 = vadd.f32 %v4574_v9, %v6434_v22  ;;  %v2259_v18 = vpop.f32.mrb[29].mxu0 }
 0x366   : > { %v2260_v14 = vadd.f32 %v6434_v22, %v2259_v18 }
 0x367   : > { %v2307_v31 = vmax.f32 %v2265_v13, 0.0 }
 0x368   : > { %v2306_v51 = vmax.f32 %v2260_v14, 0.0  ;;  %v2408_v42 = vld [vmem:[#allocation2 + $0x159] sm:$0xff] }
 0x369   : > { %2339 = vst.msk [vmem:[#allocation2 + $0x171] sm:$0xff] %vm257_vm0, %v2307_v31  ;;  %2725 = vrot.lane.b32.xlu1 %v2408_v42, %s4747_s25  ;;  %v2407_v29 = vld [vmem:[#allocation2 + $0x151] sm:$0xff]  ;;  %v2440_v36 = vld [vmem:[#allocation2 + $0x15a] sm:$0xff] }
 0x36a   : > { %2338 = vst.msk [vmem:[#allocation2 + $0x169] sm:$0xff] %vm257_vm0, %v2306_v51  ;;  %2723 = vrot.lane.b32.xlu0 %v2407_v29, %s4747_s25  ;;  %v2439_v15 = vld [vmem:[#allocation2 + $0x152] sm:$0xff]  ;;  %v6672_v14 = vld [vmem:[#allocation2 + $0x20] sm:$0xff] }
 0x36b   : > { %v6676_v51 = vld [vmem:[#allocation2 + $0x18] sm:$0xff] }
 0x36c   : > { %v4577_v19 = vpop.f32.mrb[30].mxu0  ;;  %v6684_v29 = vld [vmem:[#allocation2 + $0x38] sm:$0xff] }
 0x36d   : > { %v2275_v43 = vadd.f32 %v4577_v19, %v6434_v22  ;;  %v2269_v56 = vpop.f32.mrb[31].mxu0 }
 0x36e   : > { %v2270_v6 = vadd.f32 %v6434_v22, %v2269_v56  ;;  %v6572_v22 = vld [vmem:[#allocation2 + $0x1a] sm:$0xff] }
 0x36f   : > { %v2309_v49 = vmax.f32 %v2275_v43, 0.0  ;;  %v6688_v43 = vld [vmem:[#allocation2 + $0x30] sm:$0xff] }
 0x370   : > { %v2308_v10 = vmax.f32 %v2270_v6, 0.0  ;;  %v2410_v7 = vld [vmem:[#allocation2 + $0x171] sm:$0xff] }
 0x371   : > { %2341 = vst.msk [vmem:[#allocation2 + $0x189] sm:$0xff] %vm257_vm0, %v2309_v49  ;;  %2729 = vrot.lane.b32.xlu1 %v2410_v7, %s4747_s25  ;;  %v2409_v54 = vld [vmem:[#allocation2 + $0x169] sm:$0xff]  ;;  %v2442_v9 = vld [vmem:[#allocation2 + $0x172] sm:$0xff] }
 0x372   : > { %2340 = vst.msk [vmem:[#allocation2 + $0x181] sm:$0xff] %vm257_vm0, %v2308_v10  ;;  %2727 = vrot.lane.b32.xlu0 %v2409_v54, %s4747_s25  ;;  %v2441_v13 = vld [vmem:[#allocation2 + $0x16a] sm:$0xff] }
 0x373   : > { %v6696_v6 = vld [vmem:[#allocation2 + $0x50] sm:$0xff]  ;;  %v6700_v10 = vld [vmem:[#allocation2 + $0x48] sm:$0xff] }
 0x374   : > { %v6708_v54 = vld [vmem:[#allocation2 + $0x68] sm:$0xff] }
 0x375   : > { %2797 = vrot.lane.b32.xlu1 %v2412_v23, %s4748_s26 }
 0x376   : > { %2795 = vrot.lane.b32.xlu0 %v2411_v30, %s4748_s26  ;;  %v6712_v30 = vld [vmem:[#allocation2 + $0x60] sm:$0xff] }
 0x379   : > { %2801 = vrot.lane.b32.xlu1 %v6568_v3, %s4748_s26 }
 0x37a   : > { %2799 = vrot.lane.b32.xlu0 %v6572_v22, %s4748_s26 }
 0x37b   : > { %v6656_v52 = vpop.permute.xlu1 %2673 }
 0x37c   : > { %v6658_v12 = vpop.permute.xlu0 %2671 }
 0x37d   : > { %2805 = vrot.lane.b32.xlu1 %v6576_v38, %s4748_s26 }
 0x37e   : > { %2803 = vrot.lane.b32.xlu0 %v6580_v24, %s4748_s26 }
 0x37f   : > { %v6662_v28 = vpop.permute.xlu1 %2677 }
 0x380   : > { %v6665_v40 = vpop.permute.xlu0 %2675 }
 0x381   : > { %2809 = vrot.lane.b32.xlu1 %v6584_v32, %s4748_s26 }
 0x382   : > { %2807 = vrot.lane.b32.xlu0 %v6588_v25, %s4748_s26 }
 0x383   : > { %v6670_v18 = vpop.permute.xlu1 %2681 }
 0x384   : > { %8124 = vst [vmem:[#allocation59_spill] sm:$0xff] %v6670_v18  ;;  %v6674_v31 = vpop.permute.xlu0 %2679 }
 0x385   : > { %2813 = vrot.lane.b32.xlu1 %v6592_v20, %s4748_s26 }
 0x386   : > { %2811 = vrot.lane.b32.xlu0 %v6596_v48, %s4748_s26 }
 0x389   : > { %2817 = vrot.lane.b32.xlu1 %v6600_v39, %s4748_s26 }
 0x38a   : > { %2815 = vrot.lane.b32.xlu0 %v6604_v53, %s4748_s26 }
 0x38b   : > { %v6682_v42 = vpop.permute.xlu1 %2685 }
 0x38c   : > { %8125 = vst [vmem:[#allocation5_spill] sm:$0xff] %v6682_v42  ;;  %v6686_v19 = vpop.permute.xlu0 %2683 }
 0x38d   : > { %2821 = vrot.lane.b32.xlu1 %v6608_v1, %s4748_s26  ;;  %8126 = vst [vmem:[#allocation9_spill] sm:$0xff] %v6686_v19  ;;  %v6784_v19 = vld [vmem:[#allocation2 + $0xf0] sm:$0xff] }
 0x38e   : > { %2819 = vrot.lane.b32.xlu0 %v6612_v62, %s4748_s26 }
 0x391   : > { %2825 = vrot.lane.b32.xlu1 %v6616_v46, %s4748_s26 }
 0x392   : > { %2823 = vrot.lane.b32.xlu0 %v6620_v33, %s4748_s26 }
 0x393   : > { %v6694_v56 = vpop.permute.xlu1 %2689 }
 0x394   : > { %8127 = vst [vmem:[#allocation68_spill] sm:$0xff] %v6694_v56  ;;  %v6698_v49 = vpop.permute.xlu0 %2687 }
 0x395   : > { %2829 = vrot.lane.b32.xlu1 %v6624_v21, %s4748_s26  ;;  %8128 = vst [vmem:[#allocation63_spill] sm:$0xff] %v6698_v49  ;;  %v6772_v49 = vld [vmem:[#allocation2 + $0xd8] sm:$0xff] }
 0x396   : > { %2827 = vrot.lane.b32.xlu0 %v6628_v41, %s4748_s26 }
 0x399   : > { %2833 = vrot.lane.b32.xlu1 %v6632_v60, %s4748_s26 }
 0x39a   : > { %2831 = vrot.lane.b32.xlu0 %v6636_v58, %s4748_s26 }
 0x39b   : > { %v6706_v7 = vpop.permute.xlu1 %2693 }
 0x39c   : > { %8129 = vst [vmem:[#allocation8_spill] sm:$0xff] %v6706_v7  ;;  %v6710_v23 = vpop.permute.xlu0 %2691 }
 0x39d   : > { %2837 = vrot.lane.b32.xlu1 %v6640_v44, %s4748_s26  ;;  %8130 = vst [vmem:[#allocation12_spill] sm:$0xff] %v6710_v23  ;;  %v6760_v23 = vld [vmem:[#allocation2 + $0xc0] sm:$0xff]  ;;  %v6796_v44 = vld [vmem:[#allocation2 + $0x108] sm:$0xff] }
 0x39e   : > { %2835 = vrot.lane.b32.xlu0 %v6644_v11, %s4748_s26  ;;  %8150 = vst [vmem:[#allocation57_spill] sm:$0xff] %v6796_v44 }
 0x3a1   : > { %2841 = vrot.lane.b32.xlu1 %v2434_v61, %s4748_s26 }
 0x3a2   : > { %2839 = vrot.lane.b32.xlu0 %v2433_v35, %s4748_s26  ;;  %v6720_v35 = vld [vmem:[#allocation2 + $0x80] sm:$0xff] }
 0x3a3   : > { %v6718_v61 = vpop.permute.xlu1 %2697 }
 0x3a4   : > { %8131 = vst [vmem:[#allocation11_spill] sm:$0xff] %v6718_v61 }
 0x3a5   : > { %2845 = vrot.lane.b32.xlu1 %v2436_v47, %s4748_s26  ;;  %v6722_v47 = vpop.permute.xlu0 %2695 }
 0x3a6   : > { %2843 = vrot.lane.b32.xlu0 %v2435_v63, %s4748_s26  ;;  %8132 = vst [vmem:[#allocation70_spill] sm:$0xff] %v6722_v47  ;;  %v6724_v63 = vld [vmem:[#allocation2 + $0x78] sm:$0xff]  ;;  %v6748_v47 = vld [vmem:[#allocation2 + $0xa8] sm:$0xff] }
 0x3a7   : > { %8140 = vst [vmem:[#allocation20_spill] sm:$0xff] %v6748_v47 }
 0x3a9   : > { %2849 = vrot.lane.b32.xlu1 %v2438_v4, %s4748_s26 }
 0x3aa   : > { %2847 = vrot.lane.b32.xlu0 %v2437_v26, %s4748_s26  ;;  %v6732_v26 = vld [vmem:[#allocation2 + $0x98] sm:$0xff] }
 0x3ab   : > { %v6730_v4 = vpop.permute.xlu1 %2701  ;;  %8134 = vst [vmem:[#allocation14_spill] sm:$0xff] %v6732_v26 }
 0x3ac   : > { %8133 = vst [vmem:[#allocation67_spill] sm:$0xff] %v6730_v4 }
 0x3ad   : > { %2853 = vrot.lane.b32.xlu1 %v2440_v36, %s4748_s26  ;;  %v6734_v36 = vpop.permute.xlu0 %2699 }
 0x3ae   : > { %2851 = vrot.lane.b32.xlu0 %v2439_v15, %s4748_s26  ;;  %8135 = vst [vmem:[#allocation69_spill] sm:$0xff] %v6734_v36  ;;  %v6736_v15 = vld [vmem:[#allocation2 + $0x90] sm:$0xff]  ;;  %v6756_v36 = vld [vmem:[#allocation2 + $0xc8] sm:$0xff] }
 0x3af   : > { %8136 = vst [vmem:[#allocation13_spill] sm:$0xff] %v6736_v15 }
 0x3b1   : > { %2857 = vrot.lane.b32.xlu1 %v2442_v9, %s4748_s26 }
 0x3b2   : > { %2855 = vrot.lane.b32.xlu0 %v2441_v13, %s4748_s26  ;;  %v6744_v13 = vld [vmem:[#allocation2 + $0xb0] sm:$0xff] }
 0x3b3   : > { %v6742_v9 = vpop.permute.xlu1 %2705  ;;  %8138 = vst [vmem:[#allocation71_spill] sm:$0xff] %v6744_v13 }
 0x3b4   : > { %8137 = vst [vmem:[#allocation17_spill] sm:$0xff] %v6742_v9  ;;  %v6746_v61 = vpop.permute.xlu0 %2703 }
 0x3b5   : > { %2925 = vrot.lane.b32.xlu1 %v6672_v14, %s4749_s27  ;;  %8139 = vst [vmem:[#allocation16_spill] sm:$0xff] %v6746_v61  ;;  %v6768_v61 = vld [vmem:[#allocation2 + $0xe0] sm:$0xff] }
 0x3b6   : > { %2923 = vrot.lane.b32.xlu0 %v6676_v51, %s4749_s27 }
 0x3b9   : > { %2929 = vrot.lane.b32.xlu1 %v6684_v29, %s4749_s27 }
 0x3ba   : > { %2927 = vrot.lane.b32.xlu0 %v6688_v43, %s4749_s27 }
 0x3bb   : > { %v6754_v4 = vpop.permute.xlu1 %2709 }
 0x3bc   : > { %8141 = vst [vmem:[#allocation72_spill] sm:$0xff] %v6754_v4  ;;  %v6758_v7 = vpop.permute.xlu0 %2707 }
 0x3bd   : > { %2933 = vrot.lane.b32.xlu1 %v6696_v6, %s4749_s27  ;;  %8142 = vst [vmem:[#allocation19_spill] sm:$0xff] %v6758_v7  ;;  %v6780_v7 = vld [vmem:[#allocation2 + $0xf8] sm:$0xff] }
 0x3be   : > { %2931 = vrot.lane.b32.xlu0 %v6700_v10, %s4749_s27 }
 0x3c1   : > { %2937 = vrot.lane.b32.xlu1 %v6708_v54, %s4749_s27 }
 0x3c2   : > { %2935 = vrot.lane.b32.xlu0 %v6712_v30, %s4749_s27 }
 0x3c3   : > { %v6766_v9 = vpop.permute.xlu1 %2713 }
 0x3c4   : > { %8143 = vst [vmem:[#allocation24_spill] sm:$0xff] %v6766_v9  ;;  %v6770_v56 = vpop.permute.xlu0 %2711 }
 0x3c5   : > { %2941 = vrot.lane.b32.xlu1 %v6720_v35, %s4749_s27  ;;  %8144 = vst [vmem:[#allocation74_spill] sm:$0xff] %v6770_v56  ;;  %v6792_v56 = vld [vmem:[#allocation2 + $0x110] sm:$0xff] }
 0x3c6   : > { %2939 = vrot.lane.b32.xlu0 %v6724_v63, %s4749_s27  ;;  %8148 = vst [vmem:[#allocation10_spill] sm:$0xff] %v6792_v56 }
 0x3c9   : > { %2945 = vrot.lane.b32.xlu1 %v6732_v26, %s4749_s27 }
 0x3ca   : > { %2943 = vrot.lane.b32.xlu0 %v6736_v15, %s4749_s27 }
 0x3cb   : > { %v6778_v4 = vpop.permute.xlu1 %2717 }
 0x3cc   : > { %8145 = vst [vmem:[#allocation93_spill] sm:$0xff] %v6778_v4  ;;  %v6782_v42 = vpop.permute.xlu0 %2715 }
 0x3cd   : > { %2949 = vrot.lane.b32.xlu1 %v6744_v13, %s4749_s27  ;;  %8146 = vst [vmem:[#allocation95_spill] sm:$0xff] %v6782_v42 }
 0x3ce   : > { %2947 = vrot.lane.b32.xlu0 %v6748_v47, %s4749_s27 }
 0x3d1   : > { %2953 = vrot.lane.b32.xlu1 %v6756_v36, %s4749_s27 }
 0x3d2   : > { %2951 = vrot.lane.b32.xlu0 %v6760_v23, %s4749_s27 }
 0x3d3   : > { %v6790_v9 = vpop.permute.xlu1 %2721 }
 0x3d4   : > { %8147 = vst [vmem:[#allocation6_spill] sm:$0xff] %v6790_v9  ;;  %v6794_v18 = vpop.permute.xlu0 %2719  ;;  %v2342_v9 = vld [vmem:[%s7733_s3] sm:$0xff] }
 0x3d5   : > { %2957 = vrot.lane.b32.xlu1 %v6768_v61, %s4749_s27  ;;  %8149 = vst [vmem:[#allocation53_spill] sm:$0xff] %v6794_v18  ;;  %v2343_v18 = vld [vmem:[%s7733_s3 + $0x8] sm:$0xff] }
 0x3d6   : > { %2955 = vrot.lane.b32.xlu0 %v6772_v49, %s4749_s27 }
 0x3d9   : > { %2961 = vrot.lane.b32.xlu1 %v6780_v7, %s4749_s27 }
 0x3da   : > { %2959 = vrot.lane.b32.xlu0 %v6784_v19, %s4749_s27 }
 0x3db   : > { %v6802_v4 = vpop.permute.xlu1 %2725 }
 0x3dc   : > { %8151 = vst [vmem:[#allocation126_spill] sm:$0xff] %v6802_v4  ;;  %v6804_v42 = vpop.permute.xlu0 %2723 }
 0x3dd   : > { %2965 = vrot.lane.b32.xlu1 %v6792_v56, %s4749_s27  ;;  %8152 = vst [vmem:[#allocation128_spill] sm:$0xff] %v6804_v42 }
 0x3de   : > { %2963 = vrot.lane.b32.xlu0 %v6796_v44, %s4749_s27  ;;  %v4644_v44 = vpack.c.bf16 %v2343_v18, %v2342_v9 }
 0x3e0   : > { %4645 = vmatprep.subr.bf16.mxu1 %v4644_v44 }
 0x3e1   : > { %3053 = vrot.lane.b32.xlu1 %v6446_v34, %s4750_s28  ;;  %4647 = vmatpush3.bf16.msra.mxu1 %v4644_v44  ;;  %v2344_v34 = vld [vmem:[%s7733_s3 + $0x10] sm:$0xff]  ;;  %v2346_v44 = vld [vmem:[%s7733_s3 + $0x20] sm:$0xf] }
 0x3e2   : > { %3051 = vrot.lane.b32.xlu0 %v6451_v17, %s4750_s28  ;;  %v2345_v17 = vld [vmem:[%s7733_s3 + $0x18] sm:$0xff] }
 0x3e3   : > { %v6816_v56 = vpop.permute.xlu1 %2729  ;;  %v4648_v18 = vpack.c.bf16 %v2345_v17, %v2344_v34 }
 0x3e4   : > { %8153 = vst [vmem:[#allocation23_spill] sm:$0xff] %v6816_v56  ;;  %v6818_v4 = vpop.permute.xlu0 %2727 }
 0x3e5   : > { %8154 = vst [vmem:[#allocation28_spill] sm:$0xff] %v6818_v4  ;;  %3181 = vrot.lane.b32.xlu1 %v6568_v3, %s4751_s29  ;;  %4649 = vmatprep.subr.bf16.mxu1 %v4648_v18 }
 0x3e6   : > { %3179 = vrot.lane.b32.xlu0 %v6572_v22, %s4751_s29  ;;  %4651 = vmatpush3.bf16.msra.mxu1 %v4648_v18 }
 0x3e7   : > { %v6830_v56 = vpop.permute.xlu1 %2797  ;;  %4586 = vmatprep.subr.msk.mxu1 %vm2049_vm3, %v2346_v44 }
 0x3e8   : > { %v6832_v9 = vpop.permute.xlu0 %2795 }
 0x3e9   : > { %3309 = vrot.lane.b32.xlu1 %v6684_v29, %s4752_s30 }
 0x3ea   : > { %3307 = vrot.lane.b32.xlu0 %v6688_v43, %s4752_s30  ;;  %4587 = vmatpush3.msk.msra.mxu1 %vm2049_vm3, %v2346_v44 }
 0x3eb   : > { %v6838_v3 = vpop.permute.xlu1 %2801 }
 0x3ec   : > { %v6840_v22 = vpop.permute.xlu0 %2799 }
 0x3ed   : > { %3055 = vrot.lane.b32.xlu1 %v6461_v37, %s4750_s28 }
 0x3ee   : > { %3435 = vrot.lane.b32.xlu0 %v6461_v37, %s4753_s14 }
 0x3ef   : > { %v6851_v34 = vpop.permute.xlu1 %2805 }
 0x3f0   : > { %v6853_v17 = vpop.permute.xlu0 %2803 }
 0x3f1   : > { %3563 = vrot.lane.b32.xlu1 %v6580_v24, %s4754_s17 }
 0x3f2   : > { %3437 = vrot.lane.b32.xlu0 %v6456_v0, %s4753_s14 }
 0x3f3   : > { %v6859_v18 = vpop.permute.xlu1 %2809 }
 0x3f4   : > { %8155 = vst [vmem:[#allocation73_spill] sm:$0xff] %v6859_v18  ;;  %v6861_v4 = vpop.permute.xlu0 %2807 }
 0x3f5   : > { %3183 = vrot.lane.b32.xlu1 %v6580_v24, %s4751_s29 }
 0x3f6   : > { %3057 = vrot.lane.b32.xlu0 %v6456_v0, %s4750_s28 }
 0x3f7   : > { %v6867_v37 = vpop.permute.xlu1 %2813 }
 0x3f8   : > { %v6869_v44 = vpop.permute.xlu0 %2811 }
 0x3f9   : > { %3185 = vrot.lane.b32.xlu1 %v6576_v38, %s4751_s29 }
 0x3fa   : > { %3565 = vrot.lane.b32.xlu0 %v6576_v38, %s4754_s17 }
 0x3fb   : > { %v6875_v42 = vpop.permute.xlu1 %2817 }
 0x3fc   : > { %8156 = vst [vmem:[#allocation76_spill] sm:$0xff] %v6875_v42  ;;  %v6877_v18 = vpop.permute.xlu0 %2815 }
 0x3fd   : > { %8157 = vst [vmem:[#allocation94_spill] sm:$0xff] %v6877_v18  ;;  %3313 = vrot.lane.b32.xlu1 %v6696_v6, %s4752_s30 }
 0x3fe   : > { %3311 = vrot.lane.b32.xlu0 %v6700_v10, %s4752_s30 }
 0x3ff   : > { %v6883_v0 = vpop.permute.xlu1 %2821 }
 0x400   : > { %8158 = vst [vmem:[#allocation97_spill] sm:$0xff] %v6883_v0  ;;  %v6885_v24 = vpop.permute.xlu0 %2819 }
 0x401   : > { %8159 = vst [vmem:[#allocation7_spill] sm:$0xff] %v6885_v24  ;;  %3059 = vrot.lane.b32.xlu1 %v6471_v50, %s4750_s28 }
 0x402   : > { %3439 = vrot.lane.b32.xlu0 %v6471_v50, %s4753_s14 }
 0x403   : > { %v6891_v38 = vpop.permute.xlu1 %2825 }
 0x404   : > { %8160 = vst [vmem:[#allocation18_spill] sm:$0xff] %v6891_v38  ;;  %v6893_v42 = vpop.permute.xlu0 %2823 }
 0x405   : > { %8161 = vst [vmem:[#allocation54_spill] sm:$0xff] %v6893_v42  ;;  %3567 = vrot.lane.b32.xlu1 %v6588_v25, %s4754_s17 }
 0x406   : > { %3441 = vrot.lane.b32.xlu0 %v6466_v55, %s4753_s14 }
 0x407   : > { %v6899_v18 = vpop.permute.xlu1 %2829 }
 0x408   : > { %8162 = vst [vmem:[#allocation61_spill] sm:$0xff] %v6899_v18  ;;  %v6901_v0 = vpop.permute.xlu0 %2827 }
 0x409   : > { %8163 = vst [vmem:[#allocation127_spill] sm:$0xff] %v6901_v0  ;;  %3187 = vrot.lane.b32.xlu1 %v6588_v25, %s4751_s29 }
 0x40a   : > { %3061 = vrot.lane.b32.xlu0 %v6466_v55, %s4750_s28 }
 0x40b   : > { %v6907_v50 = vpop.permute.xlu1 %2833 }
 0x40c   : > { %8164 = vst [vmem:[#allocation130_spill] sm:$0xff] %v6907_v50  ;;  %v6909_v38 = vpop.permute.xlu0 %2831 }
 0x40d   : > { %8165 = vst [vmem:[#allocation27_spill] sm:$0xff] %v6909_v38  ;;  %3189 = vrot.lane.b32.xlu1 %v6584_v32, %s4751_s29 }
 0x40e   : > { %3569 = vrot.lane.b32.xlu0 %v6584_v32, %s4754_s17 }
 0x40f   : > { %v6915_v42 = vpop.permute.xlu1 %2837 }
 0x410   : > { %8166 = vst [vmem:[#allocation32_spill] sm:$0xff] %v6915_v42  ;;  %v6917_v18 = vpop.permute.xlu0 %2835 }
 0x411   : > { %8167 = vst [vmem:[#allocation75_spill] sm:$0xff] %v6917_v18  ;;  %3317 = vrot.lane.b32.xlu1 %v6708_v54, %s4752_s30 }
 0x412   : > { %3315 = vrot.lane.b32.xlu0 %v6712_v30, %s4752_s30 }
 0x413   : > { %v6923_v55 = vpop.permute.xlu1 %2841 }
 0x414   : > { %8168 = vst [vmem:[#allocation78_spill] sm:$0xff] %v6923_v55  ;;  %v6925_v25 = vpop.permute.xlu0 %2839 }
 0x415   : > { %8169 = vst [vmem:[#allocation96_spill] sm:$0xff] %v6925_v25  ;;  %3063 = vrot.lane.b32.xlu1 %v6483_v59, %s4750_s28 }
 0x416   : > { %3443 = vrot.lane.b32.xlu0 %v6483_v59, %s4753_s14 }
 0x417   : > { %v6931_v32 = vpop.permute.xlu1 %2845 }
 0x418   : > { %8170 = vst [vmem:[#allocation99_spill] sm:$0xff] %v6931_v32  ;;  %v6933_v42 = vpop.permute.xlu0 %2843 }
 0x419   : > { %8171 = vst [vmem:[#allocation15_spill] sm:$0xff] %v6933_v42  ;;  %3571 = vrot.lane.b32.xlu1 %v6596_v48, %s4754_s17 }
 0x41a   : > { %3445 = vrot.lane.b32.xlu0 %v6478_v8, %s4753_s14 }
 0x41b   : > { %v6939_v18 = vpop.permute.xlu1 %2849 }
 0x41c   : > { %8172 = vst [vmem:[#allocation22_spill] sm:$0xff] %v6939_v18  ;;  %v6941_v55 = vpop.permute.xlu0 %2847 }
 0x41d   : > { %8173 = vst [vmem:[#allocation58_spill] sm:$0xff] %v6941_v55  ;;  %3191 = vrot.lane.b32.xlu1 %v6596_v48, %s4751_s29 }
 0x41e   : > { %3065 = vrot.lane.b32.xlu0 %v6478_v8, %s4750_s28 }
 0x41f   : > { %v6947_v59 = vpop.permute.xlu1 %2853 }
 0x420   : > { %8174 = vst [vmem:[#allocation65_spill] sm:$0xff] %v6947_v59  ;;  %v6949_v32 = vpop.permute.xlu0 %2851 }
 0x421   : > { %8175 = vst [vmem:[#allocation129_spill] sm:$0xff] %v6949_v32  ;;  %3193 = vrot.lane.b32.xlu1 %v6592_v20, %s4751_s29 }
 0x422   : > { %3573 = vrot.lane.b32.xlu0 %v6592_v20, %s4754_s17 }
 0x423   : > { %v6955_v42 = vpop.permute.xlu1 %2857 }
 0x424   : > { %8176 = vst [vmem:[#allocation132_spill] sm:$0xff] %v6955_v42  ;;  %v6957_v18 = vpop.permute.xlu0 %2855 }
 0x425   : > { %8177 = vst [vmem:[#allocation31_spill] sm:$0xff] %v6957_v18  ;;  %3321 = vrot.lane.b32.xlu1 %v6720_v35, %s4752_s30 }
 0x426   : > { %3319 = vrot.lane.b32.xlu0 %v6724_v63, %s4752_s30 }
 0x427   : > { %v6963_v8 = vpop.permute.xlu1 %2925 }
 0x428   : > { %v2924_v48 = vpop.permute.xlu0 %2923 }
 0x429   : > { %3067 = vrot.lane.b32.xlu1 %v6495_v45, %s4750_s28 }
 0x42a   : > { %3447 = vrot.lane.b32.xlu0 %v6495_v45, %s4753_s14 }
 0x42b   : > { %v6969_v20 = vpop.permute.xlu1 %2929 }
 0x42c   : > { %v6971_v42 = vpop.permute.xlu0 %2927 }
 0x42d   : > { %3575 = vrot.lane.b32.xlu1 %v6604_v53, %s4754_s17 }
 0x42e   : > { %3449 = vrot.lane.b32.xlu0 %v6490_v57, %s4753_s14 }
 0x42f   : > { %v6977_v18 = vpop.permute.xlu1 %2933 }
 0x430   : > { %v6979_v59 = vpop.permute.xlu0 %2931 }
 0x431   : > { %3195 = vrot.lane.b32.xlu1 %v6604_v53, %s4751_s29 }
 0x432   : > { %3069 = vrot.lane.b32.xlu0 %v6490_v57, %s4750_s28 }
 0x433   : > { %v6985_v45 = vpop.permute.xlu1 %2937 }
 0x434   : > { %v6987_v32 = vpop.permute.xlu0 %2935 }
 0x435   : > { %3197 = vrot.lane.b32.xlu1 %v6600_v39, %s4751_s29 }
 0x436   : > { %3577 = vrot.lane.b32.xlu0 %v6600_v39, %s4754_s17 }
 0x437   : > { %v6993_v55 = vpop.permute.xlu1 %2941 }
 0x438   : > { %v6995_v25 = vpop.permute.xlu0 %2939 }
 0x439   : > { %3325 = vrot.lane.b32.xlu1 %v6732_v26, %s4752_s30  ;;  %v2486_v26 = vld [vmem:[#allocation2 + $0x99] sm:$0xff] }
 0x43a   : > { %3323 = vrot.lane.b32.xlu0 %v6736_v15, %s4752_s30 }
 0x43b   : > { %v7001_v57 = vpop.permute.xlu1 %2945 }
 0x43c   : > { %v7003_v53 = vpop.permute.xlu0 %2943 }
 0x43d   : > { %3071 = vrot.lane.b32.xlu1 %v6507_v16, %s4750_s28 }
 0x43e   : > { %3451 = vrot.lane.b32.xlu0 %v6507_v16, %s4753_s14 }
 0x43f   : > { %v7009_v39 = vpop.permute.xlu1 %2949 }
 0x440   : > { %8178 = vst [vmem:[#allocation36_spill] sm:$0xff] %v7009_v39  ;;  %v7011_v50 = vpop.permute.xlu0 %2947 }
 0x441   : > { %8179 = vst [vmem:[#allocation77_spill] sm:$0xff] %v7011_v50  ;;  %3579 = vrot.lane.b32.xlu1 %v6612_v62, %s4754_s17 }
 0x442   : > { %3453 = vrot.lane.b32.xlu0 %v6502_v2, %s4753_s14 }
 0x443   : > { %v7017_v38 = vpop.permute.xlu1 %2953 }
 0x444   : > { %8180 = vst [vmem:[#allocation80_spill] sm:$0xff] %v7017_v38  ;;  %v7019_v0 = vpop.permute.xlu0 %2951 }
 0x445   : > { %8181 = vst [vmem:[#allocation98_spill] sm:$0xff] %v7019_v0  ;;  %3199 = vrot.lane.b32.xlu1 %v6612_v62, %s4751_s29 }
 0x446   : > { %3073 = vrot.lane.b32.xlu0 %v2486_v26, %s4750_s28 }
 0x447   : > { %v7024_v16 = vpop.permute.xlu1 %2957 }
 0x448   : > { %8182 = vst [vmem:[#allocation101_spill] sm:$0xff] %v7024_v16  ;;  %v7026_v39 = vpop.permute.xlu0 %2955  ;;  %v2487_v16 = vld [vmem:[#allocation2 + $0xa9] sm:$0xff] }
 0x449   : > { %8183 = vst [vmem:[#allocation21_spill] sm:$0xff] %v7026_v39  ;;  %3201 = vrot.lane.b32.xlu1 %v6608_v1, %s4751_s29 }
 0x44a   : > { %3581 = vrot.lane.b32.xlu0 %v6608_v1, %s4754_s17 }
 0x44b   : > { %v7032_v2 = vpop.permute.xlu1 %2961 }
 0x44c   : > { %8184 = vst [vmem:[#allocation26_spill] sm:$0xff] %v7032_v2  ;;  %v7034_v38 = vpop.permute.xlu0 %2959  ;;  %v2582_v2 = vld [vmem:[#allocation2 + $0xb1] sm:$0xff] }
 0x44d   : > { %8185 = vst [vmem:[#allocation62_spill] sm:$0xff] %v7034_v38  ;;  %3329 = vrot.lane.b32.xlu1 %v6744_v13, %s4752_s30 }
 0x44e   : > { %3327 = vrot.lane.b32.xlu0 %v6748_v47, %s4752_s30 }
 0x44f   : > { %v7040_v62 = vpop.permute.xlu1 %2965 }
 0x450   : > { %8186 = vst [vmem:[#allocation113_spill] sm:$0xff] %v7040_v62  ;;  %v7042_v26 = vpop.permute.xlu0 %2963  ;;  %v2347_v62 = vld [vmem:[#allocation2] sm:$0xff] }
 0x451   : > { %8187 = vst [vmem:[#allocation131_spill] sm:$0xff] %v7042_v26  ;;  %3075 = vrot.lane.b32.xlu1 %v2487_v16, %s4750_s28 }
 0x452   : > { %3455 = vrot.lane.b32.xlu0 %v2487_v16, %s4753_s14  ;;  %v3659_v16 = vsel %vm257_vm0, %v2347_v62, %v6651_v27 }
 0x453   : > { %v3054_v1 = vpop.permute.xlu1 %3053  ;;  %v3691_v47 = vsel %vm1714_vm4, %v3659_v16, %v6832_v9  ;;  %v2348_v9 = vld [vmem:[#allocation2 + $0x8] sm:$0xff] }
 0x454   : > { %v3052_v39 = vpop.permute.xlu0 %3051  ;;  %v3723_v50 = vsel %vm1747_vm5, %v3691_v47, %v2924_v48  ;;  %v2489_v47 = vld [vmem:[#allocation2 + $0xc1] sm:$0xff] }
 0x455   : > { %3583 = vrot.lane.b32.xlu1 %v6620_v33, %s4754_s17  ;;  %v3755_v24 = vsel %vm1780_vm6, %v3723_v50, %v3052_v39  ;;  %v2584_v39 = vld [vmem:[#allocation2 + $0xc9] sm:$0xff] }
 0x456   : > { %3457 = vrot.lane.b32.xlu0 %v2582_v2, %s4753_s14 }
 0x457   : > { %v3182_v38 = vpop.permute.xlu1 %3181 }
 0x458   : > { %v3180_v13 = vpop.permute.xlu0 %3179 }
 0x459   : > { %3203 = vrot.lane.b32.xlu1 %v6620_v33, %s4751_s29  ;;  %v3787_v15 = vsel %vm1813_vm7, %v3755_v24, %v3180_v13 }
 0x45a   : > { %3077 = vrot.lane.b32.xlu0 %v2582_v2, %s4750_s28 }
 0x45b   : > { %v3310_v26 = vpop.permute.xlu1 %3309 }
 0x45c   : > { %v3308_v0 = vpop.permute.xlu0 %3307 }
 0x45d   : > { %3205 = vrot.lane.b32.xlu1 %v6616_v46, %s4751_s29  ;;  %v3819_v27 = vsel %vm1846_vm8, %v3787_v15, %v3308_v0 }
 0x45e   : > { %3585 = vrot.lane.b32.xlu0 %v6616_v46, %s4754_s17 }
 0x45f   : > { %v3056_v33 = vpop.permute.xlu1 %3055 }
 0x460   : > { %v3436_v2 = vpop.permute.xlu0 %3435 }
 0x461   : > { %3333 = vrot.lane.b32.xlu1 %v6756_v36, %s4752_s30  ;;  %v3851_v62 = vsel %vm1879_vm9, %v3819_v27, %v3436_v2  ;;  %v3660_v36 = vsel %vm257_vm0, %v2348_v9, %v6648_v5 }
 0x462   : > { %3331 = vrot.lane.b32.xlu0 %v6760_v23, %s4752_s30  ;;  %v3692_v15 = vsel %vm1714_vm4, %v3660_v36, %v6830_v56  ;;  %v2491_v36 = vld [vmem:[#allocation2 + $0xd9] sm:$0xff] }
 0x463   : > { %v3564_v46 = vpop.permute.xlu1 %3563  ;;  %v3724_v0 = vsel %vm1747_vm5, %v3692_v15, %v6963_v8 }
 0x464   : > { %v3438_v16 = vpop.permute.xlu0 %3437  ;;  %v3883_v48 = vsel %vm1912_vm10, %v3851_v62, %v3564_v46  ;;  %v3756_v50 = vsel %vm1780_vm6, %v3724_v0, %v3054_v1 }
 0x465   : > { %3079 = vrot.lane.b32.xlu1 %v2489_v47, %s4750_s28  ;;  %4588 = vmatprep.mubr.msk.f32.mxu1 %vm1952_vm11, %v3883_v48  ;;  %v3788_v2 = vsel %vm1813_vm7, %v3756_v50, %v3182_v38  ;;  %v3661_v38 = vsel %vm257_vm0, %v6676_v51, %v6658_v12  ;;  %v2586_v50 = vld [vmem:[#allocation2 + $0xe1] sm:$0xff] }
 0x466   : > { %3459 = vrot.lane.b32.xlu0 %v2489_v47, %s4753_s14  ;;  %v3820_v5 = vsel %vm1846_vm8, %v3788_v2, %v3310_v26  ;;  %v3693_v26 = vsel %vm1714_vm4, %v3661_v38, %v6840_v22  ;;  %v2493_v38 = vld [vmem:[#allocation2 + $0xf1] sm:$0xff] }
 0x467   : > { %v3184_v13 = vpop.permute.xlu1 %3183  ;;  %v3852_v56 = vsel %vm1879_vm9, %v3820_v5, %v3438_v16 }
 0x468   : > { %v3058_v24 = vpop.permute.xlu0 %3057 }
 0x469   : > { %3587 = vrot.lane.b32.xlu1 %v6628_v41, %s4754_s17 }
 0x46a   : > { %3461 = vrot.lane.b32.xlu0 %v2584_v39, %s4753_s14 }
 0x46b   : > { %v3186_v27 = vpop.permute.xlu1 %3185 }
 0x46c   : > { %v3566_v9 = vpop.permute.xlu0 %3565 }
 0x46d   : > { %v3884_v62 = vsel %vm1912_vm10, %v3852_v56, %v3566_v9  ;;  %3207 = vrot.lane.b32.xlu1 %v6628_v41, %s4751_s29  ;;  %v3725_v41 = vsel %vm1747_vm5, %v3693_v26, %v6971_v42 }
 0x46e   : > { %3081 = vrot.lane.b32.xlu0 %v2584_v39, %s4750_s28  ;;  %4589 = vmatmul.mubr.msk.f32.vlgmr.msra.gmra.mrb[0].mxu1 %vm1952_vm11, %v3884_v62  ;;  %v3757_v16 = vsel %vm1780_vm6, %v3725_v41, %v3056_v33 }
 0x46f   : > { %v3314_v8 = vpop.permute.xlu1 %3313  ;;  %v3789_v48 = vsel %vm1813_vm7, %v3757_v16, %v3184_v13 }
 0x470   : > { %v3312_v1 = vpop.permute.xlu0 %3311 }
 0x471   : > { %3209 = vrot.lane.b32.xlu1 %v6624_v21, %s4751_s29  ;;  %v3821_v12 = vsel %vm1846_vm8, %v3789_v48, %v3312_v1 }
 0x472   : > { %3589 = vrot.lane.b32.xlu0 %v6624_v21, %s4754_s17 }
 0x473   : > { %v3060_v46 = vpop.permute.xlu1 %3059 }
 0x474   : > { %v3440_v47 = vpop.permute.xlu0 %3439 }
 0x475   : > { %3337 = vrot.lane.b32.xlu1 %v6768_v61, %s4752_s30  ;;  %v3853_v51 = vsel %vm1879_vm9, %v3821_v12, %v3440_v47  ;;  %v3662_v61 = vsel %vm257_vm0, %v6672_v14, %v6656_v52  ;;  %v2588_v47 = vld [vmem:[#allocation2 + $0xf9] sm:$0xff] }
 0x476   : > { %3335 = vrot.lane.b32.xlu0 %v6772_v49, %s4752_s30  ;;  %v3694_v49 = vsel %vm1714_vm4, %v3662_v61, %v6838_v3 }
 0x477   : > { %v3568_v21 = vpop.permute.xlu1 %3567  ;;  %v3726_v15 = vsel %vm1747_vm5, %v3694_v49, %v6969_v20 }
 0x478   : > { %v3885_v22 = vsel %vm1912_vm10, %v3853_v51, %v3568_v21  ;;  %v3442_v42 = vpop.permute.xlu0 %3441  ;;  %v3758_v0 = vsel %vm1780_vm6, %v3726_v15, %v3058_v24 }
 0x479   : > { %3083 = vrot.lane.b32.xlu1 %v2491_v36, %s4750_s28  ;;  %4591 = vmatprep.mubr.msk.f32.mxu1 %vm1952_vm11, %v3885_v22  ;;  %v3790_v39 = vsel %vm1813_vm7, %v3758_v0, %v3186_v27  ;;  %v3663_v27 = vsel %vm257_vm0, %v6688_v43, %v6665_v40  ;;  %v3665_v22 = vsel %vm257_vm0, %v6700_v10, %v6674_v31  ;;  %v8189_v31 = vld [vmem:[#allocation10_spill] sm:$0xff] }
 0x47a   : > { %3463 = vrot.lane.b32.xlu0 %v2491_v36, %s4753_s14  ;;  %v3822_v52 = vsel %vm1846_vm8, %v3790_v39, %v3314_v8  ;;  %v3695_v56 = vsel %vm1714_vm4, %v3663_v27, %v6853_v17  ;;  %v3697_v36 = vsel %vm1714_vm4, %v3665_v22, %v6861_v4  ;;  %v2495_v39 = vld [vmem:[#allocation2 + $0x109] sm:$0xff] }
 0x47b   : > { %v3188_v33 = vpop.permute.xlu1 %3187  ;;  %v3854_v3 = vsel %vm1879_vm9, %v3822_v52, %v3442_v42  ;;  %v8188_v42 = vld [vmem:[#allocation3_spill] sm:$0xff] }
 0x47c   : > { %v3062_v13 = vpop.permute.xlu0 %3061  ;;  %v8191_v52 = vld [vmem:[#allocation59_spill] sm:$0xff] }
 0x47d   : > { %3591 = vrot.lane.b32.xlu1 %v6636_v58, %s4754_s17  ;;  %v2621_v27 = vld [vmem:[#allocation2 + $0x10a] sm:$0xff] }
 0x47e   : > { %3465 = vrot.lane.b32.xlu0 %v2586_v50, %s4753_s14 }
 0x47f   : > { %v3190_v14 = vpop.permute.xlu1 %3189 }
 0x480   : > { %v3570_v2 = vpop.permute.xlu0 %3569 }
 0x481   : > { %v3886_v5 = vsel %vm1912_vm10, %v3854_v3, %v3570_v2  ;;  %3211 = vrot.lane.b32.xlu1 %v6636_v58, %s4751_s29  ;;  %v3727_v58 = vsel %vm1747_vm5, %v3695_v56, %v6979_v59  ;;  %v8192_v3 = vld [vmem:[#allocation73_spill] sm:$0xff] }
 0x482   : > { %3085 = vrot.lane.b32.xlu0 %v2586_v50, %s4750_s28  ;;  %4592 = vmatmul.mubr.msk.f32.gmra.mrb[2].mxu1 %vm1952_vm11, %v3886_v5  ;;  %v3759_v62 = vsel %vm1780_vm6, %v3727_v58, %v3060_v46  ;;  %v2590_v58 = vld [vmem:[#allocation2 + $0x111] sm:$0xff] }
 0x483   : > { %v3318_v20 = vpop.permute.xlu1 %3317  ;;  %v3791_v1 = vsel %vm1813_vm7, %v3759_v62, %v3188_v33 }
 0x484   : > { %v3316_v24 = vpop.permute.xlu0 %3315 }
 0x485   : > { %3213 = vrot.lane.b32.xlu1 %v6632_v60, %s4751_s29  ;;  %v3823_v40 = vsel %vm1846_vm8, %v3791_v1, %v3316_v24 }
 0x486   : > { %3593 = vrot.lane.b32.xlu0 %v6632_v60, %s4754_s17 }
 0x487   : > { %v3064_v9 = vpop.permute.xlu1 %3063 }
 0x488   : > { %v3444_v8 = vpop.permute.xlu0 %3443 }
 0x489   : > { %3341 = vrot.lane.b32.xlu1 %v6780_v7, %s4752_s30  ;;  %v3855_v43 = vsel %vm1879_vm9, %v3823_v40, %v3444_v8  ;;  %v3664_v7 = vsel %vm257_vm0, %v6684_v29, %v6662_v28 }
 0x48a   : > { %3339 = vrot.lane.b32.xlu0 %v6784_v19, %s4752_s30  ;;  %v3696_v19 = vsel %vm1714_vm4, %v3664_v7, %v6851_v34 }
 0x48b   : > { %v3572_v60 = vpop.permute.xlu1 %3571  ;;  %v3728_v41 = vsel %vm1747_vm5, %v3696_v19, %v6977_v18 }
 0x48c   : > { %v3887_v17 = vsel %vm1912_vm10, %v3855_v43, %v3572_v60  ;;  %v3446_v59 = vpop.permute.xlu0 %3445  ;;  %v3760_v16 = vsel %vm1780_vm6, %v3728_v41, %v3062_v13  ;;  %v8190_v13 = vld [vmem:[#allocation57_spill] sm:$0xff]  ;;  %v2528_v60 = vld [vmem:[#allocation2 + $0x112] sm:$0xff] }
 0x48d   : > { %3087 = vrot.lane.b32.xlu1 %v2493_v38, %s4750_s28  ;;  %4594 = vmatprep.mubr.msk.f32.mxu1 %vm1952_vm11, %v3887_v17  ;;  %v3792_v48 = vsel %vm1813_vm7, %v3760_v16, %v3190_v14  ;;  %v3666_v14 = vsel %vm257_vm0, %v6696_v6, %v8191_v52  ;;  %v8193_v17 = vld [vmem:[#allocation9_spill] sm:$0xff] }
 0x48e   : > { %3467 = vrot.lane.b32.xlu0 %v2493_v38, %s4753_s14  ;;  %v3824_v28 = vsel %vm1846_vm8, %v3792_v48, %v3318_v20  ;;  %v3698_v2 = vsel %vm1714_vm4, %v3666_v14, %v8192_v3  ;;  %v2530_v14 = vld [vmem:[#allocation2 + $0x12a] sm:$0xff] }
 0x48f   : > { %v3192_v26 = vpop.permute.xlu1 %3191  ;;  %v3856_v34 = vsel %vm1879_vm9, %v3824_v28, %v3446_v59  ;;  %v3730_v20 = vsel %vm1747_vm5, %v3698_v2, %v6985_v45  ;;  %v3667_v59 = vsel %vm257_vm0, %v6712_v30, %v8193_v17  ;;  %v2591_v28 = vld [vmem:[#allocation2 + $0x121] sm:$0xff] }
 0x490   : > { %v3066_v46 = vpop.permute.xlu0 %3065  ;;  %v3699_v38 = vsel %vm1714_vm4, %v3667_v59, %v6869_v44 }
 0x491   : > { %3595 = vrot.lane.b32.xlu1 %v6644_v11, %s4754_s17  ;;  %v3762_v56 = vsel %vm1780_vm6, %v3730_v20, %v3066_v46  ;;  %v3731_v7 = vsel %vm1747_vm5, %v3699_v38, %v6995_v25  ;;  %v7274_v20 = vld [vmem:[#allocation2 + $0x138] sm:$0xff] }
 0x492   : > { %3469 = vrot.lane.b32.xlu0 %v2588_v47, %s4753_s14 }
 0x493   : > { %v3194_v29 = vpop.permute.xlu1 %3193 }
 0x494   : > { %v3574_v12 = vpop.permute.xlu0 %3573 }
 0x495   : > { %v3888_v51 = vsel %vm1912_vm10, %v3856_v34, %v3574_v12  ;;  %3215 = vrot.lane.b32.xlu1 %v6644_v11, %s4751_s29  ;;  %v3729_v11 = vsel %vm1747_vm5, %v3697_v36, %v6987_v32  ;;  %v8194_v34 = vld [vmem:[#allocation5_spill] sm:$0xff] }
 0x496   : > { %3089 = vrot.lane.b32.xlu0 %v2588_v47, %s4750_s28  ;;  %4595 = vmatmul.mubr.msk.f32.gmra.mrb[4].mxu1 %vm1952_vm11, %v3888_v51  ;;  %v3761_v49 = vsel %vm1780_vm6, %v3729_v11, %v3064_v9  ;;  %v3794_v9 = vsel %vm1813_vm7, %v3762_v56, %v3194_v29  ;;  %v7235_v29 = vld [vmem:[#allocation2 + $0x128] sm:$0xff]  ;;  %v3668_v12 = vsel %vm257_vm0, %v6708_v54, %v8194_v34  ;;  %v8197_v56 = vld [vmem:[#allocation68_spill] sm:$0xff] }
 0x497   : > { %v3322_v18 = vpop.permute.xlu1 %3321  ;;  %v3793_v15 = vsel %vm1813_vm7, %v3761_v49, %v3192_v26  ;;  %v7224_v26 = vld [vmem:[#allocation2 + $0x120] sm:$0xff]  ;;  %v3700_v51 = vsel %vm1714_vm4, %v3668_v12, %v6867_v37 }
 0x498   : > { %v3320_v21 = vpop.permute.xlu0 %3319  ;;  %v3826_v6 = vsel %vm1846_vm8, %v3794_v9, %v3322_v18  ;;  %v2623_v49 = vld [vmem:[#allocation2 + $0x122] sm:$0xff]  ;;  %v8198_v9 = vld [vmem:[#allocation76_spill] sm:$0xff] }
 0x499   : > { %3217 = vrot.lane.b32.xlu1 %v8188_v42, %s4751_s29  ;;  %v3825_v10 = vsel %vm1846_vm8, %v3793_v15, %v3320_v21  ;;  %v3732_v21 = vsel %vm1747_vm5, %v3700_v51, %v6993_v55  ;;  %v2592_v55 = vld [vmem:[#allocation2 + $0x129] sm:$0xff] }
 0x49a   : > { %3597 = vrot.lane.b32.xlu0 %v8188_v42, %s4754_s17 }
 0x49b   : > { %v3068_v61 = vpop.permute.xlu1 %3067 }
 0x49c   : > { %v3448_v33 = vpop.permute.xlu0 %3447  ;;  %v3763_v41 = vsel %vm1780_vm6, %v3731_v7, %v3068_v61 }
 0x49d   : > { %3345 = vrot.lane.b32.xlu1 %v8189_v31, %s4752_s30  ;;  %v3857_v4 = vsel %vm1879_vm9, %v3825_v10, %v3448_v33  ;;  %v8195_v10 = vld [vmem:[#allocation63_spill] sm:$0xff] }
 0x49e   : > { %3343 = vrot.lane.b32.xlu0 %v8190_v13, %s4752_s30  ;;  %v3669_v13 = vsel %vm257_vm0, %v6724_v63, %v8195_v10 }
 0x49f   : > { %v3576_v0 = vpop.permute.xlu1 %3575 }
 0x4a0   : > { %v3889_v50 = vsel %vm1912_vm10, %v3857_v4, %v3576_v0  ;;  %v3450_v32 = vpop.permute.xlu0 %3449  ;;  %v8196_v4 = vld [vmem:[#allocation94_spill] sm:$0xff] }
 0x4a1   : > { %3091 = vrot.lane.b32.xlu1 %v2495_v39, %s4750_s28  ;;  %4597 = vmatprep.mubr.msk.f32.mxu1 %vm1952_vm11, %v3889_v50  ;;  %v3858_v8 = vsel %vm1879_vm9, %v3826_v6, %v3450_v32  ;;  %v3701_v0 = vsel %vm1714_vm4, %v3669_v13, %v8196_v4  ;;  %v2469_v4 = vld [vmem:[#allocation2 + $0x150] sm:$0xff] }
 0x4a2   : > { %3471 = vrot.lane.b32.xlu0 %v2495_v39, %s4753_s14  ;;  %v3733_v50 = vsel %vm1747_vm5, %v3701_v0, %v7003_v53 }
 0x4a3   : > { %v3196_v5 = vpop.permute.xlu1 %3195 }
 0x4a4   : > { %v3070_v24 = vpop.permute.xlu0 %3069  ;;  %v3795_v16 = vsel %vm1813_vm7, %v3763_v41, %v3196_v5  ;;  %v2625_v41 = vld [vmem:[#allocation2 + $0x13a] sm:$0xff] }
 0x4a5   : > { %3599 = vrot.lane.b32.xlu1 %v2621_v27, %s4754_s17  ;;  %v3764_v42 = vsel %vm1780_vm6, %v3732_v21, %v3070_v24 }
 0x4a6   : > { %3473 = vrot.lane.b32.xlu0 %v2590_v58, %s4753_s14 }
 0x4a7   : > { %v3198_v62 = vpop.permute.xlu1 %3197 }
 0x4a8   : > { %v3578_v1 = vpop.permute.xlu0 %3577  ;;  %v3796_v36 = vsel %vm1813_vm7, %v3764_v42, %v3198_v62 }
 0x4a9   : > { %v3890_v40 = vsel %vm1912_vm10, %v3858_v8, %v3578_v1  ;;  %3219 = vrot.lane.b32.xlu1 %v2621_v27, %s4751_s29  ;;  %v2561_v27 = vld [vmem:[#allocation2 + $0x138] sm:$0xff] }
 0x4aa   : > { %3093 = vrot.lane.b32.xlu0 %v2590_v58, %s4750_s28  ;;  %4598 = vmatmul.mubr.msk.f32.gmra.mrb[6].mxu1 %vm1952_vm11, %v3890_v40  ;;  %v3670_v58 = vsel %vm257_vm0, %v6720_v35, %v8197_v56  ;;  %v2593_v40 = vld [vmem:[#allocation2 + $0x139] sm:$0xff] }
 0x4ab   : > { %v3326_v45 = vpop.permute.xlu1 %3325  ;;  %v3702_v6 = vsel %vm1714_vm4, %v3670_v58, %v8198_v9  ;;  %v8209_v58 = vld [vmem:[#allocation54_spill] sm:$0xff] }
 0x4ac   : > { %v3324_v43 = vpop.permute.xlu0 %3323  ;;  %v3828_v54 = vsel %vm1846_vm8, %v3796_v36, %v3326_v45  ;;  %v3734_v8 = vsel %vm1747_vm5, %v3702_v6, %v7001_v57  ;;  %v8210_v6 = vld [vmem:[#allocation98_spill] sm:$0xff] }
 0x4ad   : > { %3221 = vrot.lane.b32.xlu1 %v2528_v60, %s4751_s29  ;;  %v3827_v30 = vsel %vm1846_vm8, %v3795_v16, %v3324_v43  ;;  %v2562_v43 = vld [vmem:[#allocation2 + $0x140] sm:$0xff] }
 0x4ae   : > { %3601 = vrot.lane.b32.xlu0 %v2528_v60, %s4754_s17  ;;  %v8200_v16 = vld [vmem:[#allocation13_spill] sm:$0xff] }
 0x4af   : > { %v3072_v19 = vpop.permute.xlu1 %3071 }
 0x4b0   : > { %v3452_v46 = vpop.permute.xlu0 %3451  ;;  %v3765_v39 = vsel %vm1780_vm6, %v3733_v50, %v3072_v19 }
 0x4b1   : > { %2967 = vrot.lane.b32.xlu1 %v7224_v26, %s4749_s27  ;;  %v3859_v44 = vsel %vm1879_vm9, %v3827_v30, %v3452_v46  ;;  %v8199_v46 = vld [vmem:[#allocation12_spill] sm:$0xff] }
 0x4b2   : > { %3347 = vrot.lane.b32.xlu0 %v7224_v26, %s4752_s30  ;;  %v3671_v30 = vsel %vm257_vm0, %v8200_v16, %v8199_v46  ;;  %v8213_v46 = vld [vmem:[#allocation18_spill] sm:$0xff] }
 0x4b3   : > { %v3580_v47 = vpop.permute.xlu1 %3579 }
 0x4b4   : > { %v3891_v25 = vsel %vm1912_vm10, %v3859_v44, %v3580_v47  ;;  %v3454_v48 = vpop.permute.xlu0 %3453  ;;  %v2594_v44 = vld [vmem:[#allocation2 + $0x141] sm:$0xff]  ;;  %v8201_v47 = vld [vmem:[#allocation7_spill] sm:$0xff] }
 0x4b5   : > { %3475 = vrot.lane.b32.xlu1 %v2591_v28, %s4753_s14  ;;  %4600 = vmatprep.mubr.msk.f32.mxu1 %vm1952_vm11, %v3891_v25  ;;  %v3860_v61 = vsel %vm1879_vm9, %v3828_v54, %v3454_v48  ;;  %v3703_v25 = vsel %vm1714_vm4, %v3671_v30, %v8201_v47  ;;  %v8202_v48 = vld [vmem:[#allocation77_spill] sm:$0xff] }
 0x4b6   : > { %3349 = vrot.lane.b32.xlu0 %v7235_v29, %s4752_s30 }
 0x4b7   : > { %v3200_v18 = vpop.permute.xlu1 %3199 }
 0x4b8   : > { %v3074_v22 = vpop.permute.xlu0 %3073  ;;  %v3797_v3 = vsel %vm1813_vm7, %v3765_v39, %v3200_v18 }
 0x4b9   : > { %3095 = vrot.lane.b32.xlu1 %v2591_v28, %s4750_s28  ;;  %v3766_v45 = vsel %vm1780_vm6, %v3734_v8, %v3074_v22  ;;  %v3735_v28 = vsel %vm1747_vm5, %v3703_v25, %v8202_v48  ;;  %v2534_v48 = vld [vmem:[#allocation2 + $0x15a] sm:$0xff] }
 0x4ba   : > { %2969 = vrot.lane.b32.xlu0 %v7235_v29, %s4749_s27 }
 0x4bb   : > { %v3202_v11 = vpop.permute.xlu1 %3201 }
 0x4bc   : > { %v3582_v37 = vpop.permute.xlu0 %3581  ;;  %v3798_v60 = vsel %vm1813_vm7, %v3766_v45, %v3202_v11  ;;  %v2532_v11 = vld [vmem:[#allocation2 + $0x142] sm:$0xff]  ;;  %v2627_v45 = vld [vmem:[#allocation2 + $0x152] sm:$0xff] }
 0x4bd   : > { %v3892_v33 = vsel %vm1912_vm10, %v3860_v61, %v3582_v37  ;;  %3603 = vrot.lane.b32.xlu1 %v2623_v49, %s4754_s17  ;;  %v8203_v61 = vld [vmem:[#allocation8_spill] sm:$0xff]  ;;  %v8204_v37 = vld [vmem:[#allocation14_spill] sm:$0xff] }
 0x4be   : > { %3477 = vrot.lane.b32.xlu0 %v2592_v55, %s4753_s14  ;;  %4601 = vmatmul.mubr.msk.f32.gmra.mrb[8].mxu1 %vm1952_vm11, %v3892_v33  ;;  %v8205_v33 = vld [vmem:[#allocation97_spill] sm:$0xff] }
 0x4bf   : > { %v3330_v15 = vpop.permute.xlu1 %3329 }
 0x4c0   : > { %v3328_v31 = vpop.permute.xlu0 %3327  ;;  %v3830_v35 = vsel %vm1846_vm8, %v3798_v60, %v3330_v15  ;;  %v2596_v60 = vld [vmem:[#allocation2 + $0x159] sm:$0xff] }
 0x4c1   : > { %3223 = vrot.lane.b32.xlu1 %v2623_v49, %s4751_s29  ;;  %v3829_v63 = vsel %vm1846_vm8, %v3797_v3, %v3328_v31  ;;  %v3672_v49 = vsel %vm257_vm0, %v8204_v37, %v8203_v61  ;;  %v8206_v31 = vld [vmem:[#allocation36_spill] sm:$0xff]  ;;  %v8215_v61 = vld [vmem:[#allocation69_spill] sm:$0xff] }
 0x4c2   : > { %3097 = vrot.lane.b32.xlu0 %v2592_v55, %s4750_s28  ;;  %v3704_v55 = vsel %vm1714_vm4, %v3672_v49, %v8205_v33  ;;  %v2595_v3 = vld [vmem:[#allocation2 + $0x151] sm:$0xff]  ;;  %v3675_v37 = vsel %vm257_vm0, %v6760_v23, %v8215_v61 }
 0x4c3   : > { %v3076_v32 = vpop.permute.xlu1 %3075  ;;  %v3736_v10 = vsel %vm1747_vm5, %v3704_v55, %v8206_v31  ;;  %v2566_v49 = vld [vmem:[#allocation2 + $0x170] sm:$0xff] }
 0x4c4   : > { %v3456_v52 = vpop.permute.xlu0 %3455  ;;  %v3767_v12 = vsel %vm1780_vm6, %v3735_v28, %v3076_v32  ;;  %v8216_v33 = vld [vmem:[#allocation127_spill] sm:$0xff] }
 0x4c5   : > { %3225 = vrot.lane.b32.xlu1 %v2530_v14, %s4751_s29  ;;  %v3861_v2 = vsel %vm1879_vm9, %v3829_v63, %v3456_v52  ;;  %v3707_v55 = vsel %vm1714_vm4, %v3675_v37, %v8216_v33  ;;  %v8226_v37 = vld [vmem:[#allocation26_spill] sm:$0xff] }
 0x4c6   : > { %3605 = vrot.lane.b32.xlu0 %v2530_v14, %s4754_s17 }
 0x4c7   : > { %v3584_v5 = vpop.permute.xlu1 %3583 }
 0x4c8   : > { %v3893_v53 = vsel %vm1912_vm10, %v3861_v2, %v3584_v5  ;;  %v3458_v24 = vpop.permute.xlu0 %3457  ;;  %v2564_v2 = vld [vmem:[#allocation2 + $0x158] sm:$0xff] }
 0x4c9   : > { %2971 = vrot.lane.b32.xlu1 %v7274_v20, %s4749_s27  ;;  %4603 = vmatprep.mubr.msk.f32.mxu1 %vm1952_vm11, %v3893_v53  ;;  %v3862_v59 = vsel %vm1879_vm9, %v3830_v35, %v3458_v24  ;;  %v8207_v24 = vld [vmem:[#allocation70_spill] sm:$0xff] }
 0x4ca   : > { %3351 = vrot.lane.b32.xlu0 %v2561_v27, %s4752_s30  ;;  %v8208_v27 = vld [vmem:[#allocation20_spill] sm:$0xff] }
 0x4cb   : > { %v3204_v62 = vpop.permute.xlu1 %3203  ;;  %v3673_v56 = vsel %vm257_vm0, %v8208_v27, %v8207_v24 }
 0x4cc   : > { %v3078_v1 = vpop.permute.xlu0 %3077  ;;  %v3799_v18 = vsel %vm1813_vm7, %v3767_v12, %v3204_v62  ;;  %v3705_v9 = vsel %vm1714_vm4, %v3673_v56, %v8209_v58  ;;  %v8220_v56 = vld [vmem:[#allocation101_spill] sm:$0xff] }
 0x4cd   : > { %3479 = vrot.lane.b32.xlu1 %v2593_v40, %s4753_s14  ;;  %v3768_v0 = vsel %vm1780_vm6, %v3736_v10, %v3078_v1  ;;  %v3737_v62 = vsel %vm1747_vm5, %v3705_v9, %v8210_v6 }
 0x4ce   : > { %3353 = vrot.lane.b32.xlu0 %v2562_v43, %s4752_s30 }
 0x4cf   : > { %v3206_v17 = vpop.permute.xlu1 %3205 }
 0x4d0   : > { %v3586_v38 = vpop.permute.xlu0 %3585  ;;  %v3800_v50 = vsel %vm1813_vm7, %v3768_v0, %v3206_v17 }
 0x4d1   : > { %v3894_v7 = vsel %vm1912_vm10, %v3862_v59, %v3586_v38  ;;  %3099 = vrot.lane.b32.xlu1 %v2593_v40, %s4750_s28 }
 0x4d2   : > { %2973 = vrot.lane.b32.xlu0 %v2562_v43, %s4749_s27  ;;  %4604 = vmatmul.mubr.msk.f32.gmra.mrb[10].mxu1 %vm1952_vm11, %v3894_v7 }
 0x4d3   : > { %v3334_v57 = vpop.permute.xlu1 %3333 }
 0x4d4   : > { %v3332_v19 = vpop.permute.xlu0 %3331  ;;  %v3832_v32 = vsel %vm1846_vm8, %v3800_v50, %v3334_v57  ;;  %v8211_v57 = vld [vmem:[#allocation11_spill] sm:$0xff] }
 0x4d5   : > { %3607 = vrot.lane.b32.xlu1 %v2625_v41, %s4754_s17  ;;  %v3831_v21 = vsel %vm1846_vm8, %v3799_v18, %v3332_v19  ;;  %v8212_v19 = vld [vmem:[#allocation71_spill] sm:$0xff] }
 0x4d6   : > { %3481 = vrot.lane.b32.xlu0 %v2594_v44, %s4753_s14 }
 0x4d7   : > { %v3080_v34 = vpop.permute.xlu1 %3079 }
 0x4d8   : > { %v3460_v51 = vpop.permute.xlu0 %3459  ;;  %v3769_v1 = vsel %vm1780_vm6, %v3737_v62, %v3080_v34 }
 0x4d9   : > { %3227 = vrot.lane.b32.xlu1 %v2625_v41, %s4751_s29  ;;  %v3863_v22 = vsel %vm1879_vm9, %v3831_v21, %v3460_v51  ;;  %v3674_v41 = vsel %vm257_vm0, %v8212_v19, %v8211_v57  ;;  %v8222_v19 = vld [vmem:[#allocation27_spill] sm:$0xff] }
 0x4da   : > { %3101 = vrot.lane.b32.xlu0 %v2594_v44, %s4750_s28  ;;  %v3706_v16 = vsel %vm1714_vm4, %v3674_v41, %v8213_v46  ;;  %v8214_v44 = vld [vmem:[#allocation80_spill] sm:$0xff]  ;;  %v8223_v46 = vld [vmem:[#allocation62_spill] sm:$0xff] }
 0x4db   : > { %v3588_v42 = vpop.permute.xlu1 %3587  ;;  %v3738_v47 = vsel %vm1747_vm5, %v3706_v16, %v8214_v44 }
 0x4dc   : > { %v3895_v36 = vsel %vm1912_vm10, %v3863_v22, %v3588_v42  ;;  %v3462_v54 = vpop.permute.xlu0 %3461  ;;  %v2471_v22 = vld [vmem:[#allocation2 + $0x168] sm:$0xff] }
 0x4dd   : > { %3229 = vrot.lane.b32.xlu1 %v2532_v11, %s4751_s29  ;;  %4606 = vmatprep.mubr.msk.f32.mxu1 %vm1952_vm11, %v3895_v36  ;;  %v3864_v52 = vsel %vm1879_vm9, %v3832_v32, %v3462_v54 }
 0x4de   : > { %3609 = vrot.lane.b32.xlu0 %v2532_v11, %s4754_s17  ;;  %v2597_v11 = vld [vmem:[#allocation2 + $0x169] sm:$0xff] }
 0x4df   : > { %v3208_v15 = vpop.permute.xlu1 %3207 }
 0x4e0   : > { %v3082_v13 = vpop.permute.xlu0 %3081  ;;  %v3801_v43 = vsel %vm1813_vm7, %v3769_v1, %v3208_v15  ;;  %v8217_v15 = vld [vmem:[#allocation21_spill] sm:$0xff] }
 0x4e1   : > { %2975 = vrot.lane.b32.xlu1 %v2469_v4, %s4749_s27  ;;  %v3770_v28 = vsel %vm1780_vm6, %v3738_v47, %v3082_v13  ;;  %v3739_v31 = vsel %vm1747_vm5, %v3707_v55, %v8217_v15  ;;  %v2631_v55 = vld [vmem:[#allocation2 + $0x182] sm:$0xff] }
 0x4e2   : > { %3355 = vrot.lane.b32.xlu0 %v2469_v4, %s4752_s30 }
 0x4e3   : > { %v3210_v39 = vpop.permute.xlu1 %3209 }
 0x4e4   : > { %v3590_v14 = vpop.permute.xlu0 %3589  ;;  %v3802_v34 = vsel %vm1813_vm7, %v3770_v28, %v3210_v39  ;;  %v2568_v28 = vld [vmem:[#allocation2 + $0x188] sm:$0xff] }
 0x4e5   : > { %v3896_v63 = vsel %vm1912_vm10, %v3864_v52, %v3590_v14  ;;  %3483 = vrot.lane.b32.xlu1 %v2595_v3, %s4753_s14  ;;  %v2629_v14 = vld [vmem:[#allocation2 + $0x16a] sm:$0xff] }
 0x4e6   : > { %3357 = vrot.lane.b32.xlu0 %v2564_v2, %s4752_s30  ;;  %4607 = vmatmul.mubr.msk.f32.gmra.mrb[12].mxu1 %vm1952_vm11, %v3896_v63  ;;  %v4699_v63 = vld [vmem:[#allocation2 + $0xc8] sm:$0xff] }
 0x4e7   : > { %v3338_v5 = vpop.permute.xlu1 %3337 }
 0x4e8   : > { %v3336_v53 = vpop.permute.xlu0 %3335  ;;  %v3834_v12 = vsel %vm1846_vm8, %v3802_v34, %v3338_v5 }
 0x4e9   : > { %3103 = vrot.lane.b32.xlu1 %v2595_v3, %s4750_s28  ;;  %v3833_v35 = vsel %vm1846_vm8, %v3801_v43, %v3336_v53  ;;  %v2598_v3 = vld [vmem:[#allocation2 + $0x171] sm:$0xff]  ;;  %v8219_v53 = vld [vmem:[#allocation61_spill] sm:$0xff] }
 0x4ea   : > { %2977 = vrot.lane.b32.xlu0 %v2564_v2, %s4749_s27  ;;  %v8218_v2 = vld [vmem:[#allocation67_spill] sm:$0xff] }
 0x4eb   : > { %v3084_v8 = vpop.permute.xlu1 %3083  ;;  %v3676_v5 = vsel %vm257_vm0, %v4699_v63, %v8218_v2  ;;  %v2536_v43 = vld [vmem:[#allocation2 + $0x172] sm:$0xff] }
 0x4ec   : > { %v3464_v40 = vpop.permute.xlu0 %3463  ;;  %v3771_v13 = vsel %vm1780_vm6, %v3739_v31, %v3084_v8  ;;  %v3708_v24 = vsel %vm1714_vm4, %v3676_v5, %v8219_v53  ;;  %v2600_v31 = vld [vmem:[#allocation2 + $0x189] sm:$0xff]  ;;  %v2569_v63 = vld [vmem:[#allocation2 + $0x198] sm:$0xff] }
 0x4ed   : > { %3611 = vrot.lane.b32.xlu1 %v2627_v45, %s4754_s17  ;;  %v3865_v17 = vsel %vm1879_vm9, %v3833_v35, %v3464_v40  ;;  %v3740_v58 = vsel %vm1747_vm5, %v3708_v24, %v8220_v56  ;;  %v4702_v5 = vld [vmem:[#allocation2 + $0xf0] sm:$0xff] }
 0x4ee   : > { %3485 = vrot.lane.b32.xlu0 %v2596_v60, %s4753_s14  ;;  %v8227_v53 = vld [vmem:[#allocation19_spill] sm:$0xff] }
 0x4ef   : > { %v3592_v59 = vpop.permute.xlu1 %3591  ;;  %v3679_v24 = vsel %vm257_vm0, %v4702_v5, %v8227_v53 }
 0x4f0   : > { %v3897_v38 = vsel %vm1912_vm10, %v3865_v17, %v3592_v59  ;;  %v3466_v7 = vpop.permute.xlu0 %3465  ;;  %v2473_v59 = vld [vmem:[#allocation2 + $0x180] sm:$0xff] }
 0x4f1   : > { %3231 = vrot.lane.b32.xlu1 %v2627_v45, %s4751_s29  ;;  %4609 = vmatprep.mubr.msk.f32.mxu1 %vm1952_vm11, %v3897_v38  ;;  %v3866_v18 = vsel %vm1879_vm9, %v3834_v12, %v3466_v7  ;;  %v4700_v38 = vld [vmem:[#allocation2 + $0xd8] sm:$0xff] }
 0x4f2   : > { %3105 = vrot.lane.b32.xlu0 %v2596_v60, %s4750_s28  ;;  %v8221_v7 = vld [vmem:[#allocation16_spill] sm:$0xff] }
 0x4f3   : > { %v3212_v30 = vpop.permute.xlu1 %3211  ;;  %v3677_v57 = vsel %vm257_vm0, %v4700_v38, %v8221_v7 }
 0x4f4   : > { %v3086_v25 = vpop.permute.xlu0 %3085  ;;  %v3803_v0 = vsel %vm1813_vm7, %v3771_v13, %v3212_v30  ;;  %v3709_v41 = vsel %vm1714_vm4, %v3677_v57, %v8222_v19  ;;  %v4703_v57 = vld [vmem:[#allocation2 + $0xf8] sm:$0xff] }
 0x4f5   : > { %3233 = vrot.lane.b32.xlu1 %v2534_v48, %s4751_s29  ;;  %v3772_v6 = vsel %vm1780_vm6, %v3740_v58, %v3086_v25  ;;  %v3741_v16 = vsel %vm1747_vm5, %v3709_v41, %v8223_v46  ;;  %v2599_v25 = vld [vmem:[#allocation2 + $0x181] sm:$0xff]  ;;  %v8230_v19 = vld [vmem:[#allocation72_spill] sm:$0xff] }
 0x4f6   : > { %3613 = vrot.lane.b32.xlu0 %v2534_v48, %s4754_s17  ;;  %v2602_v58 = vld [vmem:[#allocation2 + $0x1a1] sm:$0xff]  ;;  %v3680_v41 = vsel %vm257_vm0, %v4703_v57, %v8230_v19  ;;  %v8231_v46 = vld [vmem:[#allocation32_spill] sm:$0xff] }
 0x4f7   : > { %v3214_v51 = vpop.permute.xlu1 %3213 }
 0x4f8   : > { %v3594_v21 = vpop.permute.xlu0 %3593  ;;  %v3804_v62 = vsel %vm1813_vm7, %v3772_v6, %v3214_v51 }
 0x4f9   : > { %v3898_v42 = vsel %vm1912_vm10, %v3866_v18, %v3594_v21  ;;  %2979 = vrot.lane.b32.xlu1 %v2471_v22, %s4749_s27 }
 0x4fa   : > { %3359 = vrot.lane.b32.xlu0 %v2471_v22, %s4752_s30  ;;  %4610 = vmatmul.mubr.msk.f32.gmra.mrb[14].mxu1 %vm1952_vm11, %v3898_v42  ;;  %v4701_v22 = vld [vmem:[#allocation2 + $0xe0] sm:$0xff] }
 0x4fb   : > { %v3342_v36 = vpop.permute.xlu1 %3341  ;;  %v8224_v42 = vld [vmem:[#allocation17_spill] sm:$0xff] }
 0x4fc   : > { %v3340_v54 = vpop.permute.xlu0 %3339  ;;  %v3836_v8 = vsel %vm1846_vm8, %v3804_v62, %v3342_v36  ;;  %v3678_v36 = vsel %vm257_vm0, %v4701_v22, %v8224_v42 }
 0x4fd   : > { %3487 = vrot.lane.b32.xlu1 %v2597_v11, %s4753_s14  ;;  %v3835_v23 = vsel %vm1846_vm8, %v3803_v0, %v3340_v54  ;;  %v8225_v54 = vld [vmem:[#allocation130_spill] sm:$0xff] }
 0x4fe   : > { %3361 = vrot.lane.b32.xlu0 %v2566_v49, %s4752_s30 }
 0x4ff   : > { %v3088_v10 = vpop.permute.xlu1 %3087 }
 0x500   : > { %v3468_v4 = vpop.permute.xlu0 %3467  ;;  %v3773_v44 = vsel %vm1780_vm6, %v3741_v16, %v3088_v10  ;;  %v3712_v16 = vsel %vm1714_vm4, %v3680_v41, %v8231_v46 }
 0x501   : > { %3107 = vrot.lane.b32.xlu1 %v2597_v11, %s4750_s28  ;;  %v3867_v50 = vsel %vm1879_vm9, %v3835_v23, %v3468_v4  ;;  %v3710_v11 = vsel %vm1714_vm4, %v3678_v36, %v8225_v54  ;;  %v7476_v54 = vld [vmem:[%s7734_s4] ss:$0 sm:$0xff] }
 0x502   : > { %2981 = vrot.lane.b32.xlu0 %v2566_v49, %s4749_s27  ;;  %v3742_v49 = vsel %vm1747_vm5, %v3710_v11, %v8226_v37  ;;  %v8233_v37 = vld [vmem:[#allocation74_spill] sm:$0xff] }
 0x503   : > { %v3596_v32 = vpop.permute.xlu1 %3595 }
 0x504   : > { %v3899_v39 = vsel %vm1912_vm10, %v3867_v50, %v3596_v32  ;;  %v3470_v52 = vpop.permute.xlu0 %3469 }
 0x505   : > { %3615 = vrot.lane.b32.xlu1 %v2629_v14, %s4754_s17  ;;  %4612 = vmatprep.mubr.msk.f32.mxu1 %vm1952_vm11, %v3899_v39  ;;  %v3868_v40 = vsel %vm1879_vm9, %v3836_v8, %v3470_v52  ;;  %v2538_v52 = vld [vmem:[#allocation2 + $0x18a] sm:$0xff]  ;;  %v2601_v8 = vld [vmem:[#allocation2 + $0x199] sm:$0xff] }
 0x506   : > { %3489 = vrot.lane.b32.xlu0 %v2598_v3, %s4753_s14 }
 0x507   : > { %v3216_v27 = vpop.permute.xlu1 %3215 }
 0x508   : > { %v3090_v9 = vpop.permute.xlu0 %3089  ;;  %v3805_v48 = vsel %vm1813_vm7, %v3773_v44, %v3216_v27  ;;  %v8228_v27 = vld [vmem:[#allocation75_spill] sm:$0xff]  ;;  %v8232_v44 = vld [vmem:[#allocation113_spill] sm:$0xff] }
 0x509   : > { %3235 = vrot.lane.b32.xlu1 %v2629_v14, %s4751_s29  ;;  %v3774_v15 = vsel %vm1780_vm6, %v3742_v49, %v3090_v9  ;;  %v2570_v14 = vld [vmem:[#allocation2 + $0x1a0] sm:$0xff]  ;;  %v3711_v56 = vsel %vm1714_vm4, %v3679_v24, %v8228_v27  ;;  %v8229_v9 = vld [vmem:[#allocation131_spill] sm:$0xff] }
 0x50a   : > { %3109 = vrot.lane.b32.xlu0 %v2598_v3, %s4750_s28  ;;  %v3743_v6 = vsel %vm1747_vm5, %v3711_v56, %v8229_v9  ;;  %v4707_v27 = vld [vmem:[#allocation2 + $0x110] sm:$0xff]  ;;  %v8235_v56 = vld [vmem:[#allocation24_spill] sm:$0xff]  ;;  %v8236_v9 = vld [vmem:[#allocation78_spill] sm:$0xff] }
 0x50b   : > { %v3218_v1 = vpop.permute.xlu1 %3217 }
 0x50c   : > { %v3598_v45 = vpop.permute.xlu0 %3597  ;;  %v3806_v10 = vsel %vm1813_vm7, %v3774_v15, %v3218_v1 }
 0x50d   : > { %v3900_v60 = vsel %vm1912_vm10, %v3868_v40, %v3598_v45  ;;  %3237 = vrot.lane.b32.xlu1 %v2536_v43, %s4751_s29 }
 0x50e   : > { %3617 = vrot.lane.b32.xlu0 %v2536_v43, %s4754_s17  ;;  %4613 = vmatmul.mubr.msk.f32.gmra.mrb[16].mxu1 %vm1952_vm11, %v3900_v60  ;;  %v2634_v60 = vld [vmem:[#allocation2 + $0x1a2] sm:$0xff] }
 0x50f   : > { %v3346_v35 = vpop.permute.xlu1 %3345 }
 0x510   : > { %v3344_v17 = vpop.permute.xlu0 %3343  ;;  %v3838_v13 = vsel %vm1846_vm8, %v3806_v10, %v3346_v35 }
 0x511   : > { %2983 = vrot.lane.b32.xlu1 %v2473_v59, %s4749_s27  ;;  %v3837_v34 = vsel %vm1846_vm8, %v3805_v48, %v3344_v17 }
 0x512   : > { %3363 = vrot.lane.b32.xlu0 %v2473_v59, %s4752_s30  ;;  %v2633_v59 = vld [vmem:[#allocation2 + $0x19a] sm:$0xff] }
 0x513   : > { %v3092_v30 = vpop.permute.xlu1 %3091 }
 0x514   : > { %v3472_v47 = vpop.permute.xlu0 %3471  ;;  %v3775_v1 = vsel %vm1780_vm6, %v3743_v6, %v3092_v30 }
 0x515   : > { %3491 = vrot.lane.b32.xlu1 %v2599_v25, %s4753_s14  ;;  %v3869_v12 = vsel %vm1879_vm9, %v3837_v34, %v3472_v47  ;;  %v3744_v47 = vsel %vm1747_vm5, %v3712_v16, %v8232_v44 }
 0x516   : > { %3365 = vrot.lane.b32.xlu0 %v2568_v28, %s4752_s30 }
 0x517   : > { %v3600_v51 = vpop.permute.xlu1 %3599 }
 0x518   : > { %v3901_v18 = vsel %vm1912_vm10, %v3869_v12, %v3600_v51  ;;  %v3474_v21 = vpop.permute.xlu0 %3473 }
 0x519   : > { %3111 = vrot.lane.b32.xlu1 %v2599_v25, %s4750_s28  ;;  %4615 = vmatprep.mubr.msk.f32.mxu1 %vm1952_vm11, %v3901_v18  ;;  %v3870_v0 = vsel %vm1879_vm9, %v3838_v13, %v3474_v21 }
 0x51a   : > { %2985 = vrot.lane.b32.xlu0 %v2568_v28, %s4749_s27 }
 0x51b   : > { %v3220_v61 = vpop.permute.xlu1 %3219 }
 0x51c   : > { %v3094_v33 = vpop.permute.xlu0 %3093  ;;  %v3807_v45 = vsel %vm1813_vm7, %v3775_v1, %v3220_v61  ;;  %v4704_v61 = vld [vmem:[#allocation2 + $0x108] sm:$0xff] }
 0x51d   : > { %3619 = vrot.lane.b32.xlu1 %v2631_v55, %s4754_s17  ;;  %v3776_v48 = vsel %vm1780_vm6, %v3744_v47, %v3094_v33  ;;  %v3681_v49 = vsel %vm257_vm0, %v4704_v61, %v8233_v37 }
 0x51e   : > { %3493 = vrot.lane.b32.xlu0 %v2600_v31, %s4753_s14 }
 0x51f   : > { %v3222_v4 = vpop.permute.xlu1 %3221 }
 0x520   : > { %v3602_v23 = vpop.permute.xlu0 %3601  ;;  %v3808_v28 = vsel %vm1813_vm7, %v3776_v48, %v3222_v4 }
 0x521   : > { %v3902_v50 = vsel %vm1912_vm10, %v3870_v0, %v3602_v23  ;;  %3239 = vrot.lane.b32.xlu1 %v2631_v55, %s4751_s29  ;;  %v8234_v55 = vld [vmem:[#allocation96_spill] sm:$0xff] }
 0x522   : > { %3113 = vrot.lane.b32.xlu0 %v2600_v31, %s4750_s28  ;;  %4616 = vmatmul.mubr.msk.f32.gmra.mrb[18].mxu1 %vm1952_vm11, %v3902_v50  ;;  %v3713_v15 = vsel %vm1714_vm4, %v3681_v49, %v8234_v55  ;;  %v4705_v50 = vld [vmem:[%s4847_s24 + $0x8] sm:$0xff]  ;;  %v8239_v55 = vld [vmem:[#allocation93_spill] sm:$0xff] }
 0x523   : > { %v2968_v32 = vpop.permute.xlu1 %2967 }
 0x524   : > { %v3348_v39 = vpop.permute.xlu0 %3347  ;;  %v3745_v13 = vsel %vm1747_vm5, %v3713_v15, %v2968_v32  ;;  %v8240_v15 = vld [vmem:[#allocation99_spill] sm:$0xff] }
 0x525   : > { %3241 = vrot.lane.b32.xlu1 %v2538_v52, %s4751_s29  ;;  %v3839_v43 = vsel %vm1846_vm8, %v3807_v45, %v3348_v39 }
 0x526   : > { %3621 = vrot.lane.b32.xlu0 %v2538_v52, %s4754_s17 }
 0x527   : > { %v3476_v3 = vpop.permute.xlu1 %3475 }
 0x528   : > { %v3350_v2 = vpop.permute.xlu0 %3349  ;;  %v3871_v35 = vsel %vm1879_vm9, %v3839_v43, %v3476_v3  ;;  %v4706_v3 = vld [vmem:[%s4847_s24] sm:$0xff] }
 0x529   : > { %3369 = vrot.lane.b32.xlu1 %v2570_v14, %s4752_s30  ;;  %v3840_v34 = vsel %vm1846_vm8, %v3808_v28, %v3350_v2  ;;  %v4709_v28 = vld [vmem:[%s4847_s24 + $0x10] sm:$0xff] }
 0x52a   : > { %3367 = vrot.lane.b32.xlu0 %v2569_v63, %s4752_s30 }
 0x52b   : > { %v3096_v62 = vpop.permute.xlu1 %3095 }
 0x52c   : > { %v7450_v40 = vpop.permute.xlu0 %2969  ;;  %v3777_v23 = vsel %vm1780_vm6, %v3745_v13, %v3096_v62 }
 0x52d   : > { %3497 = vrot.lane.b32.xlu1 %v2602_v58, %s4753_s14  ;;  %v3682_v58 = vsel %vm257_vm0, %v4707_v27, %v8235_v56  ;;  %v4711_v56 = vld [vmem:[%s4847_s24 + $0x20] sm:$0xff] }
 0x52e   : > { %3495 = vrot.lane.b32.xlu0 %v2601_v8, %s4753_s14  ;;  %v3714_v6 = vsel %vm1714_vm4, %v3682_v58, %v8236_v9 }
 0x52f   : > { %v3604_v17 = vpop.permute.xlu1 %3603  ;;  %v3746_v8 = vsel %vm1747_vm5, %v3714_v6, %v7450_v40 }
 0x530   : > { %v3903_v38 = vsel %vm1912_vm10, %v3871_v35, %v3604_v17  ;;  %v3478_v7 = vpop.permute.xlu0 %3477 }
 0x531   : > { %3625 = vrot.lane.b32.xlu1 %v2634_v60, %s4754_s17  ;;  %4618 = vmatprep.mubr.msk.f32.mxu1 %vm1952_vm11, %v3903_v38  ;;  %v3872_v51 = vsel %vm1879_vm9, %v3840_v34, %v3478_v7 }
 0x532   : > { %3623 = vrot.lane.b32.xlu0 %v2633_v59, %s4754_s17 }
 0x533   : > { %v3224_v30 = vpop.permute.xlu1 %3223 }
 0x534   : > { %v3098_v25 = vpop.permute.xlu0 %3097  ;;  %v3809_v14 = vsel %vm1813_vm7, %v3777_v23, %v3224_v30  ;;  %v4708_v30 = vld [vmem:[%s4847_s24 + $0x18] sm:$0xff] }
 0x535   : > { %v3778_v45 = vsel %vm1780_vm6, %v3746_v8, %v3098_v25  ;;  %v8237_v25 = vld [vmem:[#allocation95_spill] sm:$0xff] }
 0x536   : > { %v3683_v48 = vsel %vm257_vm0, %v7224_v26, %v8237_v25 }
 0x537   : > { %v3226_v12 = vpop.permute.xlu1 %3225 }
 0x538   : > { %v3606_v18 = vpop.permute.xlu0 %3605  ;;  %v3810_v43 = vsel %vm1813_vm7, %v3778_v45, %v3226_v12  ;;  %v8238_v12 = vld [vmem:[#allocation15_spill] sm:$0xff] }
 0x539   : > { %v3904_v21 = vsel %vm1912_vm10, %v3872_v51, %v3606_v18  ;;  %v3715_v51 = vsel %vm1714_vm4, %v3683_v48, %v8238_v12 }
 0x53a   : > { %4619 = vmatmul.mubr.msk.f32.gmra.mrb[20].mxu1 %vm1952_vm11, %v3904_v21 }
 0x53b   : > { %v2972_v22 = vpop.permute.xlu1 %2971 }
 0x53c   : > { %v3352_v42 = vpop.permute.xlu0 %3351  ;;  %v3747_v18 = vsel %vm1747_vm5, %v3715_v51, %v2972_v22  ;;  %v3684_v22 = vsel %vm257_vm0, %v7235_v29, %v8239_v55 }
 0x53d   : > { %v3841_v63 = vsel %vm1846_vm8, %v3809_v14, %v3352_v42 }
 0x53f   : > { %v3480_v36 = vpop.permute.xlu1 %3479 }
 0x540   : > { %v3354_v11 = vpop.permute.xlu0 %3353  ;;  %v3873_v2 = vsel %vm1879_vm9, %v3841_v63, %v3480_v36 }
 0x541   : > { %v4590_v33 = vpop.f32.mrb[0].mxu1  ;;  %v3842_v60 = vsel %vm1846_vm8, %v3810_v43, %v3354_v11 }
 0x542   : > { %v4093_v31 = vadd.f32 %v4590_v33, %v7476_v54  ;;  %v4087_v10 = vpop.f32.mrb[1].mxu1 }
 0x543   : > { %v4088_v4 = vadd.f32 %v7476_v54, %v4087_v10  ;;  %v3100_v0 = vpop.permute.xlu1 %3099 }
 0x544   : > { %v4247_v39 = vadd.f32 %v4705_v50, %v4093_v31  ;;  %v2974_v52 = vpop.permute.xlu0 %2973  ;;  %v3779_v42 = vsel %vm1780_vm6, %v3747_v18, %v3100_v0  ;;  %v3716_v31 = vsel %vm1714_vm4, %v3684_v22, %v8240_v15 }
 0x545   : > { %v4246_v32 = vadd.f32 %v4706_v3, %v4088_v4  ;;  %v3748_v13 = vsel %vm1747_vm5, %v3716_v31, %v2974_v52  ;;  %v2375_v31 = vld [vmem:[#allocation2 + $0x150] sm:$0xff] }
 0x546   : > { %4279 = vst.msk [vmem:[%s7489_s13 + $0x8] sm:$0xff] %vm257_vm0, %v4247_v39 }
 0x547   : > { %4278 = vst.msk [vmem:[%s7489_s13] sm:$0xff] %vm257_vm0, %v4246_v32  ;;  %v3608_v5 = vpop.permute.xlu1 %3607 }
 0x548   : > { %v3905_v53 = vsel %vm1912_vm10, %v3873_v2, %v3608_v5  ;;  %v3482_v24 = vpop.permute.xlu0 %3481 }
 0x549   : > { %4621 = vmatprep.mubr.msk.f32.mxu1 %vm1952_vm11, %v3905_v53  ;;  %v3874_v17 = vsel %vm1879_vm9, %v3842_v60, %v3482_v24  ;;  %v4710_v53 = vld [vmem:[%s4847_s24 + $0x28] sm:$0xff] }
 0x54b   : > { %v3228_v62 = vpop.permute.xlu1 %3227 }
 0x54c   : > { %v3102_v1 = vpop.permute.xlu0 %3101  ;;  %v3811_v11 = vsel %vm1813_vm7, %v3779_v42, %v3228_v62  ;;  %v8241_v62 = vld [vmem:[#allocation53_spill] sm:$0xff] }
 0x54d   : > { %v3780_v0 = vsel %vm1780_vm6, %v3748_v13, %v3102_v1  ;;  %v3685_v8 = vsel %vm257_vm0, %v7274_v20, %v8241_v62  ;;  %v8242_v1 = vld [vmem:[#allocation58_spill] sm:$0xff]  ;;  %v2374_v20 = vld [vmem:[#allocation2 + $0x140] sm:$0xff]  ;;  %v8245_v13 = vld [vmem:[#allocation128_spill] sm:$0xff] }
 0x54e   : > { %v3717_v45 = vsel %vm1714_vm4, %v3685_v8, %v8242_v1 }
 0x54f   : > { %v3230_v35 = vpop.permute.xlu1 %3229 }
 0x550   : > { %v3610_v59 = vpop.permute.xlu0 %3609  ;;  %v3812_v23 = vsel %vm1813_vm7, %v3780_v0, %v3230_v35  ;;  %v8246_v0 = vld [vmem:[#allocation129_spill] sm:$0xff] }
 0x551   : > { %v3906_v38 = vsel %vm1912_vm10, %v3874_v17, %v3610_v59 }
 0x552   : > { %4622 = vmatmul.mubr.msk.f32.gmra.mrb[22].mxu1 %vm1952_vm11, %v3906_v38 }
 0x553   : > { %v2976_v7 = vpop.permute.xlu1 %2975 }
 0x554   : > { %v3356_v40 = vpop.permute.xlu0 %3355  ;;  %v3749_v43 = vsel %vm1747_vm5, %v3717_v45, %v2976_v7 }
 0x555   : > { %v4593_v57 = vpop.f32.mrb[2].mxu1  ;;  %v3843_v61 = vsel %vm1846_vm8, %v3811_v11, %v3356_v40 }
 0x556   : > { %v4103_v19 = vadd.f32 %v4593_v57, %v7476_v54  ;;  %v4097_v41 = vpop.f32.mrb[3].mxu1 }
 0x557   : > { %v4098_v46 = vadd.f32 %v7476_v54, %v4097_v41  ;;  %v3484_v16 = vpop.permute.xlu1 %3483 }
 0x558   : > { %v4249_v44 = vadd.f32 %v4708_v30, %v4103_v19  ;;  %v3358_v47 = vpop.permute.xlu0 %3357  ;;  %v3875_v26 = vsel %vm1879_vm9, %v3843_v61, %v3484_v16  ;;  %v8244_v16 = vld [vmem:[#allocation22_spill] sm:$0xff]  ;;  %v4712_v61 = vld [vmem:[%s4847_s24 + $0x38] sm:$0xff] }
 0x559   : > { %v4248_v34 = vadd.f32 %v4709_v28, %v4098_v46  ;;  %v3844_v50 = vsel %vm1846_vm8, %v3812_v23, %v3358_v47  ;;  %v8243_v46 = vld [vmem:[#allocation6_spill] sm:$0xff] }
 0x55a   : > { %4281 = vst.msk [vmem:[%s7489_s13 + $0x18] sm:$0xff] %vm257_vm0, %v4249_v44  ;;  %v3686_v7 = vsel %vm257_vm0, %v2374_v20, %v8243_v46 }
 0x55b   : > { %4280 = vst.msk [vmem:[%s7489_s13 + $0x10] sm:$0xff] %vm257_vm0, %v4248_v34  ;;  %v3104_v21 = vpop.permute.xlu1 %3103  ;;  %v3718_v30 = vsel %vm1714_vm4, %v3686_v7, %v8244_v16 }
 0x55c   : > { %v2978_v36 = vpop.permute.xlu0 %2977  ;;  %v3781_v35 = vsel %vm1780_vm6, %v3749_v43, %v3104_v21  ;;  %v4714_v43 = vld [vmem:[%s4847_s24 + $0x48] sm:$0xff] }
 0x55d   : > { %v3750_v47 = vsel %vm1747_vm5, %v3718_v30, %v2978_v36  ;;  %v2377_v30 = vld [vmem:[#allocation2 + $0x168] sm:$0xff] }
 0x55f   : > { %v3612_v37 = vpop.permute.xlu1 %3611 }
 0x560   : > { %v3907_v49 = vsel %vm1912_vm10, %v3875_v26, %v3612_v37  ;;  %v3486_v33 = vpop.permute.xlu0 %3485  ;;  %v4713_v37 = vld [vmem:[%s4847_s24 + $0x30] sm:$0xff] }
 0x561   : > { %4624 = vmatprep.mubr.msk.f32.mxu1 %vm1952_vm11, %v3907_v49  ;;  %v3876_v29 = vsel %vm1879_vm9, %v3844_v50, %v3486_v33 }
 0x563   : > { %v3232_v10 = vpop.permute.xlu1 %3231 }
 0x564   : > { %v3106_v4 = vpop.permute.xlu0 %3105  ;;  %v3813_v59 = vsel %vm1813_vm7, %v3781_v35, %v3232_v10 }
 0x565   : > { %v3782_v48 = vsel %vm1780_vm6, %v3750_v47, %v3106_v4  ;;  %v3687_v4 = vsel %vm257_vm0, %v2375_v31, %v8245_v13  ;;  %v8249_v47 = vld [vmem:[#allocation28_spill] sm:$0xff] }
 0x566   : > { %v3719_v23 = vsel %vm1714_vm4, %v3687_v4, %v8246_v0 }
 0x567   : > { %v3234_v39 = vpop.permute.xlu1 %3233 }
 0x568   : > { %v3614_v14 = vpop.permute.xlu0 %3613  ;;  %v3814_v34 = vsel %vm1813_vm7, %v3782_v48, %v3234_v39  ;;  %v8250_v48 = vld [vmem:[#allocation23_spill] sm:$0xff] }
 0x569   : > { %v3908_v3 = vsel %vm1912_vm10, %v3876_v29, %v3614_v14  ;;  %v4596_v32 = vpop.f32.mrb[4].mxu1 }
 0x56a   : > { %v4113_v63 = vadd.f32 %v4596_v32, %v7476_v54  ;;  %v4107_v52 = vpop.f32.mrb[5].mxu1  ;;  %4625 = vmatmul.mubr.msk.f32.gmra.mrb[24].mxu1 %vm1952_vm11, %v3908_v3 }
 0x56b   : > { %v4108_v2 = vadd.f32 %v7476_v54, %v4107_v52  ;;  %v2980_v5 = vpop.permute.xlu1 %2979 }
 0x56c   : > { %v4251_v24 = vadd.f32 %v4710_v53, %v4113_v63  ;;  %v3360_v27 = vpop.permute.xlu0 %3359  ;;  %v3751_v50 = vsel %vm1747_vm5, %v3719_v23, %v2980_v5  ;;  %v8247_v5 = vld [vmem:[#allocation126_spill] sm:$0xff] }
 0x56d   : > { %v4250_v58 = vadd.f32 %v4711_v56, %v4108_v2  ;;  %v3845_v38 = vsel %vm1846_vm8, %v3813_v59, %v3360_v27 }
 0x56e   : > { %4283 = vst.msk [vmem:[%s7489_s13 + $0x28] sm:$0xff] %vm257_vm0, %v4251_v24  ;;  %v2376_v24 = vld [vmem:[#allocation2 + $0x158] sm:$0xff] }
 0x56f   : > { %4282 = vst.msk [vmem:[%s7489_s13 + $0x20] sm:$0xff] %vm257_vm0, %v4250_v58  ;;  %v3488_v9 = vpop.permute.xlu1 %3487  ;;  %v3688_v56 = vsel %vm257_vm0, %v2376_v24, %v8247_v5  ;;  %v4718_v24 = vld [vmem:[%s4847_s24 + $0x68] sm:$0xff]  ;;  %v4719_v5 = vld [vmem:[%s4847_s24 + $0x60] sm:$0xff] }
 0x570   : > { %v3362_v6 = vpop.permute.xlu0 %3361  ;;  %v3877_v40 = vsel %vm1879_vm9, %v3845_v38, %v3488_v9  ;;  %v4715_v38 = vld [vmem:[%s4847_s24 + $0x40] sm:$0xff] }
 0x571   : > { %v3846_v18 = vsel %vm1846_vm8, %v3814_v34, %v3362_v6  ;;  %v8248_v6 = vld [vmem:[#allocation65_spill] sm:$0xff]  ;;  %v8251_v34 = vld [vmem:[#allocation31_spill] sm:$0xff] }
 0x572   : > { %v3720_v62 = vsel %vm1714_vm4, %v3688_v56, %v8248_v6 }
 0x573   : > { %v3108_v60 = vpop.permute.xlu1 %3107 }
 0x574   : > { %v2982_v17 = vpop.permute.xlu0 %2981  ;;  %v3783_v29 = vsel %vm1780_vm6, %v3751_v50, %v3108_v60 }
 0x575   : > { %v3752_v45 = vsel %vm1747_vm5, %v3720_v62, %v2982_v17 }
 0x577   : > { %v3616_v57 = vpop.permute.xlu1 %3615 }
 0x578   : > { %v3909_v19 = vsel %vm1912_vm10, %v3877_v40, %v3616_v57  ;;  %v3490_v41 = vpop.permute.xlu0 %3489 }
 0x579   : > { %4627 = vmatprep.mubr.msk.f32.mxu1 %vm1952_vm11, %v3909_v19  ;;  %v3878_v11 = vsel %vm1879_vm9, %v3846_v18, %v3490_v41  ;;  %v8252_v18 = vld [vmem:[#allocation132_spill] sm:$0xff] }
 0x57b   : > { %v3236_v44 = vpop.permute.xlu1 %3235 }
 0x57c   : > { %v3110_v25 = vpop.permute.xlu0 %3109  ;;  %v3815_v3 = vsel %vm1813_vm7, %v3783_v29, %v3236_v44  ;;  %v2378_v44 = vld [vmem:[#allocation2 + $0x170] sm:$0xff]  ;;  %v4716_v29 = vld [vmem:[%s4847_s24 + $0x58] sm:$0xff] }
 0x57d   : > { %v4599_v28 = vpop.f32.mrb[6].mxu1  ;;  %v3784_v59 = vsel %vm1780_vm6, %v3752_v45, %v3110_v25  ;;  %v3689_v25 = vsel %vm257_vm0, %v2377_v30, %v8249_v47  ;;  %v4721_v45 = vld [vmem:[%s4847_s24 + $0x70] sm:$0xff] }
 0x57e   : > { %v4123_v12 = vadd.f32 %v4599_v28, %v7476_v54  ;;  %v4117_v51 = vpop.f32.mrb[7].mxu1  ;;  %v3690_v28 = vsel %vm257_vm0, %v2378_v44, %v8250_v48  ;;  %v4725_v44 = vld [vmem:[%s4847_s24 + $0x90] sm:$0xff] }
 0x57f   : > { %v4118_v21 = vadd.f32 %v7476_v54, %v4117_v51  ;;  %v3238_v42 = vpop.permute.xlu1 %3237 }
 0x580   : > { %v4253_v36 = vadd.f32 %v4712_v61, %v4123_v12  ;;  %v3618_v26 = vpop.permute.xlu0 %3617  ;;  %v3816_v57 = vsel %vm1813_vm7, %v3784_v59, %v3238_v42  ;;  %v3721_v12 = vsel %vm1714_vm4, %v3689_v25, %v8251_v34 }
 0x581   : > { %v4252_v49 = vadd.f32 %v4713_v37, %v4118_v21  ;;  %v3910_v33 = vsel %vm1912_vm10, %v3878_v11, %v3618_v26  ;;  %v3722_v21 = vsel %vm1714_vm4, %v3690_v28, %v8252_v18  ;;  %v4727_v18 = vld [vmem:[%s4847_s24 + $0xa0] sm:$0xff] }
 0x582   : > { %4285 = vst.msk [vmem:[%s7489_s13 + $0x38] sm:$0xff] %vm257_vm0, %v4253_v36  ;;  %4628 = vmatmul.mubr.msk.f32.gmra.mrb[26].mxu1 %vm1952_vm11, %v3910_v33 }
 0x583   : > { %4284 = vst.msk [vmem:[%s7489_s13 + $0x30] sm:$0xff] %vm257_vm0, %v4252_v49  ;;  %v2984_v55 = vpop.permute.xlu1 %2983 }
 0x584   : > { %v3364_v22 = vpop.permute.xlu0 %3363  ;;  %v3753_v42 = vsel %vm1747_vm5, %v3721_v12, %v2984_v55  ;;  %v4726_v12 = vld [vmem:[%s4847_s24 + $0xa8] sm:$0xff] }
 0x585   : > { %v3847_v32 = vsel %vm1846_vm8, %v3815_v3, %v3364_v22  ;;  %v4717_v3 = vld [vmem:[%s4847_s24 + $0x50] sm:$0xff] }
 0x587   : > { %v3492_v15 = vpop.permute.xlu1 %3491 }
 0x588   : > { %v3366_v10 = vpop.permute.xlu0 %3365  ;;  %v3879_v63 = vsel %vm1879_vm9, %v3847_v32, %v3492_v15 }
 0x589   : > { %v3848_v19 = vsel %vm1846_vm8, %v3816_v57, %v3366_v10 }
 0x58b   : > { %v3112_v39 = vpop.permute.xlu1 %3111 }
 0x58c   : > { %v2986_v14 = vpop.permute.xlu0 %2985  ;;  %v3785_v61 = vsel %vm1780_vm6, %v3753_v42, %v3112_v39 }
 0x58d   : > { %v3754_v36 = vsel %vm1747_vm5, %v3722_v21, %v2986_v14 }
 0x58f   : > { %v3620_v52 = vpop.permute.xlu1 %3619 }
 0x590   : > { %v3911_v2 = vsel %vm1912_vm10, %v3879_v63, %v3620_v52  ;;  %v3494_v53 = vpop.permute.xlu0 %3493 }
 0x591   : > { %v4602_v27 = vpop.f32.mrb[8].mxu1  ;;  %4630 = vmatprep.mubr.msk.f32.mxu1 %vm1952_vm11, %v3911_v2  ;;  %v3880_v20 = vsel %vm1879_vm9, %v3848_v19, %v3494_v53  ;;  %v4723_v19 = vld [vmem:[%s4847_s24 + $0x80] sm:$0xff] }
 0x592   : > { %v4133_v58 = vadd.f32 %v4602_v27, %v7476_v54  ;;  %v4127_v9 = vpop.f32.mrb[9].mxu1 }
 0x593   : > { %v4128_v8 = vadd.f32 %v7476_v54, %v4127_v9  ;;  %v3240_v1 = vpop.permute.xlu1 %3239 }
 0x594   : > { %v4255_v60 = vadd.f32 %v4714_v43, %v4133_v58  ;;  %v3114_v35 = vpop.permute.xlu0 %3113  ;;  %v3817_v26 = vsel %vm1813_vm7, %v3785_v61, %v3240_v1 }
 0x595   : > { %v4254_v40 = vadd.f32 %v4715_v38, %v4128_v8  ;;  %v3786_v37 = vsel %vm1780_vm6, %v3754_v36, %v3114_v35  ;;  %v4720_v8 = vld [vmem:[%s4847_s24 + $0x78] sm:$0xff] }
 0x596   : > { %4287 = vst.msk [vmem:[%s7489_s13 + $0x48] sm:$0xff] %vm257_vm0, %v4255_v60 }
 0x597   : > { %4286 = vst.msk [vmem:[%s7489_s13 + $0x40] sm:$0xff] %vm257_vm0, %v4254_v40  ;;  %v3242_v41 = vpop.permute.xlu1 %3241  ;;  %v4722_v40 = vld [vmem:[%s4847_s24 + $0x88] sm:$0xff] }
 0x598   : > { %v3622_v46 = vpop.permute.xlu0 %3621  ;;  %v3818_v49 = vsel %vm1813_vm7, %v3786_v37, %v3242_v41 }
 0x599   : > { %v3912_v17 = vsel %vm1912_vm10, %v3880_v20, %v3622_v46 }
 0x59a   : > { %4631 = vmatmul.mubr.msk.f32.gmra.mrb[28].mxu1 %vm1952_vm11, %v3912_v17 }
 0x59b   : > { %v3370_v7 = vpop.permute.xlu1 %3369 }
 0x59c   : > { %v3368_v16 = vpop.permute.xlu0 %3367  ;;  %v3850_v15 = vsel %vm1846_vm8, %v3818_v49, %v3370_v7  ;;  %v4729_v49 = vld [vmem:[%s4847_s24 + $0xb0] sm:$0xff] }
 0x59d   : > { %v3849_v33 = vsel %vm1846_vm8, %v3817_v26, %v3368_v16  ;;  %v4724_v16 = vld [vmem:[%s4847_s24 + $0x98] sm:$0xff] }
 0x59e   : > { %v4728_v26 = vld [vmem:[%s4847_s24 + $0xb8] sm:$0xff] }
 0x59f   : > { %v3498_v51 = vpop.permute.xlu1 %3497 }
 0x5a0   : > { %v3496_v11 = vpop.permute.xlu0 %3495  ;;  %v3882_v10 = vsel %vm1879_vm9, %v3850_v15, %v3498_v51 }
 0x5a1   : > { %v3881_v55 = vsel %vm1879_vm9, %v3849_v33, %v3496_v11 }
 0x5a3   : > { %v3626_v22 = vpop.permute.xlu1 %3625 }
 0x5a4   : > { %v3624_v31 = vpop.permute.xlu0 %3623  ;;  %v3914_v0 = vsel %vm1912_vm10, %v3882_v10, %v3626_v22  ;;  %v4730_v10 = vld [vmem:[%s4847_s24 + $0xc8] sm:$0xff] }
 0x5a5   : > { %v3913_v13 = vsel %vm1912_vm10, %v3881_v55, %v3624_v31  ;;  %v4605_v4 = vpop.f32.mrb[10].mxu1 }
 0x5a6   : > { %v4143_v23 = vadd.f32 %v4605_v4, %v7476_v54  ;;  %v4137_v50 = vpop.f32.mrb[11].mxu1  ;;  %4633 = vmatprep.mubr.msk.f32.mxu1 %vm1952_vm11, %v3913_v13  ;;  %v4731_v4 = vld [vmem:[%s4847_s24 + $0xc0] sm:$0xff] }
 0x5a7   : > { %v4138_v39 = vadd.f32 %v7476_v54, %v4137_v50  ;;  %4634 = vmatmul.mubr.msk.f32.gmra.mrb[30].mxu1 %vm1952_vm11, %v3914_v0 }
 0x5a8   : > { %v4257_v14 = vadd.f32 %v4716_v29, %v4143_v23 }
 0x5a9   : > { %v4256_v32 = vadd.f32 %v4717_v3, %v4138_v39 }
 0x5aa   : > { %4289 = vst.msk [vmem:[%s7489_s13 + $0x58] sm:$0xff] %vm257_vm0, %v4257_v14  ;;  %v4732_v14 = vld [vmem:[%s4847_s24 + $0xd8] sm:$0xff] }
 0x5ab   : > { %4288 = vst.msk [vmem:[%s7489_s13 + $0x50] sm:$0xff] %vm257_vm0, %v4256_v32  ;;  %v4733_v32 = vld [vmem:[%s4847_s24 + $0xd0] sm:$0xff] }
 0x5b9   : > { %v4608_v63 = vpop.f32.mrb[12].mxu1 }
 0x5ba   : > { %v4153_v52 = vadd.f32 %v4608_v63, %v7476_v54  ;;  %v4147_v2 = vpop.f32.mrb[13].mxu1 }
 0x5bb   : > { %v4148_v53 = vadd.f32 %v7476_v54, %v4147_v2 }
 0x5bc   : > { %v4259_v27 = vadd.f32 %v4718_v24, %v4153_v52 }
 0x5bd   : > { %v4258_v56 = vadd.f32 %v4719_v5, %v4148_v53 }
 0x5be   : > { %4291 = vst.msk [vmem:[%s7489_s13 + $0x68] sm:$0xff] %vm257_vm0, %v4259_v27  ;;  %v4734_v27 = vld [vmem:[%s4847_s24 + $0xe8] sm:$0xff] }
 0x5bf   : > { %4290 = vst.msk [vmem:[%s7489_s13 + $0x60] sm:$0xff] %vm257_vm0, %v4258_v56  ;;  %v4735_v56 = vld [vmem:[%s4847_s24 + $0xe0] sm:$0xff] }
 0x5cd   : > { %v4611_v58 = vpop.f32.mrb[14].mxu1 }
 0x5ce   : > { %v4163_v9 = vadd.f32 %v4611_v58, %v7476_v54  ;;  %v4157_v6 = vpop.f32.mrb[15].mxu1 }
 0x5cf   : > { %v4158_v62 = vadd.f32 %v7476_v54, %v4157_v6 }
 0x5d0   : > { %v4261_v1 = vadd.f32 %v4720_v8, %v4163_v9 }
 0x5d1   : > { %v4260_v43 = vadd.f32 %v4721_v45, %v4158_v62 }
 0x5d2   : > { %4293 = vst.msk [vmem:[%s7489_s13 + $0x78] sm:$0xff] %vm257_vm0, %v4261_v1  ;;  %v4736_v1 = vld [vmem:[%s4847_s24 + $0xf8] sm:$0xff] }
 0x5d3   : > { %4292 = vst.msk [vmem:[%s7489_s13 + $0x70] sm:$0xff] %vm257_vm0, %v4260_v43  ;;  %v4737_v43 = vld [vmem:[%s4847_s24 + $0xf0] sm:$0xff] }
 0x5e1   : > { %v4614_v60 = vpop.f32.mrb[16].mxu1 }
 0x5e2   : > { %v4173_v35 = vadd.f32 %v4614_v60, %v7476_v54  ;;  %v4167_v59 = vpop.f32.mrb[17].mxu1 }
 0x5e3   : > { %v4168_v38 = vadd.f32 %v7476_v54, %v4167_v59 }
 0x5e4   : > { %v4263_v57 = vadd.f32 %v4722_v40, %v4173_v35 }
 0x5e5   : > { %v4262_v41 = vadd.f32 %v4723_v19, %v4168_v38 }
 0x5e6   : > { %4295 = vst.msk [vmem:[%s7489_s13 + $0x88] sm:$0xff] %vm257_vm0, %v4263_v57 }
 0x5e7   : > { %4294 = vst.msk [vmem:[%s7489_s13 + $0x80] sm:$0xff] %vm257_vm0, %v4262_v41 }
 0x5f5   : > { %v4617_v20 = vpop.f32.mrb[18].mxu1 }
 0x5f6   : > { %v4183_v46 = vadd.f32 %v4617_v20, %v7476_v54  ;;  %v4177_v17 = vpop.f32.mrb[19].mxu1 }
 0x5f7   : > { %v4178_v7 = vadd.f32 %v7476_v54, %v4177_v17 }
 0x5f8   : > { %v4265_v30 = vadd.f32 %v4724_v16, %v4183_v46 }
 0x5f9   : > { %v4264_v47 = vadd.f32 %v4725_v44, %v4178_v7 }
 0x5fa   : > { %4297 = vst.msk [vmem:[%s7489_s13 + $0x98] sm:$0xff] %vm257_vm0, %v4265_v30 }
 0x5fb   : > { %4296 = vst.msk [vmem:[%s7489_s13 + $0x90] sm:$0xff] %vm257_vm0, %v4264_v47 }
 0x60d   : > { %v4620_v25 = vpop.f32.mrb[20].mxu1 }
 0x60e   : > { %v4193_v48 = vadd.f32 %v4620_v25, %v7476_v54  ;;  %v4187_v28 = vpop.f32.mrb[21].mxu1 }
 0x60f   : > { %v4188_v34 = vadd.f32 %v7476_v54, %v4187_v28 }
 0x610   : > { %v4267_v51 = vadd.f32 %v4726_v12, %v4193_v48 }
 0x611   : > { %v4266_v21 = vadd.f32 %v4727_v18, %v4188_v34 }
 0x612   : > { %4299 = vst.msk [vmem:[%s7489_s13 + $0xa8] sm:$0xff] %vm257_vm0, %v4267_v51 }
 0x613   : > { %4298 = vst.msk [vmem:[%s7489_s13 + $0xa0] sm:$0xff] %vm257_vm0, %v4266_v21 }
 0x625   : > { %v4623_v42 = vpop.f32.mrb[22].mxu1 }
 0x626   : > { %v4203_v11 = vadd.f32 %v4623_v42, %v7476_v54  ;;  %v4197_v61 = vpop.f32.mrb[23].mxu1 }
 0x627   : > { %v4198_v36 = vadd.f32 %v7476_v54, %v4197_v61 }
 0x628   : > { %v4269_v37 = vadd.f32 %v4728_v26, %v4203_v11 }
 0x629   : > { %v4268_v33 = vadd.f32 %v4729_v49, %v4198_v36 }
 0x62a   : > { %4301 = vst.msk [vmem:[%s7489_s13 + $0xb8] sm:$0xff] %vm257_vm0, %v4269_v37 }
 0x62b   : > { %4300 = vst.msk [vmem:[%s7489_s13 + $0xb0] sm:$0xff] %vm257_vm0, %v4268_v33 }
 0x63d   : > { %v4626_v22 = vpop.f32.mrb[24].mxu1 }
 0x63e   : > { %v4213_v15 = vadd.f32 %v4626_v22, %v7476_v54  ;;  %v4207_v55 = vpop.f32.mrb[25].mxu1 }
 0x63f   : > { %v4208_v31 = vadd.f32 %v7476_v54, %v4207_v55 }
 0x640   : > { %v4271_v13 = vadd.f32 %v4730_v10, %v4213_v15 }
 0x641   : > { %v4270_v0 = vadd.f32 %v4731_v4, %v4208_v31 }
 0x642   : > { %4303 = vst.msk [vmem:[%s7489_s13 + $0xc8] sm:$0xff] %vm257_vm0, %v4271_v13 }
 0x643   : > { %4302 = vst.msk [vmem:[%s7489_s13 + $0xc0] sm:$0xff] %vm257_vm0, %v4270_v0 }
 0x655   : > { %v4629_v23 = vpop.f32.mrb[26].mxu1 }
 0x656   : > { %v4223_v50 = vadd.f32 %v4629_v23, %v7476_v54  ;;  %v4217_v39 = vpop.f32.mrb[27].mxu1 }
 0x657   : > { %v4218_v29 = vadd.f32 %v7476_v54, %v4217_v39 }
 0x658   : > { %v4273_v3 = vadd.f32 %v4732_v14, %v4223_v50 }
 0x659   : > { %v4272_v63 = vadd.f32 %v4733_v32, %v4218_v29 }
 0x65a   : > { %4305 = vst.msk [vmem:[%s7489_s13 + $0xd8] sm:$0xff] %vm257_vm0, %v4273_v3 }
 0x65b   : > { %4304 = vst.msk [vmem:[%s7489_s13 + $0xd0] sm:$0xff] %vm257_vm0, %v4272_v63 }
 0x66d   : > { %v4632_v52 = vpop.f32.mrb[28].mxu1 }
 0x66e   : > { %v4233_v2 = vadd.f32 %v4632_v52, %v7476_v54  ;;  %v4227_v53 = vpop.f32.mrb[29].mxu1 }
 0x66f   : > { %v4228_v24 = vadd.f32 %v7476_v54, %v4227_v53 }
 0x670   : > { %v4275_v5 = vadd.f32 %v4734_v27, %v4233_v2 }
 0x671   : > { %v4274_v58 = vadd.f32 %v4735_v56, %v4228_v24 }
 0x672   : > { %4307 = vst.msk [vmem:[%s7489_s13 + $0xe8] sm:$0xff] %vm257_vm0, %v4275_v5 }
 0x673   : > { %4306 = vst.msk [vmem:[%s7489_s13 + $0xe0] sm:$0xff] %vm257_vm0, %v4274_v58 }
 0x67a   : > { %v4635_v9 = vpop.f32.mrb[30].mxu1 }
 0x67b   : > { %v4243_v6 = vadd.f32 %v4635_v9, %v7476_v54  ;;  %v4237_v62 = vpop.f32.mrb[31].mxu1 }
 0x67c   : > { %v4238_v8 = vadd.f32 %v7476_v54, %v4237_v62 }
 0x67d   : > { %v4277_v45 = vadd.f32 %v4736_v1, %v4243_v6 }
 0x67e   : > { %v4276_v60 = vadd.f32 %v4737_v43, %v4238_v8 }
 0x67f   : > { %4309 = vst.msk [vmem:[%s7489_s13 + $0xf8] sm:$0xff] %vm257_vm0, %v4277_v45 }
 0x680   : > { %4308 = vst.msk [vmem:[%s7489_s13 + $0xf0] sm:$0xff] %vm257_vm0, %v4276_v60 }
 0x681 PF: > { %s15_s18 = sadd.s32 1, %s4744_s18  }
 0x682   : > { %p12_p4 = scmp.ge.s32.totalorder %s15_s18, 4  }
 0x684   :  { %14 = sbr.rel (!%p12_p4) target bundleno = 1 (0x1), region = 73 }

</bundles_post_ra>
